<compile_context>
chip_gen: v7x
topology: tpu7x:2x2x1
jax: 0.10.0
libtpu: 0.0.40
codegen_flags: <defaults>
</compile_context>

<pallas_src>
import jax
import jax.numpy as jnp
import numpy as np
from jax import lax
from jax.experimental import pallas as pl
from jax.experimental.pallas import tpu as pltpu


# ---------------------------------------------------------------------------
# Kernel
# ---------------------------------------------------------------------------
def bigru_kernel(x_ref, lens_ref, winf_ref, winb_ref, binf_ref, binb_ref,
                 whf_ref, whb_ref, bhnf_ref, bhnb_ref,
                 out_ref, hT_ref,
                 gif_ref, gib_ref, outb_ref):
    """Fused bidirectional GRU over the whole (small) sequence in VMEM.

    x_ref     : (T*Bp, Hp)   bf16 embedded tokens (padded, seq-major, flattened)
    lens_ref  : (Bp, 1)      int32 valid lengths (0 for padded batch rows)
    winf/winb : (Hp, 3*Hp)   bf16 input weights per direction, per-gate padded
    binf/binb : (1, 3*Hp)    f32 folded biases (b_ih all gates + b_hh for r,z)
    whf/whb   : (Hp, 3*Hp)   bf16 hidden weights per direction
    bhnf/bhnb : (1, Hp)      f32 n-gate hidden bias per direction
    out_ref   : (T, Bp, Hp)  f32 fwd+bwd outputs (padded steps zero)
    hT_ref    : (2, Bp, Hp)  f32 final hidden per direction
    gif/gib   : (T, Bp, 3Hp) bf16 scratch: hoisted input projections
    outb_ref  : (T//2,Bp,Hp) f32 scratch: parked backward outputs (first half)
    """
    T, Bp, Hp = out_ref.shape
    H3 = 3 * Hp
    T_mid = T // 2          # iterations whose backward value is parked in outb
    base = T - T_mid        # first time index held in outb

    # ---- hoisted input projection: one MXU matmul per direction, fused with
    #      its bias add, stored straight into the bf16 gi scratch.
    gif_ref[...] = (jnp.dot(x_ref[...], winf_ref[...],
                            preferred_element_type=jnp.float32)
                    + binf_ref[...]).reshape(T, Bp, H3).astype(jnp.bfloat16)
    gib_ref[...] = (jnp.dot(x_ref[...], winb_ref[...],
                            preferred_element_type=jnp.float32)
                    + binb_ref[...]).reshape(T, Bp, H3).astype(jnp.bfloat16)

    whf = whf_ref[...]
    whb = whb_ref[...]
    # hoist the (1,Hp)->(Bp,Hp) broadcasts out of the recurrent loop
    bhnf = jnp.broadcast_to(bhnf_ref[...], (Bp, Hp))
    bhnb = jnp.broadcast_to(bhnb_ref[...], (Bp, Hp))
    lens = lens_ref[...]                                        # (Bp, 1) int32

    def gru_step(gi_t, h, wh, bhn):
        # gi_t (bf16) already contains b_ih (all gates) and b_hh (r,z gates).
        gi = gi_t.astype(jnp.float32)
        gh = jnp.dot(h.astype(jnp.bfloat16), wh,
                     preferred_element_type=jnp.float32)        # (Bp, 3Hp)
        r = jax.nn.sigmoid(gi[:, :Hp] + gh[:, :Hp])
        z = jax.nn.sigmoid(gi[:, Hp:2 * Hp] + gh[:, Hp:2 * Hp])
        n = jnp.tanh(gi[:, 2 * Hp:] + r * (gh[:, 2 * Hp:] + bhn))
        return n + z * (h - n)                                  # == (1-z)*n + z*h

    def step_pair(i, hf, hb):
        tb = T - 1 - i
        m_f = i < lens                                          # (Bp, 1) bool
        m_b = tb < lens
        hf_new = gru_step(gif_ref[i], hf, whf, bhnf)
        hb_new = gru_step(gib_ref[tb], hb, whb, bhnb)
        hf = jnp.where(m_f, hf_new, hf)                         # freeze past seq end
        hb = jnp.where(m_b, hb_new, hb)
        return hf, hb, tb, m_f, m_b

    # Phase A (i < T//2): forward value at tb not written yet -> park the
    # backward value in the half-size scratch.
    def body_a(i, carry):
        hf, hb = carry
        hf, hb, tb, m_f, m_b = step_pair(i, hf, hb)
        out_ref[i] = jnp.where(m_f, hf, 0.0)                    # padded outputs zero
        outb_ref[tb - base] = jnp.where(m_b, hb, 0.0)
        return hf, hb

    # Phase B (i >= T//2): forward value at tb already in out_ref -> accumulate
    # the backward value in place (no full-tensor read-modify-write at the end).
    def body_b(i, carry):
        hf, hb = carry
        hf, hb, tb, m_f, m_b = step_pair(i, hf, hb)
        out_ref[i] = jnp.where(m_f, hf, 0.0)
        out_ref[tb] = out_ref[tb] + jnp.where(m_b, hb, 0.0)
        return hf, hb

    h0 = jnp.zeros((Bp, Hp), jnp.float32)
    # Full unroll only for short sequences; a window of 2 is enough for the
    # scheduler to overlap the two directions' MXU pushes with the other
    # direction's VPU/EUP epilogue without blowing up code size / vregs.
    unroll = True if T <= 16 else 2
    hf, hb = lax.fori_loop(0, T_mid, body_a, (h0, h0), unroll=unroll)
    hf, hb = lax.fori_loop(T_mid, T, body_b, (hf, hb), unroll=unroll)
    hT_ref[0] = hf
    hT_ref[1] = hb

    # fold the parked backward half into the output (only T//2 slabs)
    if T_mid > 0:
        sl = pl.ds(base, T_mid)
        out_ref[sl] = out_ref[sl] + outb_ref[...]


# ---------------------------------------------------------------------------
# Wrapper (padding / layout plumbing + pallas_call)
# ---------------------------------------------------------------------------
def _round_up(x, m):
    return (x + m - 1) // m * m


def _pad_gate_weight_T(w, H, Hp):
    """PyTorch (3H, H) rows [r; z; n] -> (Hp, 3Hp) cols [r|z|n], per-gate padded."""
    wt = jnp.asarray(w).T                                       # (H, 3H)
    cols = []
    for g in range(3):
        blk = wt[:, g * H:(g + 1) * H]                          # (H, H)
        cols.append(jnp.pad(blk, ((0, Hp - H), (0, Hp - H))))
    return jnp.concatenate(cols, axis=1)                        # (Hp, 3Hp)


def _pad_gate_bias(b, H, Hp):
    return jnp.concatenate(
        [jnp.pad(b[g * H:(g + 1) * H], (0, Hp - H)) for g in range(3)])  # (3Hp,)


def _physical_vmem_bytes():
    try:
        return int(pltpu.get_tpu_info().vmem_capacity_bytes)
    except Exception:
        return 64 * 1024 * 1024          # conservative (v7x per-TensorCore)


def _vmem_limit_bytes(T, Bp, Hp):
    elem = T * Bp * Hp
    need = (
        2 * elem                                  # x (bf16)
        + 12 * elem                               # gif + gib scratch (bf16, 3Hp lanes)
        + 12 * elem                               # f32 projection transient (one dir)
        + 4 * elem                                # out (f32)
        + 4 * max(T // 2, 1) * Bp * Hp            # outb park scratch (f32)
        + 24 * Hp * Hp                            # 4 weight matrices (bf16, 3Hp lanes)
        + 8 * Bp * Hp                             # hT
        + (1 << 20)                               # biases / lens / slack
    )
    need = int(need * 1.25)                       # regalloc / pipelining headroom
    cap = int(_physical_vmem_bytes() * 0.75)      # leave DMA headroom
    return max(min(need, cap), 16 * 1024 * 1024)


def encoder_rnn_forward(input_seq, input_lengths, params):
    """input_seq: (T, B) int32 token ids; input_lengths: (B,) int32."""
    H = params["embedding"].shape[1]
    # TODO(synk): embedding gather + pad/unpad plumbing stay as plain-JAX glue.
    emb = params["embedding"][input_seq]                        # (T, B, H)
    T, B, _ = emb.shape
    Hp = _round_up(H, 128)                                      # lane-dense hidden
    Bp = max(_round_up(B, 16), 16)                              # bf16: 2 rows/sublane

    # embedded input: pad (B->Bp, H->Hp), bf16 for the MXU, flattened to (T*Bp, Hp)
    x = jnp.pad(emb.astype(jnp.float32),
                ((0, 0), (0, Bp - B), (0, Hp - H))).astype(jnp.bfloat16)
    x2d = x.reshape(T * Bp, Hp)

    lens = jnp.pad(input_lengths.astype(jnp.int32), (0, Bp - B)).reshape(Bp, 1)

    # weights: per-gate padded, transposed; one input-weight matrix per direction
    winf = _pad_gate_weight_T(params["w_ih_f"], H, Hp).astype(jnp.bfloat16)
    winb = _pad_gate_weight_T(params["w_ih_b"], H, Hp).astype(jnp.bfloat16)
    whf = _pad_gate_weight_T(params["w_hh_f"], H, Hp).astype(jnp.bfloat16)
    whb = _pad_gate_weight_T(params["w_hh_b"], H, Hp).astype(jnp.bfloat16)

    bihf = _pad_gate_bias(params["b_ih_f"], H, Hp)
    bhhf = _pad_gate_bias(params["b_hh_f"], H, Hp)
    bihb = _pad_gate_bias(params["b_ih_b"], H, Hp)
    bhhb = _pad_gate_bias(params["b_hh_b"], H, Hp)

    def fold(bih, bhh):   # r,z gates: b_ih + b_hh ; n gate: b_ih only
        return jnp.concatenate([bih[:2 * Hp] + bhh[:2 * Hp], bih[2 * Hp:]])[None, :]

    binf = fold(bihf, bhhf).astype(jnp.float32)                 # (1, 3Hp)
    binb = fold(bihb, bhhb).astype(jnp.float32)
    bhnf = bhhf[2 * Hp:][None, :].astype(jnp.float32)           # (1, Hp)
    bhnb = bhhb[2 * Hp:][None, :].astype(jnp.float32)

    vmem = pl.BlockSpec(memory_space=pltpu.MemorySpace.VMEM)
    args = (x2d, lens, winf, winb, binf, binb, whf, whb, bhnf, bhnb)

    out_full, h_full = pl.pallas_call(
        bigru_kernel,
        out_shape=(jax.ShapeDtypeStruct((T, Bp, Hp), jnp.float32),
                   jax.ShapeDtypeStruct((2, Bp, Hp), jnp.float32)),
        in_specs=[vmem] * len(args),
        out_specs=(vmem, vmem),
        scratch_shapes=[pltpu.VMEM((T, Bp, 3 * Hp), jnp.bfloat16),        # gi fwd
                        pltpu.VMEM((T, Bp, 3 * Hp), jnp.bfloat16),        # gi bwd
                        pltpu.VMEM((max(T // 2, 1), Bp, Hp), jnp.float32)],  # bwd park
        compiler_params=pltpu.CompilerParams(
            vmem_limit_bytes=_vmem_limit_bytes(T, Bp, Hp)),
    )(*args)

    # strip padding back to the module's shapes
    return out_full[:, :B, :H], h_full[:, :B, :H]


# ---------------------------------------------------------------------------
# Pure-JAX reference (mirrors PyTorch packed bidirectional GRU, f32 HIGHEST)
# ---------------------------------------------------------------------------
def encoder_rnn_reference(input_seq, input_lengths, params):
    emb = params["embedding"][input_seq].astype(jnp.float32)
    T, B, H = emb.shape
    mask = (jnp.arange(T)[:, None] < input_lengths[None, :]).astype(jnp.float32)[:, :, None]
    hp = lax.Precision.HIGHEST

    def cell(x_t, h, wi, wh, bi, bh):
        gi = jnp.dot(x_t, wi.T, precision=hp) + bi
        gh = jnp.dot(h, wh.T, precision=hp) + bh
        r = jax.nn.sigmoid(gi[:, :H] + gh[:, :H])
        z = jax.nn.sigmoid(gi[:, H:2 * H] + gh[:, H:2 * H])
        n = jnp.tanh(gi[:, 2 * H:] + r * gh[:, 2 * H:])
        return (1.0 - z) * n + z * h

    def make_step(wi, wh, bi, bh):
        def step(h, xm):
            x_t, m = xm
            h_new = cell(x_t, h, wi, wh, bi, bh)
            h = m * h_new + (1.0 - m) * h
            return h, m * h
        return step

    h0 = jnp.zeros((B, H), jnp.float32)
    hf, out_f = lax.scan(make_step(params["w_ih_f"], params["w_hh_f"],
                                   params["b_ih_f"], params["b_hh_f"]),
                         h0, (emb, mask))
    hb, out_b_rev = lax.scan(make_step(params["w_ih_b"], params["w_hh_b"],
                                       params["b_ih_b"], params["b_hh_b"]),
                             h0, (emb[::-1], mask[::-1]))
    out_b = out_b_rev[::-1]
    return out_f + out_b, jnp.stack([hf, hb], axis=0)


# ---------------------------------------------------------------------------
if __name__ == "__main__":
    T, B, H, VOCAB = 8, 2, 32, 50   # small stand-ins (module uses hidden_size=500)

    key = jax.random.PRNGKey(0)
    ks = jax.random.split(key, 12)
    bound = 1.0 / np.sqrt(H)

    def u(k, shape):
        return jax.random.uniform(k, shape, jnp.float32, -bound, bound)

    params = {
        "embedding": jax.random.normal(ks[0], (VOCAB, H), jnp.float32),
        # forward direction GRU weights (PyTorch layout: (3H, H) / (3H,))
        "w_ih_f": u(ks[1], (3 * H, H)),
        "w_hh_f": u(ks[2], (3 * H, H)),
        "b_ih_f": u(ks[3], (3 * H,)),
        "b_hh_f": u(ks[4], (3 * H,)),
        # backward direction
        "w_ih_b": u(ks[5], (3 * H, H)),
        "w_hh_b": u(ks[6], (3 * H, H)),
        "b_ih_b": u(ks[7], (3 * H,)),
        "b_hh_b": u(ks[8], (3 * H,)),
    }

    input_seq = jax.random.randint(ks[9], (T, B), 0, VOCAB, dtype=jnp.int32)
    input_lengths = jnp.array([T, 5], dtype=jnp.int32)  # sorted desc, like pack_padded_sequence

    outputs, hidden = jax.jit(encoder_rnn_forward)(input_seq, input_lengths, params)
    jax.block_until_ready((outputs, hidden))

    ref_out, ref_hid = encoder_rnn_reference(input_seq, input_lengths, params)
    # bf16 MXU operands + bf16 gi scratch (vs the f32 HIGHEST reference) widen the error.
    np.testing.assert_allclose(np.asarray(outputs), np.asarray(ref_out), rtol=2e-2, atol=2e-2)
    np.testing.assert_allclose(np.asarray(hidden), np.asarray(ref_hid), rtol=2e-2, atol=2e-2)

    assert outputs.shape == (T, B, H) and hidden.shape == (2, B, H)
    print("KERNEL_OK")
</pallas_src>

<mosaic_0001>
module attributes {stable_mosaic.version = 11 : i64} {
  func.func @bigru_kernel(%arg0: memref<128x128xbf16, #tpu.memory_space<vmem>>, %arg1: memref<16x1xi32, #tpu.memory_space<vmem>>, %arg2: memref<128x384xbf16, #tpu.memory_space<vmem>>, %arg3: memref<128x384xbf16, #tpu.memory_space<vmem>>, %arg4: memref<1x384xf32, #tpu.memory_space<vmem>>, %arg5: memref<1x384xf32, #tpu.memory_space<vmem>>, %arg6: memref<128x384xbf16, #tpu.memory_space<vmem>>, %arg7: memref<128x384xbf16, #tpu.memory_space<vmem>>, %arg8: memref<1x128xf32, #tpu.memory_space<vmem>>, %arg9: memref<1x128xf32, #tpu.memory_space<vmem>>, %arg10: memref<8x16x128xf32, #tpu.memory_space<vmem>>, %arg11: memref<2x16x128xf32, #tpu.memory_space<vmem>>, %arg12: memref<8x16x384xbf16, #tpu.memory_space<vmem>>, %arg13: memref<8x16x384xbf16, #tpu.memory_space<vmem>>, %arg14: memref<4x16x128xf32, #tpu.memory_space<vmem>>) attributes {dimension_semantics = [], scalar_prefetch = 0 : i64, scratch_operands = 3 : i64, tpu.core_type = #tpu.core_type<tc>} {
    %c0 = arith.constant 0 : index
    %c0_0 = arith.constant 0 : index
    %0 = vector.load %arg0[%c0, %c0_0] : memref<128x128xbf16, #tpu.memory_space<vmem>>, vector<128x128xbf16>
    %c0_1 = arith.constant 0 : index
    %c0_2 = arith.constant 0 : index
    %1 = vector.load %arg2[%c0_1, %c0_2] : memref<128x384xbf16, #tpu.memory_space<vmem>>, vector<128x384xbf16>
    %cst = arith.constant dense<0.000000e+00> : vector<128x384xf32>
    %2 = tpu.matmul %0, %1, %cst {dimension_numbers = #tpu.dot_dimension_numbers<[1], [0], [0], [1], [0, 0, 1, 1], [], []>} : vector<128x128xbf16>, vector<128x384xbf16>, vector<128x384xf32> -> vector<128x384xf32>
    %c0_3 = arith.constant 0 : index
    %c0_4 = arith.constant 0 : index
    %3 = vector.load %arg4[%c0_3, %c0_4] : memref<1x384xf32, #tpu.memory_space<vmem>>, vector<1x384xf32>
    %4 = vector.broadcast %3 : vector<1x384xf32> to vector<128x384xf32>
    %5 = arith.addf %2, %4 : vector<128x384xf32>
    %6 = vector.shape_cast %5 : vector<128x384xf32> to vector<8x16x384xf32>
    %7 = arith.truncf %6 : vector<8x16x384xf32> to vector<8x16x384xbf16>
    %c0_5 = arith.constant 0 : index
    %c0_6 = arith.constant 0 : index
    %c0_7 = arith.constant 0 : index
    %8 = vector.load %arg12[%c0_5, %c0_6, %c0_7] : memref<8x16x384xbf16, #tpu.memory_space<vmem>>, vector<8x16x384xbf16>
    tpu.vector_store %arg12[%c0_5, %c0_6, %c0_7], %7 {strides = array<i32>} : memref<8x16x384xbf16, #tpu.memory_space<vmem>>, vector<8x16x384xbf16>,
    %c0_8 = arith.constant 0 : index
    %c0_9 = arith.constant 0 : index
    %9 = vector.load %arg0[%c0_8, %c0_9] : memref<128x128xbf16, #tpu.memory_space<vmem>>, vector<128x128xbf16>
    %c0_10 = arith.constant 0 : index
    %c0_11 = arith.constant 0 : index
    %10 = vector.load %arg3[%c0_10, %c0_11] : memref<128x384xbf16, #tpu.memory_space<vmem>>, vector<128x384xbf16>
    %cst_12 = arith.constant dense<0.000000e+00> : vector<128x384xf32>
    %11 = tpu.matmul %9, %10, %cst_12 {dimension_numbers = #tpu.dot_dimension_numbers<[1], [0], [0], [1], [0, 0, 1, 1], [], []>} : vector<128x128xbf16>, vector<128x384xbf16>, vector<128x384xf32> -> vector<128x384xf32>
    %c0_13 = arith.constant 0 : index
    %c0_14 = arith.constant 0 : index
    %12 = vector.load %arg5[%c0_13, %c0_14] : memref<1x384xf32, #tpu.memory_space<vmem>>, vector<1x384xf32>
    %13 = vector.broadcast %12 : vector<1x384xf32> to vector<128x384xf32>
    %14 = arith.addf %11, %13 : vector<128x384xf32>
    %15 = vector.shape_cast %14 : vector<128x384xf32> to vector<8x16x384xf32>
    %16 = arith.truncf %15 : vector<8x16x384xf32> to vector<8x16x384xbf16>
    %c0_15 = arith.constant 0 : index
    %c0_16 = arith.constant 0 : index
    %c0_17 = arith.constant 0 : index
    %17 = vector.load %arg13[%c0_15, %c0_16, %c0_17] : memref<8x16x384xbf16, #tpu.memory_space<vmem>>, vector<8x16x384xbf16>
    tpu.vector_store %arg13[%c0_15, %c0_16, %c0_17], %16 {strides = array<i32>} : memref<8x16x384xbf16, #tpu.memory_space<vmem>>, vector<8x16x384xbf16>,
    %c0_18 = arith.constant 0 : index
    %c0_19 = arith.constant 0 : index
    %18 = vector.load %arg6[%c0_18, %c0_19] : memref<128x384xbf16, #tpu.memory_space<vmem>>, vector<128x384xbf16>
    %c0_20 = arith.constant 0 : index
    %c0_21 = arith.constant 0 : index
    %19 = vector.load %arg7[%c0_20, %c0_21] : memref<128x384xbf16, #tpu.memory_space<vmem>>, vector<128x384xbf16>
    %c0_22 = arith.constant 0 : index
    %c0_23 = arith.constant 0 : index
    %20 = vector.load %arg8[%c0_22, %c0_23] : memref<1x128xf32, #tpu.memory_space<vmem>>, vector<1x128xf32>
    %21 = vector.shape_cast %20 : vector<1x128xf32> to vector<1x128xf32>
    %22 = vector.broadcast %21 : vector<1x128xf32> to vector<16x128xf32>
    %c0_24 = arith.constant 0 : index
    %c0_25 = arith.constant 0 : index
    %23 = vector.load %arg9[%c0_24, %c0_25] : memref<1x128xf32, #tpu.memory_space<vmem>>, vector<1x128xf32>
    %24 = vector.shape_cast %23 : vector<1x128xf32> to vector<1x128xf32>
    %25 = vector.broadcast %24 : vector<1x128xf32> to vector<16x128xf32>
    %c0_26 = arith.constant 0 : index
    %c0_27 = arith.constant 0 : index
    %26 = vector.load %arg1[%c0_26, %c0_27] : memref<16x1xi32, #tpu.memory_space<vmem>>, vector<16x1xi32>
    %cst_28 = arith.constant 0.000000e+00 : f32
    %27 = vector.broadcast %cst_28 : f32 to vector<16x128xf32>
    %c0_i32 = arith.constant 0 : i32
    %c7_i32 = arith.constant 7 : i32
    %28 = arith.subi %c7_i32, %c0_i32 : i32
    %29 = vector.broadcast %c0_i32 : i32 to vector<16x1xi32>
    %30 = arith.cmpi slt, %29, %26 : vector<16x1xi32>
    %31 = vector.broadcast %28 : i32 to vector<16x1xi32>
    %32 = arith.cmpi slt, %31, %26 : vector<16x1xi32>
    %33 = arith.index_cast %c0_i32 : i32 to index
    %c0_29 = arith.constant 0 : index
    %c0_30 = arith.constant 0 : index
    %34 = vector.load %arg12[%33, %c0_29, %c0_30] : memref<8x16x384xbf16, #tpu.memory_space<vmem>>, vector<1x16x384xbf16>
    %35 = vector.shape_cast %34 : vector<1x16x384xbf16> to vector<16x384xbf16>
    %36 = arith.extf %35 : vector<16x384xbf16> to vector<16x384xf32>
    %37 = arith.truncf %27 : vector<16x128xf32> to vector<16x128xbf16>
    %cst_31 = arith.constant dense<0.000000e+00> : vector<16x384xf32>
    %38 = tpu.matmul %37, %18, %cst_31 {dimension_numbers = #tpu.dot_dimension_numbers<[1], [0], [0], [1], [0, 0, 1, 1], [], []>} : vector<16x128xbf16>, vector<128x384xbf16>, vector<16x384xf32> -> vector<16x384xf32>
    %39 = vector.extract_strided_slice %36 {offsets = [0, 0], sizes = [16, 128], strides = [1, 1]} : vector<16x384xf32> to vector<16x128xf32>
    %40 = vector.extract_strided_slice %38 {offsets = [0, 0], sizes = [16, 128], strides = [1, 1]} : vector<16x384xf32> to vector<16x128xf32>
    %41 = arith.addf %39, %40 : vector<16x128xf32>
    %42 = arith.negf %41 : vector<16x128xf32>
    %43 = math.exp %42 : vector<16x128xf32>
    %cst_32 = arith.constant 1.000000e+00 : f32
    %44 = vector.broadcast %cst_32 : f32 to vector<16x128xf32>
    %45 = arith.addf %44, %43 : vector<16x128xf32>
    %46 = arith.divf %44, %45 : vector<16x128xf32>
    %47 = vector.extract_strided_slice %36 {offsets = [0, 128], sizes = [16, 128], strides = [1, 1]} : vector<16x384xf32> to vector<16x128xf32>
    %48 = vector.extract_strided_slice %38 {offsets = [0, 128], sizes = [16, 128], strides = [1, 1]} : vector<16x384xf32> to vector<16x128xf32>
    %49 = arith.addf %47, %48 : vector<16x128xf32>
    %50 = arith.negf %49 : vector<16x128xf32>
    %51 = math.exp %50 : vector<16x128xf32>
    %cst_33 = arith.constant 1.000000e+00 : f32
    %52 = vector.broadcast %cst_33 : f32 to vector<16x128xf32>
    %53 = arith.addf %52, %51 : vector<16x128xf32>
    %54 = arith.divf %52, %53 : vector<16x128xf32>
    %55 = vector.extract_strided_slice %36 {offsets = [0, 256], sizes = [16, 128], strides = [1, 1]} : vector<16x384xf32> to vector<16x128xf32>
    %56 = vector.extract_strided_slice %38 {offsets = [0, 256], sizes = [16, 128], strides = [1, 1]} : vector<16x384xf32> to vector<16x128xf32>
    %57 = arith.addf %56, %22 : vector<16x128xf32>
    %58 = arith.mulf %46, %57 : vector<16x128xf32>
    %59 = arith.addf %55, %58 : vector<16x128xf32>
    %60 = math.tanh %59 : vector<16x128xf32>
    %61 = arith.subf %27, %60 : vector<16x128xf32>
    %62 = arith.mulf %54, %61 : vector<16x128xf32>
    %63 = arith.addf %60, %62 : vector<16x128xf32>
    %64 = arith.index_cast %28 : i32 to index
    %c0_34 = arith.constant 0 : index
    %c0_35 = arith.constant 0 : index
    %65 = vector.load %arg13[%64, %c0_34, %c0_35] : memref<8x16x384xbf16, #tpu.memory_space<vmem>>, vector<1x16x384xbf16>
    %66 = vector.shape_cast %65 : vector<1x16x384xbf16> to vector<16x384xbf16>
    %67 = arith.extf %66 : vector<16x384xbf16> to vector<16x384xf32>
    %68 = arith.truncf %27 : vector<16x128xf32> to vector<16x128xbf16>
    %cst_36 = arith.constant dense<0.000000e+00> : vector<16x384xf32>
    %69 = tpu.matmul %68, %19, %cst_36 {dimension_numbers = #tpu.dot_dimension_numbers<[1], [0], [0], [1], [0, 0, 1, 1], [], []>} : vector<16x128xbf16>, vector<128x384xbf16>, vector<16x384xf32> -> vector<16x384xf32>
    %70 = vector.extract_strided_slice %67 {offsets = [0, 0], sizes = [16, 128], strides = [1, 1]} : vector<16x384xf32> to vector<16x128xf32>
    %71 = vector.extract_strided_slice %69 {offsets = [0, 0], sizes = [16, 128], strides = [1, 1]} : vector<16x384xf32> to vector<16x128xf32>
    %72 = arith.addf %70, %71 : vector<16x128xf32>
    %73 = arith.negf %72 : vector<16x128xf32>
    %74 = math.exp %73 : vector<16x128xf32>
    %cst_37 = arith.constant 1.000000e+00 : f32
    %75 = vector.broadcast %cst_37 : f32 to vector<16x128xf32>
    %76 = arith.addf %75, %74 : vector<16x128xf32>
    %77 = arith.divf %75, %76 : vector<16x128xf32>
    %78 = vector.extract_strided_slice %67 {offsets = [0, 128], sizes = [16, 128], strides = [1, 1]} : vector<16x384xf32> to vector<16x128xf32>
    %79 = vector.extract_strided_slice %69 {offsets = [0, 128], sizes = [16, 128], strides = [1, 1]} : vector<16x384xf32> to vector<16x128xf32>
    %80 = arith.addf %78, %79 : vector<16x128xf32>
    %81 = arith.negf %80 : vector<16x128xf32>
    %82 = math.exp %81 : vector<16x128xf32>
    %cst_38 = arith.constant 1.000000e+00 : f32
    %83 = vector.broadcast %cst_38 : f32 to vector<16x128xf32>
    %84 = arith.addf %83, %82 : vector<16x128xf32>
    %85 = arith.divf %83, %84 : vector<16x128xf32>
    %86 = vector.extract_strided_slice %67 {offsets = [0, 256], sizes = [16, 128], strides = [1, 1]} : vector<16x384xf32> to vector<16x128xf32>
    %87 = vector.extract_strided_slice %69 {offsets = [0, 256], sizes = [16, 128], strides = [1, 1]} : vector<16x384xf32> to vector<16x128xf32>
    %88 = arith.addf %87, %25 : vector<16x128xf32>
    %89 = arith.mulf %77, %88 : vector<16x128xf32>
    %90 = arith.addf %86, %89 : vector<16x128xf32>
    %91 = math.tanh %90 : vector<16x128xf32>
    %92 = arith.subf %27, %91 : vector<16x128xf32>
    %93 = arith.mulf %85, %92 : vector<16x128xf32>
    %94 = arith.addf %91, %93 : vector<16x128xf32>
    %95 = vector.shape_cast %30 : vector<16x1xi1> to vector<16x1xi1>
    %96 = vector.broadcast %95 : vector<16x1xi1> to vector<16x128xi1>
    %97 = arith.select %96, %63, %27 : vector<16x128xi1>, vector<16x128xf32>
    %98 = vector.shape_cast %32 : vector<16x1xi1> to vector<16x1xi1>
    %99 = vector.broadcast %98 : vector<16x1xi1> to vector<16x128xi1>
    %100 = arith.select %99, %94, %27 : vector<16x128xi1>, vector<16x128xf32>
    %cst_39 = arith.constant 0.000000e+00 : f32
    %101 = vector.shape_cast %30 : vector<16x1xi1> to vector<16x1xi1>
    %102 = vector.broadcast %101 : vector<16x1xi1> to vector<16x128xi1>
    %103 = vector.broadcast %cst_39 : f32 to vector<16x128xf32>
    %104 = arith.select %102, %97, %103 : vector<16x128xi1>, vector<16x128xf32>
    %105 = arith.index_cast %c0_i32 : i32 to index
    %c0_40 = arith.constant 0 : index
    %c0_41 = arith.constant 0 : index
    %106 = vector.load %arg10[%105, %c0_40, %c0_41] : memref<8x16x128xf32, #tpu.memory_space<vmem>>, vector<1x16x128xf32>
    %107 = vector.shape_cast %106 : vector<1x16x128xf32> to vector<16x128xf32>
    %108 = vector.shape_cast %104 : vector<16x128xf32> to vector<1x16x128xf32>
    tpu.vector_store %arg10[%105, %c0_40, %c0_41], %108 {strides = array<i32>} : memref<8x16x128xf32, #tpu.memory_space<vmem>>, vector<1x16x128xf32>,
    %cst_42 = arith.constant 0.000000e+00 : f32
    %109 = vector.shape_cast %32 : vector<16x1xi1> to vector<16x1xi1>
    %110 = vector.broadcast %109 : vector<16x1xi1> to vector<16x128xi1>
    %111 = vector.broadcast %cst_42 : f32 to vector<16x128xf32>
    %112 = arith.select %110, %100, %111 : vector<16x128xi1>, vector<16x128xf32>
    %c4_i32 = arith.constant 4 : i32
    %113 = arith.subi %28, %c4_i32 : i32
    %114 = arith.index_cast %113 : i32 to index
    %c0_43 = arith.constant 0 : index
    %c0_44 = arith.constant 0 : index
    %115 = vector.load %arg14[%114, %c0_43, %c0_44] : memref<4x16x128xf32, #tpu.memory_space<vmem>>, vector<1x16x128xf32>
    %116 = vector.shape_cast %115 : vector<1x16x128xf32> to vector<16x128xf32>
    %117 = vector.shape_cast %112 : vector<16x128xf32> to vector<1x16x128xf32>
    tpu.vector_store %arg14[%114, %c0_43, %c0_44], %117 {strides = array<i32>} : memref<4x16x128xf32, #tpu.memory_space<vmem>>, vector<1x16x128xf32>,
    %c1_i32 = arith.constant 1 : i32
    %c7_i32_45 = arith.constant 7 : i32
    %118 = arith.subi %c7_i32_45, %c1_i32 : i32
    %119 = vector.broadcast %c1_i32 : i32 to vector<16x1xi32>
    %120 = arith.cmpi slt, %119, %26 : vector<16x1xi32>
    %121 = vector.broadcast %118 : i32 to vector<16x1xi32>
    %122 = arith.cmpi slt, %121, %26 : vector<16x1xi32>
    %123 = arith.index_cast %c1_i32 : i32 to index
    %c0_46 = arith.constant 0 : index
    %c0_47 = arith.constant 0 : index
    %124 = vector.load %arg12[%123, %c0_46, %c0_47] : memref<8x16x384xbf16, #tpu.memory_space<vmem>>, vector<1x16x384xbf16>
    %125 = vector.shape_cast %124 : vector<1x16x384xbf16> to vector<16x384xbf16>
    %126 = arith.extf %125 : vector<16x384xbf16> to vector<16x384xf32>
    %127 = arith.truncf %97 : vector<16x128xf32> to vector<16x128xbf16>
    %cst_48 = arith.constant dense<0.000000e+00> : vector<16x384xf32>
    %128 = tpu.matmul %127, %18, %cst_48 {dimension_numbers = #tpu.dot_dimension_numbers<[1], [0], [0], [1], [0, 0, 1, 1], [], []>} : vector<16x128xbf16>, vector<128x384xbf16>, vector<16x384xf32> -> vector<16x384xf32>
    %129 = vector.extract_strided_slice %126 {offsets = [0, 0], sizes = [16, 128], strides = [1, 1]} : vector<16x384xf32> to vector<16x128xf32>
    %130 = vector.extract_strided_slice %128 {offsets = [0, 0], sizes = [16, 128], strides = [1, 1]} : vector<16x384xf32> to vector<16x128xf32>
    %131 = arith.addf %129, %130 : vector<16x128xf32>
    %132 = arith.negf %131 : vector<16x128xf32>
    %133 = math.exp %132 : vector<16x128xf32>
    %cst_49 = arith.constant 1.000000e+00 : f32
    %134 = vector.broadcast %cst_49 : f32 to vector<16x128xf32>
    %135 = arith.addf %134, %133 : vector<16x128xf32>
    %136 = arith.divf %134, %135 : vector<16x128xf32>
    %137 = vector.extract_strided_slice %126 {offsets = [0, 128], sizes = [16, 128], strides = [1, 1]} : vector<16x384xf32> to vector<16x128xf32>
    %138 = vector.extract_strided_slice %128 {offsets = [0, 128], sizes = [16, 128], strides = [1, 1]} : vector<16x384xf32> to vector<16x128xf32>
    %139 = arith.addf %137, %138 : vector<16x128xf32>
    %140 = arith.negf %139 : vector<16x128xf32>
    %141 = math.exp %140 : vector<16x128xf32>
    %cst_50 = arith.constant 1.000000e+00 : f32
    %142 = vector.broadcast %cst_50 : f32 to vector<16x128xf32>
    %143 = arith.addf %142, %141 : vector<16x128xf32>
    %144 = arith.divf %142, %143 : vector<16x128xf32>
    %145 = vector.extract_strided_slice %126 {offsets = [0, 256], sizes = [16, 128], strides = [1, 1]} : vector<16x384xf32> to vector<16x128xf32>
    %146 = vector.extract_strided_slice %128 {offsets = [0, 256], sizes = [16, 128], strides = [1, 1]} : vector<16x384xf32> to vector<16x128xf32>
    %147 = arith.addf %146, %22 : vector<16x128xf32>
    %148 = arith.mulf %136, %147 : vector<16x128xf32>
    %149 = arith.addf %145, %148 : vector<16x128xf32>
    %150 = math.tanh %149 : vector<16x128xf32>
    %151 = arith.subf %97, %150 : vector<16x128xf32>
    %152 = arith.mulf %144, %151 : vector<16x128xf32>
    %153 = arith.addf %150, %152 : vector<16x128xf32>
    %154 = arith.index_cast %118 : i32 to index
    %c0_51 = arith.constant 0 : index
    %c0_52 = arith.constant 0 : index
    %155 = vector.load %arg13[%154, %c0_51, %c0_52] : memref<8x16x384xbf16, #tpu.memory_space<vmem>>, vector<1x16x384xbf16>
    %156 = vector.shape_cast %155 : vector<1x16x384xbf16> to vector<16x384xbf16>
    %157 = arith.extf %156 : vector<16x384xbf16> to vector<16x384xf32>
    %158 = arith.truncf %100 : vector<16x128xf32> to vector<16x128xbf16>
    %cst_53 = arith.constant dense<0.000000e+00> : vector<16x384xf32>
    %159 = tpu.matmul %158, %19, %cst_53 {dimension_numbers = #tpu.dot_dimension_numbers<[1], [0], [0], [1], [0, 0, 1, 1], [], []>} : vector<16x128xbf16>, vector<128x384xbf16>, vector<16x384xf32> -> vector<16x384xf32>
    %160 = vector.extract_strided_slice %157 {offsets = [0, 0], sizes = [16, 128], strides = [1, 1]} : vector<16x384xf32> to vector<16x128xf32>
    %161 = vector.extract_strided_slice %159 {offsets = [0, 0], sizes = [16, 128], strides = [1, 1]} : vector<16x384xf32> to vector<16x128xf32>
    %162 = arith.addf %160, %161 : vector<16x128xf32>
    %163 = arith.negf %162 : vector<16x128xf32>
    %164 = math.exp %163 : vector<16x128xf32>
    %cst_54 = arith.constant 1.000000e+00 : f32
    %165 = vector.broadcast %cst_54 : f32 to vector<16x128xf32>
    %166 = arith.addf %165, %164 : vector<16x128xf32>
    %167 = arith.divf %165, %166 : vector<16x128xf32>
    %168 = vector.extract_strided_slice %157 {offsets = [0, 128], sizes = [16, 128], strides = [1, 1]} : vector<16x384xf32> to vector<16x128xf32>
    %169 = vector.extract_strided_slice %159 {offsets = [0, 128], sizes = [16, 128], strides = [1, 1]} : vector<16x384xf32> to vector<16x128xf32>
    %170 = arith.addf %168, %169 : vector<16x128xf32>
    %171 = arith.negf %170 : vector<16x128xf32>
    %172 = math.exp %171 : vector<16x128xf32>
    %cst_55 = arith.constant 1.000000e+00 : f32
    %173 = vector.broadcast %cst_55 : f32 to vector<16x128xf32>
    %174 = arith.addf %173, %172 : vector<16x128xf32>
    %175 = arith.divf %173, %174 : vector<16x128xf32>
    %176 = vector.extract_strided_slice %157 {offsets = [0, 256], sizes = [16, 128], strides = [1, 1]} : vector<16x384xf32> to vector<16x128xf32>
    %177 = vector.extract_strided_slice %159 {offsets = [0, 256], sizes = [16, 128], strides = [1, 1]} : vector<16x384xf32> to vector<16x128xf32>
    %178 = arith.addf %177, %25 : vector<16x128xf32>
    %179 = arith.mulf %167, %178 : vector<16x128xf32>
    %180 = arith.addf %176, %179 : vector<16x128xf32>
    %181 = math.tanh %180 : vector<16x128xf32>
    %182 = arith.subf %100, %181 : vector<16x128xf32>
    %183 = arith.mulf %175, %182 : vector<16x128xf32>
    %184 = arith.addf %181, %183 : vector<16x128xf32>
    %185 = vector.shape_cast %120 : vector<16x1xi1> to vector<16x1xi1>
    %186 = vector.broadcast %185 : vector<16x1xi1> to vector<16x128xi1>
    %187 = arith.select %186, %153, %97 : vector<16x128xi1>, vector<16x128xf32>
    %188 = vector.shape_cast %122 : vector<16x1xi1> to vector<16x1xi1>
    %189 = vector.broadcast %188 : vector<16x1xi1> to vector<16x128xi1>
    %190 = arith.select %189, %184, %100 : vector<16x128xi1>, vector<16x128xf32>
    %cst_56 = arith.constant 0.000000e+00 : f32
    %191 = vector.shape_cast %120 : vector<16x1xi1> to vector<16x1xi1>
    %192 = vector.broadcast %191 : vector<16x1xi1> to vector<16x128xi1>
    %193 = vector.broadcast %cst_56 : f32 to vector<16x128xf32>
    %194 = arith.select %192, %187, %193 : vector<16x128xi1>, vector<16x128xf32>
    %195 = arith.index_cast %c1_i32 : i32 to index
    %c0_57 = arith.constant 0 : index
    %c0_58 = arith.constant 0 : index
    %196 = vector.load %arg10[%195, %c0_57, %c0_58] : memref<8x16x128xf32, #tpu.memory_space<vmem>>, vector<1x16x128xf32>
    %197 = vector.shape_cast %196 : vector<1x16x128xf32> to vector<16x128xf32>
    %198 = vector.shape_cast %194 : vector<16x128xf32> to vector<1x16x128xf32>
    tpu.vector_store %arg10[%195, %c0_57, %c0_58], %198 {strides = array<i32>} : memref<8x16x128xf32, #tpu.memory_space<vmem>>, vector<1x16x128xf32>,
    %cst_59 = arith.constant 0.000000e+00 : f32
    %199 = vector.shape_cast %122 : vector<16x1xi1> to vector<16x1xi1>
    %200 = vector.broadcast %199 : vector<16x1xi1> to vector<16x128xi1>
    %201 = vector.broadcast %cst_59 : f32 to vector<16x128xf32>
    %202 = arith.select %200, %190, %201 : vector<16x128xi1>, vector<16x128xf32>
    %c4_i32_60 = arith.constant 4 : i32
    %203 = arith.subi %118, %c4_i32_60 : i32
    %204 = arith.index_cast %203 : i32 to index
    %c0_61 = arith.constant 0 : index
    %c0_62 = arith.constant 0 : index
    %205 = vector.load %arg14[%204, %c0_61, %c0_62] : memref<4x16x128xf32, #tpu.memory_space<vmem>>, vector<1x16x128xf32>
    %206 = vector.shape_cast %205 : vector<1x16x128xf32> to vector<16x128xf32>
    %207 = vector.shape_cast %202 : vector<16x128xf32> to vector<1x16x128xf32>
    tpu.vector_store %arg14[%204, %c0_61, %c0_62], %207 {strides = array<i32>} : memref<4x16x128xf32, #tpu.memory_space<vmem>>, vector<1x16x128xf32>,
    %c2_i32 = arith.constant 2 : i32
    %c7_i32_63 = arith.constant 7 : i32
    %208 = arith.subi %c7_i32_63, %c2_i32 : i32
    %209 = vector.broadcast %c2_i32 : i32 to vector<16x1xi32>
    %210 = arith.cmpi slt, %209, %26 : vector<16x1xi32>
    %211 = vector.broadcast %208 : i32 to vector<16x1xi32>
    %212 = arith.cmpi slt, %211, %26 : vector<16x1xi32>
    %213 = arith.index_cast %c2_i32 : i32 to index
    %c0_64 = arith.constant 0 : index
    %c0_65 = arith.constant 0 : index
    %214 = vector.load %arg12[%213, %c0_64, %c0_65] : memref<8x16x384xbf16, #tpu.memory_space<vmem>>, vector<1x16x384xbf16>
    %215 = vector.shape_cast %214 : vector<1x16x384xbf16> to vector<16x384xbf16>
    %216 = arith.extf %215 : vector<16x384xbf16> to vector<16x384xf32>
    %217 = arith.truncf %187 : vector<16x128xf32> to vector<16x128xbf16>
    %cst_66 = arith.constant dense<0.000000e+00> : vector<16x384xf32>
    %218 = tpu.matmul %217, %18, %cst_66 {dimension_numbers = #tpu.dot_dimension_numbers<[1], [0], [0], [1], [0, 0, 1, 1], [], []>} : vector<16x128xbf16>, vector<128x384xbf16>, vector<16x384xf32> -> vector<16x384xf32>
    %219 = vector.extract_strided_slice %216 {offsets = [0, 0], sizes = [16, 128], strides = [1, 1]} : vector<16x384xf32> to vector<16x128xf32>
    %220 = vector.extract_strided_slice %218 {offsets = [0, 0], sizes = [16, 128], strides = [1, 1]} : vector<16x384xf32> to vector<16x128xf32>
    %221 = arith.addf %219, %220 : vector<16x128xf32>
    %222 = arith.negf %221 : vector<16x128xf32>
    %223 = math.exp %222 : vector<16x128xf32>
    %cst_67 = arith.constant 1.000000e+00 : f32
    %224 = vector.broadcast %cst_67 : f32 to vector<16x128xf32>
    %225 = arith.addf %224, %223 : vector<16x128xf32>
    %226 = arith.divf %224, %225 : vector<16x128xf32>
    %227 = vector.extract_strided_slice %216 {offsets = [0, 128], sizes = [16, 128], strides = [1, 1]} : vector<16x384xf32> to vector<16x128xf32>
    %228 = vector.extract_strided_slice %218 {offsets = [0, 128], sizes = [16, 128], strides = [1, 1]} : vector<16x384xf32> to vector<16x128xf32>
    %229 = arith.addf %227, %228 : vector<16x128xf32>
    %230 = arith.negf %229 : vector<16x128xf32>
    %231 = math.exp %230 : vector<16x128xf32>
    %cst_68 = arith.constant 1.000000e+00 : f32
    %232 = vector.broadcast %cst_68 : f32 to vector<16x128xf32>
    %233 = arith.addf %232, %231 : vector<16x128xf32>
    %234 = arith.divf %232, %233 : vector<16x128xf32>
    %235 = vector.extract_strided_slice %216 {offsets = [0, 256], sizes = [16, 128], strides = [1, 1]} : vector<16x384xf32> to vector<16x128xf32>
    %236 = vector.extract_strided_slice %218 {offsets = [0, 256], sizes = [16, 128], strides = [1, 1]} : vector<16x384xf32> to vector<16x128xf32>
    %237 = arith.addf %236, %22 : vector<16x128xf32>
    %238 = arith.mulf %226, %237 : vector<16x128xf32>
    %239 = arith.addf %235, %238 : vector<16x128xf32>
    %240 = math.tanh %239 : vector<16x128xf32>
    %241 = arith.subf %187, %240 : vector<16x128xf32>
    %242 = arith.mulf %234, %241 : vector<16x128xf32>
    %243 = arith.addf %240, %242 : vector<16x128xf32>
    %244 = arith.index_cast %208 : i32 to index
    %c0_69 = arith.constant 0 : index
    %c0_70 = arith.constant 0 : index
    %245 = vector.load %arg13[%244, %c0_69, %c0_70] : memref<8x16x384xbf16, #tpu.memory_space<vmem>>, vector<1x16x384xbf16>
    %246 = vector.shape_cast %245 : vector<1x16x384xbf16> to vector<16x384xbf16>
    %247 = arith.extf %246 : vector<16x384xbf16> to vector<16x384xf32>
    %248 = arith.truncf %190 : vector<16x128xf32> to vector<16x128xbf16>
    %cst_71 = arith.constant dense<0.000000e+00> : vector<16x384xf32>
    %249 = tpu.matmul %248, %19, %cst_71 {dimension_numbers = #tpu.dot_dimension_numbers<[1], [0], [0], [1], [0, 0, 1, 1], [], []>} : vector<16x128xbf16>, vector<128x384xbf16>, vector<16x384xf32> -> vector<16x384xf32>
    %250 = vector.extract_strided_slice %247 {offsets = [0, 0], sizes = [16, 128], strides = [1, 1]} : vector<16x384xf32> to vector<16x128xf32>
    %251 = vector.extract_strided_slice %249 {offsets = [0, 0], sizes = [16, 128], strides = [1, 1]} : vector<16x384xf32> to vector<16x128xf32>
    %252 = arith.addf %250, %251 : vector<16x128xf32>
    %253 = arith.negf %252 : vector<16x128xf32>
    %254 = math.exp %253 : vector<16x128xf32>
    %cst_72 = arith.constant 1.000000e+00 : f32
    %255 = vector.broadcast %cst_72 : f32 to vector<16x128xf32>
    %256 = arith.addf %255, %254 : vector<16x128xf32>
    %257 = arith.divf %255, %256 : vector<16x128xf32>
    %258 = vector.extract_strided_slice %247 {offsets = [0, 128], sizes = [16, 128], strides = [1, 1]} : vector<16x384xf32> to vector<16x128xf32>
    %259 = vector.extract_strided_slice %249 {offsets = [0, 128], sizes = [16, 128], strides = [1, 1]} : vector<16x384xf32> to vector<16x128xf32>
    %260 = arith.addf %258, %259 : vector<16x128xf32>
    %261 = arith.negf %260 : vector<16x128xf32>
    %262 = math.exp %261 : vector<16x128xf32>
    %cst_73 = arith.constant 1.000000e+00 : f32
    %263 = vector.broadcast %cst_73 : f32 to vector<16x128xf32>
    %264 = arith.addf %263, %262 : vector<16x128xf32>
    %265 = arith.divf %263, %264 : vector<16x128xf32>
    %266 = vector.extract_strided_slice %247 {offsets = [0, 256], sizes = [16, 128], strides = [1, 1]} : vector<16x384xf32> to vector<16x128xf32>
    %267 = vector.extract_strided_slice %249 {offsets = [0, 256], sizes = [16, 128], strides = [1, 1]} : vector<16x384xf32> to vector<16x128xf32>
    %268 = arith.addf %267, %25 : vector<16x128xf32>
    %269 = arith.mulf %257, %268 : vector<16x128xf32>
    %270 = arith.addf %266, %269 : vector<16x128xf32>
    %271 = math.tanh %270 : vector<16x128xf32>
    %272 = arith.subf %190, %271 : vector<16x128xf32>
    %273 = arith.mulf %265, %272 : vector<16x128xf32>
    %274 = arith.addf %271, %273 : vector<16x128xf32>
    %275 = vector.shape_cast %210 : vector<16x1xi1> to vector<16x1xi1>
    %276 = vector.broadcast %275 : vector<16x1xi1> to vector<16x128xi1>
    %277 = arith.select %276, %243, %187 : vector<16x128xi1>, vector<16x128xf32>
    %278 = vector.shape_cast %212 : vector<16x1xi1> to vector<16x1xi1>
    %279 = vector.broadcast %278 : vector<16x1xi1> to vector<16x128xi1>
    %280 = arith.select %279, %274, %190 : vector<16x128xi1>, vector<16x128xf32>
    %cst_74 = arith.constant 0.000000e+00 : f32
    %281 = vector.shape_cast %210 : vector<16x1xi1> to vector<16x1xi1>
    %282 = vector.broadcast %281 : vector<16x1xi1> to vector<16x128xi1>
    %283 = vector.broadcast %cst_74 : f32 to vector<16x128xf32>
    %284 = arith.select %282, %277, %283 : vector<16x128xi1>, vector<16x128xf32>
    %285 = arith.index_cast %c2_i32 : i32 to index
    %c0_75 = arith.constant 0 : index
    %c0_76 = arith.constant 0 : index
    %286 = vector.load %arg10[%285, %c0_75, %c0_76] : memref<8x16x128xf32, #tpu.memory_space<vmem>>, vector<1x16x128xf32>
    %287 = vector.shape_cast %286 : vector<1x16x128xf32> to vector<16x128xf32>
    %288 = vector.shape_cast %284 : vector<16x128xf32> to vector<1x16x128xf32>
    tpu.vector_store %arg10[%285, %c0_75, %c0_76], %288 {strides = array<i32>} : memref<8x16x128xf32, #tpu.memory_space<vmem>>, vector<1x16x128xf32>,
    %cst_77 = arith.constant 0.000000e+00 : f32
    %289 = vector.shape_cast %212 : vector<16x1xi1> to vector<16x1xi1>
    %290 = vector.broadcast %289 : vector<16x1xi1> to vector<16x128xi1>
    %291 = vector.broadcast %cst_77 : f32 to vector<16x128xf32>
    %292 = arith.select %290, %280, %291 : vector<16x128xi1>, vector<16x128xf32>
    %c4_i32_78 = arith.constant 4 : i32
    %293 = arith.subi %208, %c4_i32_78 : i32
    %294 = arith.index_cast %293 : i32 to index
    %c0_79 = arith.constant 0 : index
    %c0_80 = arith.constant 0 : index
    %295 = vector.load %arg14[%294, %c0_79, %c0_80] : memref<4x16x128xf32, #tpu.memory_space<vmem>>, vector<1x16x128xf32>
    %296 = vector.shape_cast %295 : vector<1x16x128xf32> to vector<16x128xf32>
    %297 = vector.shape_cast %292 : vector<16x128xf32> to vector<1x16x128xf32>
    tpu.vector_store %arg14[%294, %c0_79, %c0_80], %297 {strides = array<i32>} : memref<4x16x128xf32, #tpu.memory_space<vmem>>, vector<1x16x128xf32>,
    %c3_i32 = arith.constant 3 : i32
    %c7_i32_81 = arith.constant 7 : i32
    %298 = arith.subi %c7_i32_81, %c3_i32 : i32
    %299 = vector.broadcast %c3_i32 : i32 to vector<16x1xi32>
    %300 = arith.cmpi slt, %299, %26 : vector<16x1xi32>
    %301 = vector.broadcast %298 : i32 to vector<16x1xi32>
    %302 = arith.cmpi slt, %301, %26 : vector<16x1xi32>
    %303 = arith.index_cast %c3_i32 : i32 to index
    %c0_82 = arith.constant 0 : index
    %c0_83 = arith.constant 0 : index
    %304 = vector.load %arg12[%303, %c0_82, %c0_83] : memref<8x16x384xbf16, #tpu.memory_space<vmem>>, vector<1x16x384xbf16>
    %305 = vector.shape_cast %304 : vector<1x16x384xbf16> to vector<16x384xbf16>
    %306 = arith.extf %305 : vector<16x384xbf16> to vector<16x384xf32>
    %307 = arith.truncf %277 : vector<16x128xf32> to vector<16x128xbf16>
    %cst_84 = arith.constant dense<0.000000e+00> : vector<16x384xf32>
    %308 = tpu.matmul %307, %18, %cst_84 {dimension_numbers = #tpu.dot_dimension_numbers<[1], [0], [0], [1], [0, 0, 1, 1], [], []>} : vector<16x128xbf16>, vector<128x384xbf16>, vector<16x384xf32> -> vector<16x384xf32>
    %309 = vector.extract_strided_slice %306 {offsets = [0, 0], sizes = [16, 128], strides = [1, 1]} : vector<16x384xf32> to vector<16x128xf32>
    %310 = vector.extract_strided_slice %308 {offsets = [0, 0], sizes = [16, 128], strides = [1, 1]} : vector<16x384xf32> to vector<16x128xf32>
    %311 = arith.addf %309, %310 : vector<16x128xf32>
    %312 = arith.negf %311 : vector<16x128xf32>
    %313 = math.exp %312 : vector<16x128xf32>
    %cst_85 = arith.constant 1.000000e+00 : f32
    %314 = vector.broadcast %cst_85 : f32 to vector<16x128xf32>
    %315 = arith.addf %314, %313 : vector<16x128xf32>
    %316 = arith.divf %314, %315 : vector<16x128xf32>
    %317 = vector.extract_strided_slice %306 {offsets = [0, 128], sizes = [16, 128], strides = [1, 1]} : vector<16x384xf32> to vector<16x128xf32>
    %318 = vector.extract_strided_slice %308 {offsets = [0, 128], sizes = [16, 128], strides = [1, 1]} : vector<16x384xf32> to vector<16x128xf32>
    %319 = arith.addf %317, %318 : vector<16x128xf32>
    %320 = arith.negf %319 : vector<16x128xf32>
    %321 = math.exp %320 : vector<16x128xf32>
    %cst_86 = arith.constant 1.000000e+00 : f32
    %322 = vector.broadcast %cst_86 : f32 to vector<16x128xf32>
    %323 = arith.addf %322, %321 : vector<16x128xf32>
    %324 = arith.divf %322, %323 : vector<16x128xf32>
    %325 = vector.extract_strided_slice %306 {offsets = [0, 256], sizes = [16, 128], strides = [1, 1]} : vector<16x384xf32> to vector<16x128xf32>
    %326 = vector.extract_strided_slice %308 {offsets = [0, 256], sizes = [16, 128], strides = [1, 1]} : vector<16x384xf32> to vector<16x128xf32>
    %327 = arith.addf %326, %22 : vector<16x128xf32>
    %328 = arith.mulf %316, %327 : vector<16x128xf32>
    %329 = arith.addf %325, %328 : vector<16x128xf32>
    %330 = math.tanh %329 : vector<16x128xf32>
    %331 = arith.subf %277, %330 : vector<16x128xf32>
    %332 = arith.mulf %324, %331 : vector<16x128xf32>
    %333 = arith.addf %330, %332 : vector<16x128xf32>
    %334 = arith.index_cast %298 : i32 to index
    %c0_87 = arith.constant 0 : index
    %c0_88 = arith.constant 0 : index
    %335 = vector.load %arg13[%334, %c0_87, %c0_88] : memref<8x16x384xbf16, #tpu.memory_space<vmem>>, vector<1x16x384xbf16>
    %336 = vector.shape_cast %335 : vector<1x16x384xbf16> to vector<16x384xbf16>
    %337 = arith.extf %336 : vector<16x384xbf16> to vector<16x384xf32>
    %338 = arith.truncf %280 : vector<16x128xf32> to vector<16x128xbf16>
    %cst_89 = arith.constant dense<0.000000e+00> : vector<16x384xf32>
    %339 = tpu.matmul %338, %19, %cst_89 {dimension_numbers = #tpu.dot_dimension_numbers<[1], [0], [0], [1], [0, 0, 1, 1], [], []>} : vector<16x128xbf16>, vector<128x384xbf16>, vector<16x384xf32> -> vector<16x384xf32>
    %340 = vector.extract_strided_slice %337 {offsets = [0, 0], sizes = [16, 128], strides = [1, 1]} : vector<16x384xf32> to vector<16x128xf32>
    %341 = vector.extract_strided_slice %339 {offsets = [0, 0], sizes = [16, 128], strides = [1, 1]} : vector<16x384xf32> to vector<16x128xf32>
    %342 = arith.addf %340, %341 : vector<16x128xf32>
    %343 = arith.negf %342 : vector<16x128xf32>
    %344 = math.exp %343 : vector<16x128xf32>
    %cst_90 = arith.constant 1.000000e+00 : f32
    %345 = vector.broadcast %cst_90 : f32 to vector<16x128xf32>
    %346 = arith.addf %345, %344 : vector<16x128xf32>
    %347 = arith.divf %345, %346 : vector<16x128xf32>
    %348 = vector.extract_strided_slice %337 {offsets = [0, 128], sizes = [16, 128], strides = [1, 1]} : vector<16x384xf32> to vector<16x128xf32>
    %349 = vector.extract_strided_slice %339 {offsets = [0, 128], sizes = [16, 128], strides = [1, 1]} : vector<16x384xf32> to vector<16x128xf32>
    %350 = arith.addf %348, %349 : vector<16x128xf32>
    %351 = arith.negf %350 : vector<16x128xf32>
    %352 = math.exp %351 : vector<16x128xf32>
    %cst_91 = arith.constant 1.000000e+00 : f32
    %353 = vector.broadcast %cst_91 : f32 to vector<16x128xf32>
    %354 = arith.addf %353, %352 : vector<16x128xf32>
    %355 = arith.divf %353, %354 : vector<16x128xf32>
    %356 = vector.extract_strided_slice %337 {offsets = [0, 256], sizes = [16, 128], strides = [1, 1]} : vector<16x384xf32> to vector<16x128xf32>
    %357 = vector.extract_strided_slice %339 {offsets = [0, 256], sizes = [16, 128], strides = [1, 1]} : vector<16x384xf32> to vector<16x128xf32>
    %358 = arith.addf %357, %25 : vector<16x128xf32>
    %359 = arith.mulf %347, %358 : vector<16x128xf32>
    %360 = arith.addf %356, %359 : vector<16x128xf32>
    %361 = math.tanh %360 : vector<16x128xf32>
    %362 = arith.subf %280, %361 : vector<16x128xf32>
    %363 = arith.mulf %355, %362 : vector<16x128xf32>
    %364 = arith.addf %361, %363 : vector<16x128xf32>
    %365 = vector.shape_cast %300 : vector<16x1xi1> to vector<16x1xi1>
    %366 = vector.broadcast %365 : vector<16x1xi1> to vector<16x128xi1>
    %367 = arith.select %366, %333, %277 : vector<16x128xi1>, vector<16x128xf32>
    %368 = vector.shape_cast %302 : vector<16x1xi1> to vector<16x1xi1>
    %369 = vector.broadcast %368 : vector<16x1xi1> to vector<16x128xi1>
    %370 = arith.select %369, %364, %280 : vector<16x128xi1>, vector<16x128xf32>
    %cst_92 = arith.constant 0.000000e+00 : f32
    %371 = vector.shape_cast %300 : vector<16x1xi1> to vector<16x1xi1>
    %372 = vector.broadcast %371 : vector<16x1xi1> to vector<16x128xi1>
    %373 = vector.broadcast %cst_92 : f32 to vector<16x128xf32>
    %374 = arith.select %372, %367, %373 : vector<16x128xi1>, vector<16x128xf32>
    %375 = arith.index_cast %c3_i32 : i32 to index
    %c0_93 = arith.constant 0 : index
    %c0_94 = arith.constant 0 : index
    %376 = vector.load %arg10[%375, %c0_93, %c0_94] : memref<8x16x128xf32, #tpu.memory_space<vmem>>, vector<1x16x128xf32>
    %377 = vector.shape_cast %376 : vector<1x16x128xf32> to vector<16x128xf32>
    %378 = vector.shape_cast %374 : vector<16x128xf32> to vector<1x16x128xf32>
    tpu.vector_store %arg10[%375, %c0_93, %c0_94], %378 {strides = array<i32>} : memref<8x16x128xf32, #tpu.memory_space<vmem>>, vector<1x16x128xf32>,
    %cst_95 = arith.constant 0.000000e+00 : f32
    %379 = vector.shape_cast %302 : vector<16x1xi1> to vector<16x1xi1>
    %380 = vector.broadcast %379 : vector<16x1xi1> to vector<16x128xi1>
    %381 = vector.broadcast %cst_95 : f32 to vector<16x128xf32>
    %382 = arith.select %380, %370, %381 : vector<16x128xi1>, vector<16x128xf32>
    %c4_i32_96 = arith.constant 4 : i32
    %383 = arith.subi %298, %c4_i32_96 : i32
    %384 = arith.index_cast %383 : i32 to index
    %c0_97 = arith.constant 0 : index
    %c0_98 = arith.constant 0 : index
    %385 = vector.load %arg14[%384, %c0_97, %c0_98] : memref<4x16x128xf32, #tpu.memory_space<vmem>>, vector<1x16x128xf32>
    %386 = vector.shape_cast %385 : vector<1x16x128xf32> to vector<16x128xf32>
    %387 = vector.shape_cast %382 : vector<16x128xf32> to vector<1x16x128xf32>
    tpu.vector_store %arg14[%384, %c0_97, %c0_98], %387 {strides = array<i32>} : memref<4x16x128xf32, #tpu.memory_space<vmem>>, vector<1x16x128xf32>,
    %c4_i32_99 = arith.constant 4 : i32
    %c4_i32_100 = arith.constant 4 : i32
    %c7_i32_101 = arith.constant 7 : i32
    %388 = arith.subi %c7_i32_101, %c4_i32_100 : i32
    %389 = vector.broadcast %c4_i32_100 : i32 to vector<16x1xi32>
    %390 = arith.cmpi slt, %389, %26 : vector<16x1xi32>
    %391 = vector.broadcast %388 : i32 to vector<16x1xi32>
    %392 = arith.cmpi slt, %391, %26 : vector<16x1xi32>
    %393 = arith.index_cast %c4_i32_100 : i32 to index
    %c0_102 = arith.constant 0 : index
    %c0_103 = arith.constant 0 : index
    %394 = vector.load %arg12[%393, %c0_102, %c0_103] : memref<8x16x384xbf16, #tpu.memory_space<vmem>>, vector<1x16x384xbf16>
    %395 = vector.shape_cast %394 : vector<1x16x384xbf16> to vector<16x384xbf16>
    %396 = arith.extf %395 : vector<16x384xbf16> to vector<16x384xf32>
    %397 = arith.truncf %367 : vector<16x128xf32> to vector<16x128xbf16>
    %cst_104 = arith.constant dense<0.000000e+00> : vector<16x384xf32>
    %398 = tpu.matmul %397, %18, %cst_104 {dimension_numbers = #tpu.dot_dimension_numbers<[1], [0], [0], [1], [0, 0, 1, 1], [], []>} : vector<16x128xbf16>, vector<128x384xbf16>, vector<16x384xf32> -> vector<16x384xf32>
    %399 = vector.extract_strided_slice %396 {offsets = [0, 0], sizes = [16, 128], strides = [1, 1]} : vector<16x384xf32> to vector<16x128xf32>
    %400 = vector.extract_strided_slice %398 {offsets = [0, 0], sizes = [16, 128], strides = [1, 1]} : vector<16x384xf32> to vector<16x128xf32>
    %401 = arith.addf %399, %400 : vector<16x128xf32>
    %402 = arith.negf %401 : vector<16x128xf32>
    %403 = math.exp %402 : vector<16x128xf32>
    %cst_105 = arith.constant 1.000000e+00 : f32
    %404 = vector.broadcast %cst_105 : f32 to vector<16x128xf32>
    %405 = arith.addf %404, %403 : vector<16x128xf32>
    %406 = arith.divf %404, %405 : vector<16x128xf32>
    %407 = vector.extract_strided_slice %396 {offsets = [0, 128], sizes = [16, 128], strides = [1, 1]} : vector<16x384xf32> to vector<16x128xf32>
    %408 = vector.extract_strided_slice %398 {offsets = [0, 128], sizes = [16, 128], strides = [1, 1]} : vector<16x384xf32> to vector<16x128xf32>
    %409 = arith.addf %407, %408 : vector<16x128xf32>
    %410 = arith.negf %409 : vector<16x128xf32>
    %411 = math.exp %410 : vector<16x128xf32>
    %cst_106 = arith.constant 1.000000e+00 : f32
    %412 = vector.broadcast %cst_106 : f32 to vector<16x128xf32>
    %413 = arith.addf %412, %411 : vector<16x128xf32>
    %414 = arith.divf %412, %413 : vector<16x128xf32>
    %415 = vector.extract_strided_slice %396 {offsets = [0, 256], sizes = [16, 128], strides = [1, 1]} : vector<16x384xf32> to vector<16x128xf32>
    %416 = vector.extract_strided_slice %398 {offsets = [0, 256], sizes = [16, 128], strides = [1, 1]} : vector<16x384xf32> to vector<16x128xf32>
    %417 = arith.addf %416, %22 : vector<16x128xf32>
    %418 = arith.mulf %406, %417 : vector<16x128xf32>
    %419 = arith.addf %415, %418 : vector<16x128xf32>
    %420 = math.tanh %419 : vector<16x128xf32>
    %421 = arith.subf %367, %420 : vector<16x128xf32>
    %422 = arith.mulf %414, %421 : vector<16x128xf32>
    %423 = arith.addf %420, %422 : vector<16x128xf32>
    %424 = arith.index_cast %388 : i32 to index
    %c0_107 = arith.constant 0 : index
    %c0_108 = arith.constant 0 : index
    %425 = vector.load %arg13[%424, %c0_107, %c0_108] : memref<8x16x384xbf16, #tpu.memory_space<vmem>>, vector<1x16x384xbf16>
    %426 = vector.shape_cast %425 : vector<1x16x384xbf16> to vector<16x384xbf16>
    %427 = arith.extf %426 : vector<16x384xbf16> to vector<16x384xf32>
    %428 = arith.truncf %370 : vector<16x128xf32> to vector<16x128xbf16>
    %cst_109 = arith.constant dense<0.000000e+00> : vector<16x384xf32>
    %429 = tpu.matmul %428, %19, %cst_109 {dimension_numbers = #tpu.dot_dimension_numbers<[1], [0], [0], [1], [0, 0, 1, 1], [], []>} : vector<16x128xbf16>, vector<128x384xbf16>, vector<16x384xf32> -> vector<16x384xf32>
    %430 = vector.extract_strided_slice %427 {offsets = [0, 0], sizes = [16, 128], strides = [1, 1]} : vector<16x384xf32> to vector<16x128xf32>
    %431 = vector.extract_strided_slice %429 {offsets = [0, 0], sizes = [16, 128], strides = [1, 1]} : vector<16x384xf32> to vector<16x128xf32>
    %432 = arith.addf %430, %431 : vector<16x128xf32>
    %433 = arith.negf %432 : vector<16x128xf32>
    %434 = math.exp %433 : vector<16x128xf32>
    %cst_110 = arith.constant 1.000000e+00 : f32
    %435 = vector.broadcast %cst_110 : f32 to vector<16x128xf32>
    %436 = arith.addf %435, %434 : vector<16x128xf32>
    %437 = arith.divf %435, %436 : vector<16x128xf32>
    %438 = vector.extract_strided_slice %427 {offsets = [0, 128], sizes = [16, 128], strides = [1, 1]} : vector<16x384xf32> to vector<16x128xf32>
    %439 = vector.extract_strided_slice %429 {offsets = [0, 128], sizes = [16, 128], strides = [1, 1]} : vector<16x384xf32> to vector<16x128xf32>
    %440 = arith.addf %438, %439 : vector<16x128xf32>
    %441 = arith.negf %440 : vector<16x128xf32>
    %442 = math.exp %441 : vector<16x128xf32>
    %cst_111 = arith.constant 1.000000e+00 : f32
    %443 = vector.broadcast %cst_111 : f32 to vector<16x128xf32>
    %444 = arith.addf %443, %442 : vector<16x128xf32>
    %445 = arith.divf %443, %444 : vector<16x128xf32>
    %446 = vector.extract_strided_slice %427 {offsets = [0, 256], sizes = [16, 128], strides = [1, 1]} : vector<16x384xf32> to vector<16x128xf32>
    %447 = vector.extract_strided_slice %429 {offsets = [0, 256], sizes = [16, 128], strides = [1, 1]} : vector<16x384xf32> to vector<16x128xf32>
    %448 = arith.addf %447, %25 : vector<16x128xf32>
    %449 = arith.mulf %437, %448 : vector<16x128xf32>
    %450 = arith.addf %446, %449 : vector<16x128xf32>
    %451 = math.tanh %450 : vector<16x128xf32>
    %452 = arith.subf %370, %451 : vector<16x128xf32>
    %453 = arith.mulf %445, %452 : vector<16x128xf32>
    %454 = arith.addf %451, %453 : vector<16x128xf32>
    %455 = vector.shape_cast %390 : vector<16x1xi1> to vector<16x1xi1>
    %456 = vector.broadcast %455 : vector<16x1xi1> to vector<16x128xi1>
    %457 = arith.select %456, %423, %367 : vector<16x128xi1>, vector<16x128xf32>
    %458 = vector.shape_cast %392 : vector<16x1xi1> to vector<16x1xi1>
    %459 = vector.broadcast %458 : vector<16x1xi1> to vector<16x128xi1>
    %460 = arith.select %459, %454, %370 : vector<16x128xi1>, vector<16x128xf32>
    %cst_112 = arith.constant 0.000000e+00 : f32
    %461 = vector.shape_cast %390 : vector<16x1xi1> to vector<16x1xi1>
    %462 = vector.broadcast %461 : vector<16x1xi1> to vector<16x128xi1>
    %463 = vector.broadcast %cst_112 : f32 to vector<16x128xf32>
    %464 = arith.select %462, %457, %463 : vector<16x128xi1>, vector<16x128xf32>
    %465 = arith.index_cast %c4_i32_100 : i32 to index
    %c0_113 = arith.constant 0 : index
    %c0_114 = arith.constant 0 : index
    %466 = vector.load %arg10[%465, %c0_113, %c0_114] : memref<8x16x128xf32, #tpu.memory_space<vmem>>, vector<1x16x128xf32>
    %467 = vector.shape_cast %466 : vector<1x16x128xf32> to vector<16x128xf32>
    %468 = vector.shape_cast %464 : vector<16x128xf32> to vector<1x16x128xf32>
    tpu.vector_store %arg10[%465, %c0_113, %c0_114], %468 {strides = array<i32>} : memref<8x16x128xf32, #tpu.memory_space<vmem>>, vector<1x16x128xf32>,
    %469 = arith.index_cast %388 : i32 to index
    %c0_115 = arith.constant 0 : index
    %c0_116 = arith.constant 0 : index
    %470 = vector.load %arg10[%469, %c0_115, %c0_116] : memref<8x16x128xf32, #tpu.memory_space<vmem>>, vector<1x16x128xf32>
    %471 = vector.shape_cast %470 : vector<1x16x128xf32> to vector<16x128xf32>
    %cst_117 = arith.constant 0.000000e+00 : f32
    %472 = vector.shape_cast %392 : vector<16x1xi1> to vector<16x1xi1>
    %473 = vector.broadcast %472 : vector<16x1xi1> to vector<16x128xi1>
    %474 = vector.broadcast %cst_117 : f32 to vector<16x128xf32>
    %475 = arith.select %473, %460, %474 : vector<16x128xi1>, vector<16x128xf32>
    %476 = arith.addf %471, %475 : vector<16x128xf32>
    %477 = arith.index_cast %388 : i32 to index
    %c0_118 = arith.constant 0 : index
    %c0_119 = arith.constant 0 : index
    %478 = vector.load %arg10[%477, %c0_118, %c0_119] : memref<8x16x128xf32, #tpu.memory_space<vmem>>, vector<1x16x128xf32>
    %479 = vector.shape_cast %478 : vector<1x16x128xf32> to vector<16x128xf32>
    %480 = vector.shape_cast %476 : vector<16x128xf32> to vector<1x16x128xf32>
    tpu.vector_store %arg10[%477, %c0_118, %c0_119], %480 {strides = array<i32>} : memref<8x16x128xf32, #tpu.memory_space<vmem>>, vector<1x16x128xf32>,
    %c5_i32 = arith.constant 5 : i32
    %c7_i32_120 = arith.constant 7 : i32
    %481 = arith.subi %c7_i32_120, %c5_i32 : i32
    %482 = vector.broadcast %c5_i32 : i32 to vector<16x1xi32>
    %483 = arith.cmpi slt, %482, %26 : vector<16x1xi32>
    %484 = vector.broadcast %481 : i32 to vector<16x1xi32>
    %485 = arith.cmpi slt, %484, %26 : vector<16x1xi32>
    %486 = arith.index_cast %c5_i32 : i32 to index
    %c0_121 = arith.constant 0 : index
    %c0_122 = arith.constant 0 : index
    %487 = vector.load %arg12[%486, %c0_121, %c0_122] : memref<8x16x384xbf16, #tpu.memory_space<vmem>>, vector<1x16x384xbf16>
    %488 = vector.shape_cast %487 : vector<1x16x384xbf16> to vector<16x384xbf16>
    %489 = arith.extf %488 : vector<16x384xbf16> to vector<16x384xf32>
    %490 = arith.truncf %457 : vector<16x128xf32> to vector<16x128xbf16>
    %cst_123 = arith.constant dense<0.000000e+00> : vector<16x384xf32>
    %491 = tpu.matmul %490, %18, %cst_123 {dimension_numbers = #tpu.dot_dimension_numbers<[1], [0], [0], [1], [0, 0, 1, 1], [], []>} : vector<16x128xbf16>, vector<128x384xbf16>, vector<16x384xf32> -> vector<16x384xf32>
    %492 = vector.extract_strided_slice %489 {offsets = [0, 0], sizes = [16, 128], strides = [1, 1]} : vector<16x384xf32> to vector<16x128xf32>
    %493 = vector.extract_strided_slice %491 {offsets = [0, 0], sizes = [16, 128], strides = [1, 1]} : vector<16x384xf32> to vector<16x128xf32>
    %494 = arith.addf %492, %493 : vector<16x128xf32>
    %495 = arith.negf %494 : vector<16x128xf32>
    %496 = math.exp %495 : vector<16x128xf32>
    %cst_124 = arith.constant 1.000000e+00 : f32
    %497 = vector.broadcast %cst_124 : f32 to vector<16x128xf32>
    %498 = arith.addf %497, %496 : vector<16x128xf32>
    %499 = arith.divf %497, %498 : vector<16x128xf32>
    %500 = vector.extract_strided_slice %489 {offsets = [0, 128], sizes = [16, 128], strides = [1, 1]} : vector<16x384xf32> to vector<16x128xf32>
    %501 = vector.extract_strided_slice %491 {offsets = [0, 128], sizes = [16, 128], strides = [1, 1]} : vector<16x384xf32> to vector<16x128xf32>
    %502 = arith.addf %500, %501 : vector<16x128xf32>
    %503 = arith.negf %502 : vector<16x128xf32>
    %504 = math.exp %503 : vector<16x128xf32>
    %cst_125 = arith.constant 1.000000e+00 : f32
    %505 = vector.broadcast %cst_125 : f32 to vector<16x128xf32>
    %506 = arith.addf %505, %504 : vector<16x128xf32>
    %507 = arith.divf %505, %506 : vector<16x128xf32>
    %508 = vector.extract_strided_slice %489 {offsets = [0, 256], sizes = [16, 128], strides = [1, 1]} : vector<16x384xf32> to vector<16x128xf32>
    %509 = vector.extract_strided_slice %491 {offsets = [0, 256], sizes = [16, 128], strides = [1, 1]} : vector<16x384xf32> to vector<16x128xf32>
    %510 = arith.addf %509, %22 : vector<16x128xf32>
    %511 = arith.mulf %499, %510 : vector<16x128xf32>
    %512 = arith.addf %508, %511 : vector<16x128xf32>
    %513 = math.tanh %512 : vector<16x128xf32>
    %514 = arith.subf %457, %513 : vector<16x128xf32>
    %515 = arith.mulf %507, %514 : vector<16x128xf32>
    %516 = arith.addf %513, %515 : vector<16x128xf32>
    %517 = arith.index_cast %481 : i32 to index
    %c0_126 = arith.constant 0 : index
    %c0_127 = arith.constant 0 : index
    %518 = vector.load %arg13[%517, %c0_126, %c0_127] : memref<8x16x384xbf16, #tpu.memory_space<vmem>>, vector<1x16x384xbf16>
    %519 = vector.shape_cast %518 : vector<1x16x384xbf16> to vector<16x384xbf16>
    %520 = arith.extf %519 : vector<16x384xbf16> to vector<16x384xf32>
    %521 = arith.truncf %460 : vector<16x128xf32> to vector<16x128xbf16>
    %cst_128 = arith.constant dense<0.000000e+00> : vector<16x384xf32>
    %522 = tpu.matmul %521, %19, %cst_128 {dimension_numbers = #tpu.dot_dimension_numbers<[1], [0], [0], [1], [0, 0, 1, 1], [], []>} : vector<16x128xbf16>, vector<128x384xbf16>, vector<16x384xf32> -> vector<16x384xf32>
    %523 = vector.extract_strided_slice %520 {offsets = [0, 0], sizes = [16, 128], strides = [1, 1]} : vector<16x384xf32> to vector<16x128xf32>
    %524 = vector.extract_strided_slice %522 {offsets = [0, 0], sizes = [16, 128], strides = [1, 1]} : vector<16x384xf32> to vector<16x128xf32>
    %525 = arith.addf %523, %524 : vector<16x128xf32>
    %526 = arith.negf %525 : vector<16x128xf32>
    %527 = math.exp %526 : vector<16x128xf32>
    %cst_129 = arith.constant 1.000000e+00 : f32
    %528 = vector.broadcast %cst_129 : f32 to vector<16x128xf32>
    %529 = arith.addf %528, %527 : vector<16x128xf32>
    %530 = arith.divf %528, %529 : vector<16x128xf32>
    %531 = vector.extract_strided_slice %520 {offsets = [0, 128], sizes = [16, 128], strides = [1, 1]} : vector<16x384xf32> to vector<16x128xf32>
    %532 = vector.extract_strided_slice %522 {offsets = [0, 128], sizes = [16, 128], strides = [1, 1]} : vector<16x384xf32> to vector<16x128xf32>
    %533 = arith.addf %531, %532 : vector<16x128xf32>
    %534 = arith.negf %533 : vector<16x128xf32>
    %535 = math.exp %534 : vector<16x128xf32>
    %cst_130 = arith.constant 1.000000e+00 : f32
    %536 = vector.broadcast %cst_130 : f32 to vector<16x128xf32>
    %537 = arith.addf %536, %535 : vector<16x128xf32>
    %538 = arith.divf %536, %537 : vector<16x128xf32>
    %539 = vector.extract_strided_slice %520 {offsets = [0, 256], sizes = [16, 128], strides = [1, 1]} : vector<16x384xf32> to vector<16x128xf32>
    %540 = vector.extract_strided_slice %522 {offsets = [0, 256], sizes = [16, 128], strides = [1, 1]} : vector<16x384xf32> to vector<16x128xf32>
    %541 = arith.addf %540, %25 : vector<16x128xf32>
    %542 = arith.mulf %530, %541 : vector<16x128xf32>
    %543 = arith.addf %539, %542 : vector<16x128xf32>
    %544 = math.tanh %543 : vector<16x128xf32>
    %545 = arith.subf %460, %544 : vector<16x128xf32>
    %546 = arith.mulf %538, %545 : vector<16x128xf32>
    %547 = arith.addf %544, %546 : vector<16x128xf32>
    %548 = vector.shape_cast %483 : vector<16x1xi1> to vector<16x1xi1>
    %549 = vector.broadcast %548 : vector<16x1xi1> to vector<16x128xi1>
    %550 = arith.select %549, %516, %457 : vector<16x128xi1>, vector<16x128xf32>
    %551 = vector.shape_cast %485 : vector<16x1xi1> to vector<16x1xi1>
    %552 = vector.broadcast %551 : vector<16x1xi1> to vector<16x128xi1>
    %553 = arith.select %552, %547, %460 : vector<16x128xi1>, vector<16x128xf32>
    %cst_131 = arith.constant 0.000000e+00 : f32
    %554 = vector.shape_cast %483 : vector<16x1xi1> to vector<16x1xi1>
    %555 = vector.broadcast %554 : vector<16x1xi1> to vector<16x128xi1>
    %556 = vector.broadcast %cst_131 : f32 to vector<16x128xf32>
    %557 = arith.select %555, %550, %556 : vector<16x128xi1>, vector<16x128xf32>
    %558 = arith.index_cast %c5_i32 : i32 to index
    %c0_132 = arith.constant 0 : index
    %c0_133 = arith.constant 0 : index
    %559 = vector.load %arg10[%558, %c0_132, %c0_133] : memref<8x16x128xf32, #tpu.memory_space<vmem>>, vector<1x16x128xf32>
    %560 = vector.shape_cast %559 : vector<1x16x128xf32> to vector<16x128xf32>
    %561 = vector.shape_cast %557 : vector<16x128xf32> to vector<1x16x128xf32>
    tpu.vector_store %arg10[%558, %c0_132, %c0_133], %561 {strides = array<i32>} : memref<8x16x128xf32, #tpu.memory_space<vmem>>, vector<1x16x128xf32>,
    %562 = arith.index_cast %481 : i32 to index
    %c0_134 = arith.constant 0 : index
    %c0_135 = arith.constant 0 : index
    %563 = vector.load %arg10[%562, %c0_134, %c0_135] : memref<8x16x128xf32, #tpu.memory_space<vmem>>, vector<1x16x128xf32>
    %564 = vector.shape_cast %563 : vector<1x16x128xf32> to vector<16x128xf32>
    %cst_136 = arith.constant 0.000000e+00 : f32
    %565 = vector.shape_cast %485 : vector<16x1xi1> to vector<16x1xi1>
    %566 = vector.broadcast %565 : vector<16x1xi1> to vector<16x128xi1>
    %567 = vector.broadcast %cst_136 : f32 to vector<16x128xf32>
    %568 = arith.select %566, %553, %567 : vector<16x128xi1>, vector<16x128xf32>
    %569 = arith.addf %564, %568 : vector<16x128xf32>
    %570 = arith.index_cast %481 : i32 to index
    %c0_137 = arith.constant 0 : index
    %c0_138 = arith.constant 0 : index
    %571 = vector.load %arg10[%570, %c0_137, %c0_138] : memref<8x16x128xf32, #tpu.memory_space<vmem>>, vector<1x16x128xf32>
    %572 = vector.shape_cast %571 : vector<1x16x128xf32> to vector<16x128xf32>
    %573 = vector.shape_cast %569 : vector<16x128xf32> to vector<1x16x128xf32>
    tpu.vector_store %arg10[%570, %c0_137, %c0_138], %573 {strides = array<i32>} : memref<8x16x128xf32, #tpu.memory_space<vmem>>, vector<1x16x128xf32>,
    %c6_i32 = arith.constant 6 : i32
    %c7_i32_139 = arith.constant 7 : i32
    %574 = arith.subi %c7_i32_139, %c6_i32 : i32
    %575 = vector.broadcast %c6_i32 : i32 to vector<16x1xi32>
    %576 = arith.cmpi slt, %575, %26 : vector<16x1xi32>
    %577 = vector.broadcast %574 : i32 to vector<16x1xi32>
    %578 = arith.cmpi slt, %577, %26 : vector<16x1xi32>
    %579 = arith.index_cast %c6_i32 : i32 to index
    %c0_140 = arith.constant 0 : index
    %c0_141 = arith.constant 0 : index
    %580 = vector.load %arg12[%579, %c0_140, %c0_141] : memref<8x16x384xbf16, #tpu.memory_space<vmem>>, vector<1x16x384xbf16>
    %581 = vector.shape_cast %580 : vector<1x16x384xbf16> to vector<16x384xbf16>
    %582 = arith.extf %581 : vector<16x384xbf16> to vector<16x384xf32>
    %583 = arith.truncf %550 : vector<16x128xf32> to vector<16x128xbf16>
    %cst_142 = arith.constant dense<0.000000e+00> : vector<16x384xf32>
    %584 = tpu.matmul %583, %18, %cst_142 {dimension_numbers = #tpu.dot_dimension_numbers<[1], [0], [0], [1], [0, 0, 1, 1], [], []>} : vector<16x128xbf16>, vector<128x384xbf16>, vector<16x384xf32> -> vector<16x384xf32>
    %585 = vector.extract_strided_slice %582 {offsets = [0, 0], sizes = [16, 128], strides = [1, 1]} : vector<16x384xf32> to vector<16x128xf32>
    %586 = vector.extract_strided_slice %584 {offsets = [0, 0], sizes = [16, 128], strides = [1, 1]} : vector<16x384xf32> to vector<16x128xf32>
    %587 = arith.addf %585, %586 : vector<16x128xf32>
    %588 = arith.negf %587 : vector<16x128xf32>
    %589 = math.exp %588 : vector<16x128xf32>
    %cst_143 = arith.constant 1.000000e+00 : f32
    %590 = vector.broadcast %cst_143 : f32 to vector<16x128xf32>
    %591 = arith.addf %590, %589 : vector<16x128xf32>
    %592 = arith.divf %590, %591 : vector<16x128xf32>
    %593 = vector.extract_strided_slice %582 {offsets = [0, 128], sizes = [16, 128], strides = [1, 1]} : vector<16x384xf32> to vector<16x128xf32>
    %594 = vector.extract_strided_slice %584 {offsets = [0, 128], sizes = [16, 128], strides = [1, 1]} : vector<16x384xf32> to vector<16x128xf32>
    %595 = arith.addf %593, %594 : vector<16x128xf32>
    %596 = arith.negf %595 : vector<16x128xf32>
    %597 = math.exp %596 : vector<16x128xf32>
    %cst_144 = arith.constant 1.000000e+00 : f32
    %598 = vector.broadcast %cst_144 : f32 to vector<16x128xf32>
    %599 = arith.addf %598, %597 : vector<16x128xf32>
    %600 = arith.divf %598, %599 : vector<16x128xf32>
    %601 = vector.extract_strided_slice %582 {offsets = [0, 256], sizes = [16, 128], strides = [1, 1]} : vector<16x384xf32> to vector<16x128xf32>
    %602 = vector.extract_strided_slice %584 {offsets = [0, 256], sizes = [16, 128], strides = [1, 1]} : vector<16x384xf32> to vector<16x128xf32>
    %603 = arith.addf %602, %22 : vector<16x128xf32>
    %604 = arith.mulf %592, %603 : vector<16x128xf32>
    %605 = arith.addf %601, %604 : vector<16x128xf32>
    %606 = math.tanh %605 : vector<16x128xf32>
    %607 = arith.subf %550, %606 : vector<16x128xf32>
    %608 = arith.mulf %600, %607 : vector<16x128xf32>
    %609 = arith.addf %606, %608 : vector<16x128xf32>
    %610 = arith.index_cast %574 : i32 to index
    %c0_145 = arith.constant 0 : index
    %c0_146 = arith.constant 0 : index
    %611 = vector.load %arg13[%610, %c0_145, %c0_146] : memref<8x16x384xbf16, #tpu.memory_space<vmem>>, vector<1x16x384xbf16>
    %612 = vector.shape_cast %611 : vector<1x16x384xbf16> to vector<16x384xbf16>
    %613 = arith.extf %612 : vector<16x384xbf16> to vector<16x384xf32>
    %614 = arith.truncf %553 : vector<16x128xf32> to vector<16x128xbf16>
    %cst_147 = arith.constant dense<0.000000e+00> : vector<16x384xf32>
    %615 = tpu.matmul %614, %19, %cst_147 {dimension_numbers = #tpu.dot_dimension_numbers<[1], [0], [0], [1], [0, 0, 1, 1], [], []>} : vector<16x128xbf16>, vector<128x384xbf16>, vector<16x384xf32> -> vector<16x384xf32>
    %616 = vector.extract_strided_slice %613 {offsets = [0, 0], sizes = [16, 128], strides = [1, 1]} : vector<16x384xf32> to vector<16x128xf32>
    %617 = vector.extract_strided_slice %615 {offsets = [0, 0], sizes = [16, 128], strides = [1, 1]} : vector<16x384xf32> to vector<16x128xf32>
    %618 = arith.addf %616, %617 : vector<16x128xf32>
    %619 = arith.negf %618 : vector<16x128xf32>
    %620 = math.exp %619 : vector<16x128xf32>
    %cst_148 = arith.constant 1.000000e+00 : f32
    %621 = vector.broadcast %cst_148 : f32 to vector<16x128xf32>
    %622 = arith.addf %621, %620 : vector<16x128xf32>
    %623 = arith.divf %621, %622 : vector<16x128xf32>
    %624 = vector.extract_strided_slice %613 {offsets = [0, 128], sizes = [16, 128], strides = [1, 1]} : vector<16x384xf32> to vector<16x128xf32>
    %625 = vector.extract_strided_slice %615 {offsets = [0, 128], sizes = [16, 128], strides = [1, 1]} : vector<16x384xf32> to vector<16x128xf32>
    %626 = arith.addf %624, %625 : vector<16x128xf32>
    %627 = arith.negf %626 : vector<16x128xf32>
    %628 = math.exp %627 : vector<16x128xf32>
    %cst_149 = arith.constant 1.000000e+00 : f32
    %629 = vector.broadcast %cst_149 : f32 to vector<16x128xf32>
    %630 = arith.addf %629, %628 : vector<16x128xf32>
    %631 = arith.divf %629, %630 : vector<16x128xf32>
    %632 = vector.extract_strided_slice %613 {offsets = [0, 256], sizes = [16, 128], strides = [1, 1]} : vector<16x384xf32> to vector<16x128xf32>
    %633 = vector.extract_strided_slice %615 {offsets = [0, 256], sizes = [16, 128], strides = [1, 1]} : vector<16x384xf32> to vector<16x128xf32>
    %634 = arith.addf %633, %25 : vector<16x128xf32>
    %635 = arith.mulf %623, %634 : vector<16x128xf32>
    %636 = arith.addf %632, %635 : vector<16x128xf32>
    %637 = math.tanh %636 : vector<16x128xf32>
    %638 = arith.subf %553, %637 : vector<16x128xf32>
    %639 = arith.mulf %631, %638 : vector<16x128xf32>
    %640 = arith.addf %637, %639 : vector<16x128xf32>
    %641 = vector.shape_cast %576 : vector<16x1xi1> to vector<16x1xi1>
    %642 = vector.broadcast %641 : vector<16x1xi1> to vector<16x128xi1>
    %643 = arith.select %642, %609, %550 : vector<16x128xi1>, vector<16x128xf32>
    %644 = vector.shape_cast %578 : vector<16x1xi1> to vector<16x1xi1>
    %645 = vector.broadcast %644 : vector<16x1xi1> to vector<16x128xi1>
    %646 = arith.select %645, %640, %553 : vector<16x128xi1>, vector<16x128xf32>
    %cst_150 = arith.constant 0.000000e+00 : f32
    %647 = vector.shape_cast %576 : vector<16x1xi1> to vector<16x1xi1>
    %648 = vector.broadcast %647 : vector<16x1xi1> to vector<16x128xi1>
    %649 = vector.broadcast %cst_150 : f32 to vector<16x128xf32>
    %650 = arith.select %648, %643, %649 : vector<16x128xi1>, vector<16x128xf32>
    %651 = arith.index_cast %c6_i32 : i32 to index
    %c0_151 = arith.constant 0 : index
    %c0_152 = arith.constant 0 : index
    %652 = vector.load %arg10[%651, %c0_151, %c0_152] : memref<8x16x128xf32, #tpu.memory_space<vmem>>, vector<1x16x128xf32>
    %653 = vector.shape_cast %652 : vector<1x16x128xf32> to vector<16x128xf32>
    %654 = vector.shape_cast %650 : vector<16x128xf32> to vector<1x16x128xf32>
    tpu.vector_store %arg10[%651, %c0_151, %c0_152], %654 {strides = array<i32>} : memref<8x16x128xf32, #tpu.memory_space<vmem>>, vector<1x16x128xf32>,
    %655 = arith.index_cast %574 : i32 to index
    %c0_153 = arith.constant 0 : index
    %c0_154 = arith.constant 0 : index
    %656 = vector.load %arg10[%655, %c0_153, %c0_154] : memref<8x16x128xf32, #tpu.memory_space<vmem>>, vector<1x16x128xf32>
    %657 = vector.shape_cast %656 : vector<1x16x128xf32> to vector<16x128xf32>
    %cst_155 = arith.constant 0.000000e+00 : f32
    %658 = vector.shape_cast %578 : vector<16x1xi1> to vector<16x1xi1>
    %659 = vector.broadcast %658 : vector<16x1xi1> to vector<16x128xi1>
    %660 = vector.broadcast %cst_155 : f32 to vector<16x128xf32>
    %661 = arith.select %659, %646, %660 : vector<16x128xi1>, vector<16x128xf32>
    %662 = arith.addf %657, %661 : vector<16x128xf32>
    %663 = arith.index_cast %574 : i32 to index
    %c0_156 = arith.constant 0 : index
    %c0_157 = arith.constant 0 : index
    %664 = vector.load %arg10[%663, %c0_156, %c0_157] : memref<8x16x128xf32, #tpu.memory_space<vmem>>, vector<1x16x128xf32>
    %665 = vector.shape_cast %664 : vector<1x16x128xf32> to vector<16x128xf32>
    %666 = vector.shape_cast %662 : vector<16x128xf32> to vector<1x16x128xf32>
    tpu.vector_store %arg10[%663, %c0_156, %c0_157], %666 {strides = array<i32>} : memref<8x16x128xf32, #tpu.memory_space<vmem>>, vector<1x16x128xf32>,
    %c7_i32_158 = arith.constant 7 : i32
    %c7_i32_159 = arith.constant 7 : i32
    %667 = arith.subi %c7_i32_159, %c7_i32_158 : i32
    %668 = vector.broadcast %c7_i32_158 : i32 to vector<16x1xi32>
    %669 = arith.cmpi slt, %668, %26 : vector<16x1xi32>
    %670 = vector.broadcast %667 : i32 to vector<16x1xi32>
    %671 = arith.cmpi slt, %670, %26 : vector<16x1xi32>
    %672 = arith.index_cast %c7_i32_158 : i32 to index
    %c0_160 = arith.constant 0 : index
    %c0_161 = arith.constant 0 : index
    %673 = vector.load %arg12[%672, %c0_160, %c0_161] : memref<8x16x384xbf16, #tpu.memory_space<vmem>>, vector<1x16x384xbf16>
    %674 = vector.shape_cast %673 : vector<1x16x384xbf16> to vector<16x384xbf16>
    %675 = arith.extf %674 : vector<16x384xbf16> to vector<16x384xf32>
    %676 = arith.truncf %643 : vector<16x128xf32> to vector<16x128xbf16>
    %cst_162 = arith.constant dense<0.000000e+00> : vector<16x384xf32>
    %677 = tpu.matmul %676, %18, %cst_162 {dimension_numbers = #tpu.dot_dimension_numbers<[1], [0], [0], [1], [0, 0, 1, 1], [], []>} : vector<16x128xbf16>, vector<128x384xbf16>, vector<16x384xf32> -> vector<16x384xf32>
    %678 = vector.extract_strided_slice %675 {offsets = [0, 0], sizes = [16, 128], strides = [1, 1]} : vector<16x384xf32> to vector<16x128xf32>
    %679 = vector.extract_strided_slice %677 {offsets = [0, 0], sizes = [16, 128], strides = [1, 1]} : vector<16x384xf32> to vector<16x128xf32>
    %680 = arith.addf %678, %679 : vector<16x128xf32>
    %681 = arith.negf %680 : vector<16x128xf32>
    %682 = math.exp %681 : vector<16x128xf32>
    %cst_163 = arith.constant 1.000000e+00 : f32
    %683 = vector.broadcast %cst_163 : f32 to vector<16x128xf32>
    %684 = arith.addf %683, %682 : vector<16x128xf32>
    %685 = arith.divf %683, %684 : vector<16x128xf32>
    %686 = vector.extract_strided_slice %675 {offsets = [0, 128], sizes = [16, 128], strides = [1, 1]} : vector<16x384xf32> to vector<16x128xf32>
    %687 = vector.extract_strided_slice %677 {offsets = [0, 128], sizes = [16, 128], strides = [1, 1]} : vector<16x384xf32> to vector<16x128xf32>
    %688 = arith.addf %686, %687 : vector<16x128xf32>
    %689 = arith.negf %688 : vector<16x128xf32>
    %690 = math.exp %689 : vector<16x128xf32>
    %cst_164 = arith.constant 1.000000e+00 : f32
    %691 = vector.broadcast %cst_164 : f32 to vector<16x128xf32>
    %692 = arith.addf %691, %690 : vector<16x128xf32>
    %693 = arith.divf %691, %692 : vector<16x128xf32>
    %694 = vector.extract_strided_slice %675 {offsets = [0, 256], sizes = [16, 128], strides = [1, 1]} : vector<16x384xf32> to vector<16x128xf32>
    %695 = vector.extract_strided_slice %677 {offsets = [0, 256], sizes = [16, 128], strides = [1, 1]} : vector<16x384xf32> to vector<16x128xf32>
    %696 = arith.addf %695, %22 : vector<16x128xf32>
    %697 = arith.mulf %685, %696 : vector<16x128xf32>
    %698 = arith.addf %694, %697 : vector<16x128xf32>
    %699 = math.tanh %698 : vector<16x128xf32>
    %700 = arith.subf %643, %699 : vector<16x128xf32>
    %701 = arith.mulf %693, %700 : vector<16x128xf32>
    %702 = arith.addf %699, %701 : vector<16x128xf32>
    %703 = arith.index_cast %667 : i32 to index
    %c0_165 = arith.constant 0 : index
    %c0_166 = arith.constant 0 : index
    %704 = vector.load %arg13[%703, %c0_165, %c0_166] : memref<8x16x384xbf16, #tpu.memory_space<vmem>>, vector<1x16x384xbf16>
    %705 = vector.shape_cast %704 : vector<1x16x384xbf16> to vector<16x384xbf16>
    %706 = arith.extf %705 : vector<16x384xbf16> to vector<16x384xf32>
    %707 = arith.truncf %646 : vector<16x128xf32> to vector<16x128xbf16>
    %cst_167 = arith.constant dense<0.000000e+00> : vector<16x384xf32>
    %708 = tpu.matmul %707, %19, %cst_167 {dimension_numbers = #tpu.dot_dimension_numbers<[1], [0], [0], [1], [0, 0, 1, 1], [], []>} : vector<16x128xbf16>, vector<128x384xbf16>, vector<16x384xf32> -> vector<16x384xf32>
    %709 = vector.extract_strided_slice %706 {offsets = [0, 0], sizes = [16, 128], strides = [1, 1]} : vector<16x384xf32> to vector<16x128xf32>
    %710 = vector.extract_strided_slice %708 {offsets = [0, 0], sizes = [16, 128], strides = [1, 1]} : vector<16x384xf32> to vector<16x128xf32>
    %711 = arith.addf %709, %710 : vector<16x128xf32>
    %712 = arith.negf %711 : vector<16x128xf32>
    %713 = math.exp %712 : vector<16x128xf32>
    %cst_168 = arith.constant 1.000000e+00 : f32
    %714 = vector.broadcast %cst_168 : f32 to vector<16x128xf32>
    %715 = arith.addf %714, %713 : vector<16x128xf32>
    %716 = arith.divf %714, %715 : vector<16x128xf32>
    %717 = vector.extract_strided_slice %706 {offsets = [0, 128], sizes = [16, 128], strides = [1, 1]} : vector<16x384xf32> to vector<16x128xf32>
    %718 = vector.extract_strided_slice %708 {offsets = [0, 128], sizes = [16, 128], strides = [1, 1]} : vector<16x384xf32> to vector<16x128xf32>
    %719 = arith.addf %717, %718 : vector<16x128xf32>
    %720 = arith.negf %719 : vector<16x128xf32>
    %721 = math.exp %720 : vector<16x128xf32>
    %cst_169 = arith.constant 1.000000e+00 : f32
    %722 = vector.broadcast %cst_169 : f32 to vector<16x128xf32>
    %723 = arith.addf %722, %721 : vector<16x128xf32>
    %724 = arith.divf %722, %723 : vector<16x128xf32>
    %725 = vector.extract_strided_slice %706 {offsets = [0, 256], sizes = [16, 128], strides = [1, 1]} : vector<16x384xf32> to vector<16x128xf32>
    %726 = vector.extract_strided_slice %708 {offsets = [0, 256], sizes = [16, 128], strides = [1, 1]} : vector<16x384xf32> to vector<16x128xf32>
    %727 = arith.addf %726, %25 : vector<16x128xf32>
    %728 = arith.mulf %716, %727 : vector<16x128xf32>
    %729 = arith.addf %725, %728 : vector<16x128xf32>
    %730 = math.tanh %729 : vector<16x128xf32>
    %731 = arith.subf %646, %730 : vector<16x128xf32>
    %732 = arith.mulf %724, %731 : vector<16x128xf32>
    %733 = arith.addf %730, %732 : vector<16x128xf32>
    %734 = vector.shape_cast %669 : vector<16x1xi1> to vector<16x1xi1>
    %735 = vector.broadcast %734 : vector<16x1xi1> to vector<16x128xi1>
    %736 = arith.select %735, %702, %643 : vector<16x128xi1>, vector<16x128xf32>
    %737 = vector.shape_cast %671 : vector<16x1xi1> to vector<16x1xi1>
    %738 = vector.broadcast %737 : vector<16x1xi1> to vector<16x128xi1>
    %739 = arith.select %738, %733, %646 : vector<16x128xi1>, vector<16x128xf32>
    %cst_170 = arith.constant 0.000000e+00 : f32
    %740 = vector.shape_cast %669 : vector<16x1xi1> to vector<16x1xi1>
    %741 = vector.broadcast %740 : vector<16x1xi1> to vector<16x128xi1>
    %742 = vector.broadcast %cst_170 : f32 to vector<16x128xf32>
    %743 = arith.select %741, %736, %742 : vector<16x128xi1>, vector<16x128xf32>
    %744 = arith.index_cast %c7_i32_158 : i32 to index
    %c0_171 = arith.constant 0 : index
    %c0_172 = arith.constant 0 : index
    %745 = vector.load %arg10[%744, %c0_171, %c0_172] : memref<8x16x128xf32, #tpu.memory_space<vmem>>, vector<1x16x128xf32>
    %746 = vector.shape_cast %745 : vector<1x16x128xf32> to vector<16x128xf32>
    %747 = vector.shape_cast %743 : vector<16x128xf32> to vector<1x16x128xf32>
    tpu.vector_store %arg10[%744, %c0_171, %c0_172], %747 {strides = array<i32>} : memref<8x16x128xf32, #tpu.memory_space<vmem>>, vector<1x16x128xf32>,
    %748 = arith.index_cast %667 : i32 to index
    %c0_173 = arith.constant 0 : index
    %c0_174 = arith.constant 0 : index
    %749 = vector.load %arg10[%748, %c0_173, %c0_174] : memref<8x16x128xf32, #tpu.memory_space<vmem>>, vector<1x16x128xf32>
    %750 = vector.shape_cast %749 : vector<1x16x128xf32> to vector<16x128xf32>
    %cst_175 = arith.constant 0.000000e+00 : f32
    %751 = vector.shape_cast %671 : vector<16x1xi1> to vector<16x1xi1>
    %752 = vector.broadcast %751 : vector<16x1xi1> to vector<16x128xi1>
    %753 = vector.broadcast %cst_175 : f32 to vector<16x128xf32>
    %754 = arith.select %752, %739, %753 : vector<16x128xi1>, vector<16x128xf32>
    %755 = arith.addf %750, %754 : vector<16x128xf32>
    %756 = arith.index_cast %667 : i32 to index
    %c0_176 = arith.constant 0 : index
    %c0_177 = arith.constant 0 : index
    %757 = vector.load %arg10[%756, %c0_176, %c0_177] : memref<8x16x128xf32, #tpu.memory_space<vmem>>, vector<1x16x128xf32>
    %758 = vector.shape_cast %757 : vector<1x16x128xf32> to vector<16x128xf32>
    %759 = vector.shape_cast %755 : vector<16x128xf32> to vector<1x16x128xf32>
    tpu.vector_store %arg10[%756, %c0_176, %c0_177], %759 {strides = array<i32>} : memref<8x16x128xf32, #tpu.memory_space<vmem>>, vector<1x16x128xf32>,
    %c4_i32_178 = arith.constant 4 : i32
    %c0_179 = arith.constant 0 : index
    %c0_180 = arith.constant 0 : index
    %c0_181 = arith.constant 0 : index
    %760 = vector.load %arg11[%c0_179, %c0_180, %c0_181] : memref<2x16x128xf32, #tpu.memory_space<vmem>>, vector<1x16x128xf32>
    %761 = vector.shape_cast %760 : vector<1x16x128xf32> to vector<16x128xf32>
    %762 = vector.shape_cast %736 : vector<16x128xf32> to vector<1x16x128xf32>
    tpu.vector_store %arg11[%c0_179, %c0_180, %c0_181], %762 {strides = array<i32>} : memref<2x16x128xf32, #tpu.memory_space<vmem>>, vector<1x16x128xf32>,
    %c1 = arith.constant 1 : index
    %c0_182 = arith.constant 0 : index
    %c0_183 = arith.constant 0 : index
    %763 = vector.load %arg11[%c1, %c0_182, %c0_183] : memref<2x16x128xf32, #tpu.memory_space<vmem>>, vector<1x16x128xf32>
    %764 = vector.shape_cast %763 : vector<1x16x128xf32> to vector<16x128xf32>
    %765 = vector.shape_cast %739 : vector<16x128xf32> to vector<1x16x128xf32>
    tpu.vector_store %arg11[%c1, %c0_182, %c0_183], %765 {strides = array<i32>} : memref<2x16x128xf32, #tpu.memory_space<vmem>>, vector<1x16x128xf32>,
    %c4 = arith.constant 4 : index
    %c0_184 = arith.constant 0 : index
    %c0_185 = arith.constant 0 : index
    %766 = vector.load %arg10[%c4, %c0_184, %c0_185] : memref<8x16x128xf32, #tpu.memory_space<vmem>>, vector<4x16x128xf32>
    %c0_186 = arith.constant 0 : index
    %c0_187 = arith.constant 0 : index
    %c0_188 = arith.constant 0 : index
    %767 = vector.load %arg14[%c0_186, %c0_187, %c0_188] : memref<4x16x128xf32, #tpu.memory_space<vmem>>, vector<4x16x128xf32>
    %768 = arith.addf %766, %767 : vector<4x16x128xf32>
    %c4_189 = arith.constant 4 : index
    %c0_190 = arith.constant 0 : index
    %c0_191 = arith.constant 0 : index
    %769 = vector.load %arg10[%c4_189, %c0_190, %c0_191] : memref<8x16x128xf32, #tpu.memory_space<vmem>>, vector<4x16x128xf32>
    tpu.vector_store %arg10[%c4_189, %c0_190, %c0_191], %768 {strides = array<i32>} : memref<8x16x128xf32, #tpu.memory_space<vmem>>, vector<4x16x128xf32>,
    return
  }
}

</mosaic_0001>

<bundles_post_ra>
// kernel: encoder_rnn_forward.1
= control target key start
LH: loop header
LB: loop body
LE: loop exit
PB: predicated region body
PF: predicated region fallthrough
CT: control target
= control target key end

     0   :  { %v7648_v1 = vmov 0   ;;  %v7650_v60 = vmov 0.0   ;;  %vm5184_vm8 = vmmov 0   ;;  %s7636_s2 = inlined_call_operand.vmem [shape: bf16[128,384], index: 2, kind: input, shape index: {}]   ;;  %s7637_s0 = inlined_call_operand.vmem [shape: bf16[128,128], index: 0, kind: input, shape index: {}]   ;;  %s7638_s3 = inlined_call_operand.vmem [shape: bf16[128,384], index: 3, kind: input, shape index: {}]   ;;  %s7639_s6 = inlined_call_operand.vmem [shape: bf16[128,384], index: 6, kind: input, shape index: {}]   ;;  %s7640_s7 = inlined_call_operand.vmem [shape: bf16[128,384], index: 7, kind: input, shape index: {}]   ;;  %s7641_s1 = inlined_call_operand.vmem [shape: s32[16,1], index: 1, kind: input, shape index: {}]   ;;  %s7642_s4 = inlined_call_operand.vmem [shape: f32[1,384], index: 4, kind: input, shape index: {}]   ;;  %s7643_s5 = inlined_call_operand.vmem [shape: f32[1,384], index: 5, kind: input, shape index: {}]   ;;  %s7644_s8 = inlined_call_operand.vmem [shape: f32[1,128], index: 8, kind: input, shape index: {}]   ;;  %s7645_s10 = inlined_call_operand.vmem [shape: f32[8,16,128], index: 10, kind: output, shape index: {0}]   ;;  %s7646_s9 = inlined_call_operand.vmem [shape: f32[1,128], index: 9, kind: input, shape index: {}]   ;;  %s7647_s11 = inlined_call_operand.vmem [shape: f32[2,16,128], index: 11, kind: output, shape index: {1}]  }
   0x1   :  { %v4618_v0 = vld [vmem:[%s7636_s2 + $0x4] ss:$12 sps:$4 sm:$0xff]   ;;  %311 = vmatprep.mubr.bf16.mxu0 %v7648_v1  ;;  %4616 = vset.pattern.permute.xlu0 %v7648_v1  ;;  %v4620_v2 = vld [vmem:[%s7636_s2] ss:$12 sps:$4 sm:$0xff]   ;;  %v4621_v3 = vld [vmem:[%s7636_s2 + $0x1c] ss:$12 sps:$4 sm:$0xff]  }
   0x2   :  { %4617 = vset.pattern.permute.xlu1 %v7648_v1  ;;  %279 = vmatprep.subr.bf16.mxu0 %v4618_v0  ;;  %v4623_v4 = vld [vmem:[%s7636_s2 + $0x18] ss:$12 sps:$4 sm:$0xff]   ;;  %v4624_v5 = vld [vmem:[%s7636_s2 + $0x34] ss:$12 sps:$4 sm:$0xff]   ;;  %v4626_v6 = vld [vmem:[%s7636_s2 + $0x30] ss:$12 sps:$4 sm:$0xff]  }
   0x3   :  { %280 = vmatpush1.bf16.msra.mxu0 %v4620_v2  ;;  %v4627_v7 = vld [vmem:[%s7636_s2 + $0x4c] ss:$12 sps:$4 sm:$0xff]   ;;  %v4638_v8 = vld [vmem:[%s7636_s2 + $0x8] ss:$12 sps:$4 sm:$0xff]   ;;  %v4630_v10 = vld [vmem:[%s7636_s2 + $0x64] ss:$12 sps:$4 sm:$0xff]  }
   0x4   :  { %281 = vmatprep.subr.bf16.mxu0 %v4621_v3  ;;  %v4629_v9 = vld [vmem:[%s7636_s2 + $0x48] ss:$12 sps:$4 sm:$0xff]   ;;  %4229 = vmatprep.subr.bf16.mxu1 %v4638_v8  ;;  %v4642_v11 = vld [vmem:[%s7636_s2 + $0x20] ss:$12 sps:$4 sm:$0xff]   ;;  %v4645_v13 = vld [vmem:[%s7636_s2 + $0x38] ss:$12 sps:$4 sm:$0xff]  }
   0x5   :  { %4230 = vmatpush3.bf16.msra.mxu1 %v4638_v8  ;;  %v4644_v12 = vld [vmem:[%s7637_s0] sm:$0xff]   ;;  %v4633_v15 = vld [vmem:[%s7636_s2 + $0x7c] ss:$12 sps:$4 sm:$0xff]   ;;  %v4640_v21 = vld [vmem:[%s7636_s2 + $0xac] ss:$12 sps:$4 sm:$0xff]  }
   0x6   :  { %4231 = vmatprep.subr.bf16.mxu1 %v4642_v11  ;;  %v4632_v14 = vld [vmem:[%s7636_s2 + $0x60] ss:$12 sps:$4 sm:$0xff]   ;;  %4245 = vmatprep.mubr.bf16.mxu1 %v4644_v12  ;;  %v4647_v16 = vld [vmem:[%s7636_s2 + $0x50] ss:$12 sps:$4 sm:$0xff]   ;;  %v4635_v17 = vld [vmem:[%s7636_s2 + $0x78] ss:$12 sps:$4 sm:$0xff]  }
   0x7   :  { %282 = vmatpush1.bf16.msra.mxu0 %v4623_v4  ;;  %v4636_v18 = vld [vmem:[%s7636_s2 + $0x94] ss:$12 sps:$4 sm:$0xff]   ;;  %v4639_v20 = vld [vmem:[%s7636_s2 + $0x90] ss:$12 sps:$4 sm:$0xff]   ;;  %v4653_v25 = vld [vmem:[%s7636_s2 + $0x98] ss:$12 sps:$4 sm:$0xff]  }
   0x8   :  { %283 = vmatprep.subr.bf16.mxu0 %v4624_v5  ;;  %v4649_v19 = vld [vmem:[%s7636_s2 + $0x68] ss:$12 sps:$4 sm:$0xff]   ;;  %v4651_v22 = vld [vmem:[%s7636_s2 + $0x80] ss:$12 sps:$4 sm:$0xff]   ;;  %v4655_v27 = vld [vmem:[%s7636_s2 + $0xb0] ss:$12 sps:$4 sm:$0xff]  }
   0x9   :  { %4232 = vmatpush3.bf16.msra.mxu1 %v4642_v11  ;;  %v4643_v23 = vld [vmem:[%s7636_s2 + $0xa8] ss:$12 sps:$4 sm:$0xff]   ;;  %v4650_v26 = vld [vmem:[%s7638_s3 + $0x20] ss:$12 sps:$4 sm:$0xff]   ;;  %v4654_v28 = vld [vmem:[%s7638_s3 + $0x38] ss:$12 sps:$4 sm:$0xff]  }
   0xa   :  { %4233 = vmatprep.subr.bf16.mxu1 %v4645_v13  ;;  %v4646_v24 = vld [vmem:[%s7638_s3 + $0x8] ss:$12 sps:$4 sm:$0xff]   ;;  %v4659_v29 = vld [vmem:[%s7638_s3 + $0x4] ss:$12 sps:$4 sm:$0xff]   ;;  %v4657_v32 = vld [vmem:[%s7638_s3] ss:$12 sps:$4 sm:$0xff]  }
   0xb   :  { %284 = vmatpush1.bf16.msra.mxu0 %v4626_v6  ;;  %v4648_v30 = vld [vmem:[%s7637_s0 + $0x8] sm:$0xff]   ;;  %v4660_v31 = vld [vmem:[%s7638_s3 + $0x50] ss:$12 sps:$4 sm:$0xff]   ;;  %v4661_v36 = vld [vmem:[%s7638_s3 + $0x18] ss:$12 sps:$4 sm:$0xff]  }
   0xc   :  { %285 = vmatprep.subr.bf16.mxu0 %v4627_v7  ;;  %v4663_v33 = vld [vmem:[%s7638_s3 + $0x1c] ss:$12 sps:$4 sm:$0xff]   ;;  %v4652_v34 = vld [vmem:[%s7637_s0 + $0x10] sm:$0xff]   ;;  %v4676_v38 = vld [vmem:[%s7638_s3 + $0x80] ss:$12 sps:$4 sm:$0xff]  }
   0xd   :  { %4234 = vmatpush3.bf16.msra.mxu1 %v4645_v13  ;;  %v4668_v35 = vld [vmem:[%s7638_s3 + $0x68] ss:$12 sps:$4 sm:$0xff]   ;;  %v4656_v39 = vld [vmem:[%s7637_s0 + $0x18] sm:$0xff]   ;;  %v4664_v42 = vld [vmem:[%s7637_s0 + $0x20] sm:$0xff]  }
   0xe   :  { %4235 = vmatprep.subr.bf16.mxu1 %v4647_v16  ;;  %v4667_v37 = vld [vmem:[%s7638_s3 + $0x34] ss:$12 sps:$4 sm:$0xff]   ;;  %v4665_v40 = vld [vmem:[%s7638_s3 + $0x30] ss:$12 sps:$4 sm:$0xff]   ;;  %v4671_v41 = vld [vmem:[%s7638_s3 + $0x4c] ss:$12 sps:$4 sm:$0xff]  }
   0xf   :  { %286 = vmatpush1.bf16.msra.mxu0 %v4629_v9  ;;  %v4685_v43 = vld [vmem:[%s7638_s3 + $0x98] ss:$12 sps:$4 sm:$0xff]   ;;  %v4669_v44 = vld [vmem:[%s7638_s3 + $0x48] ss:$12 sps:$4 sm:$0xff]   ;;  %v4690_v47 = vld [vmem:[%s7638_s3 + $0xb0] ss:$12 sps:$4 sm:$0xff]  }
  0x10   :  { %287 = vmatprep.subr.bf16.mxu0 %v4630_v10  ;;  %v4675_v45 = vld [vmem:[%s7638_s3 + $0x64] ss:$12 sps:$4 sm:$0xff]   ;;  %v4672_v46 = vld [vmem:[%s7637_s0 + $0x28] sm:$0xff]   ;;  %v4684_v53 = vld [vmem:[%s7638_s3 + $0x94] ss:$12 sps:$4 sm:$0xff]  }
  0x11   :  { %4236 = vmatpush3.bf16.msra.mxu1 %v4647_v16  ;;  %v4673_v48 = vld [vmem:[%s7638_s3 + $0x60] ss:$12 sps:$4 sm:$0xff]   ;;  %v4680_v49 = vld [vmem:[%s7637_s0 + $0x30] sm:$0xff]   ;;  %v4679_v50 = vld [vmem:[%s7638_s3 + $0x7c] ss:$12 sps:$4 sm:$0xff]  }
  0x12   :  { %4237 = vmatprep.subr.bf16.mxu1 %v4649_v19  ;;  %v5405_v51 = vld [vmem:[%s7639_s6 + $0x4] ss:$12 sps:$4 sm:$0xff]   ;;  %v4681_v54 = vld [vmem:[%s7637_s0 + $0x38] sm:$0xff]   ;;  %v4686_v57 = vld [vmem:[%s7638_s3 + $0xa8] ss:$12 sps:$4 sm:$0xff]  }
  0x13   :  { %288 = vmatpush1.bf16.msra.mxu0 %v4632_v14  ;;  %v4677_v52 = vld [vmem:[%s7638_s3 + $0x78] ss:$12 sps:$4 sm:$0xff]   ;;  %v4682_v55 = vld [vmem:[%s7638_s3 + $0x90] ss:$12 sps:$4 sm:$0xff]   ;;  %v5434_v59 = vld [vmem:[%s7639_s6 + $0x8] ss:$12 sps:$4 sm:$0xff]  }
  0x14   :  { %289 = vmatprep.subr.bf16.mxu0 %v4633_v15  ;;  %v4688_v56 = vld [vmem:[%s7638_s3 + $0xac] ss:$12 sps:$4 sm:$0xff]   ;;  %v4689_v58 = vld [vmem:[%s7637_s0] sm:$0xff]   ;;  %v5462_v0 = vld [vmem:[%s7639_s6 + $0x50] ss:$12 sps:$4 sm:$0xff]  }
  0x15   :  { %4238 = vmatpush3.bf16.msra.mxu1 %v4649_v19  ;;  %v5443_v61 = vld [vmem:[%s7639_s6 + $0x20] ss:$12 sps:$4 sm:$0xff]   ;;  %v5453_v63 = vld [vmem:[%s7639_s6 + $0x38] ss:$12 sps:$4 sm:$0xff]   ;;  %v4700_v2 = vld [vmem:[%s7637_s0 + $0x10] sm:$0xff]  }
  0x16   :  { %4239 = vmatprep.subr.bf16.mxu1 %v4651_v22  ;;  %v4694_v62 = vld [vmem:[%s7637_s0 + $0x8] sm:$0xff]   ;;  %v5478_v4 = vld [vmem:[%s7641_s1] sm:$0xff]  ;;  %v4703_v11 = vld [vmem:[%s7637_s0 + $0x18] sm:$0xff]  }
  0x17   :  { %290 = vmatpush1.bf16.msra.mxu0 %v4635_v17  ;;  %v5472_v3 = vld [vmem:[%s7639_s6 + $0x68] ss:$12 sps:$4 sm:$0xff]   ;;  %vm1116_vm0 = vcmp.gt.s32.totalorder %v5478_v4, 0  ;;  %v5487_v6 = vld [vmem:[%s7639_s6 + $0x80] ss:$12 sps:$4 sm:$0xff]   ;;  %vm1676_vm2 = vcmp.gt.s32.totalorder %v5478_v4, 1 }
  0x18   :  { %291 = vmatprep.subr.bf16.mxu0 %v4636_v18  ;;  %v1647_v5 = vsel %vm1116_vm0, 1, %v7648_v1  ;;  %v5492_v7 = vld [vmem:[%s7641_s1 + $0x8] sm:$0xff]  ;;  %v5510_v10 = vld [vmem:[%s7639_s6 + $0x98] ss:$12 sps:$4 sm:$0xff]   ;;  %v5527_v14 = vld [vmem:[%s7639_s6 + $0x34] ss:$12 sps:$4 sm:$0xff]  }
  0x19   :  { %4240 = vmatpush3.bf16.msra.mxu1 %v4651_v22  ;;  %1650 = vperm.xlu0 %4616, %v1647_v5   ;;  %v5498_v8 = vld [vmem:[%s7639_s6] ss:$12 sps:$4 sm:$0xff]   ;;  %v5503_v9 = vld [vmem:[%s7639_s6 + $0x1c] ss:$12 sps:$4 sm:$0xff]   ;;  %vm1117_vm1 = vcmp.gt.s32.totalorder %v5492_v7, 0  ;;  %v1954_v19 = vsel %vm1676_vm2, 1, %v7648_v1 }
  0x1a   :  { %4241 = vmatprep.subr.bf16.mxu1 %v4653_v25  ;;  %v1648_v13 = vsel %vm1117_vm1, 1, %v7648_v1  ;;  %v5534_v15 = vld [vmem:[%s7639_s6 + $0xb0] ss:$12 sps:$4 sm:$0xff]   ;;  %v4709_v17 = vld [vmem:[%s7637_s0 + $0x20] sm:$0xff]   ;;  %v5551_v18 = vld [vmem:[%s7639_s6 + $0x4c] ss:$12 sps:$4 sm:$0xff]  }
  0x1b   :  { %292 = vmatpush1.bf16.msra.mxu0 %v4639_v20  ;;  %v5541_v16 = vld [vmem:[%s7639_s6 + $0x30] ss:$12 sps:$4 sm:$0xff]   ;;  %v5560_v20 = vld [vmem:[%s7639_s6 + $0x48] ss:$12 sps:$4 sm:$0xff]   ;;  %vm1678_vm3 = vcmp.gt.s32.totalorder %v5478_v4, 6  ;;  %vm1988_vm4 = vcmp.gt.s32.totalorder %v5478_v4, 2 }
  0x1c   :  { %293 = vmatprep.subr.bf16.mxu0 %v4640_v21  ;;  %v5566_v21 = vld [vmem:[%s7639_s6 + $0x64] ss:$12 sps:$4 sm:$0xff]   ;;  %v4712_v22 = vld [vmem:[%s7637_s0 + $0x28] sm:$0xff]   ;;  %vm1990_vm5 = vcmp.gt.s32.totalorder %v5478_v4, 5  ;;  %vm2300_vm6 = vcmp.gt.s32.totalorder %v5478_v4, 3  ;;  %vm2302_vm7 = vcmp.gt.s32.totalorder %v5478_v4, 4 }
  0x1d   :  { %4242 = vmatpush3.bf16.msra.mxu1 %v4653_v25  ;;  %1653 = vperm.xlu0 %4616, %v1648_v13   ;;  %v5585_v25 = vld [vmem:[%s7639_s6 + $0x7c] ss:$12 sps:$4 sm:$0xff]   ;;  %vm1118_vm9 = vcmp.gt.s32.totalorder %v5478_v4, 7  ;;  %vm1119_vm10 = vcmp.gt.s32.totalorder %v5492_v7, 7  ;;  %vm1677_vm11 = vcmp.gt.s32.totalorder %v5492_v7, 1  ;;  %vm1679_vm12 = vcmp.gt.s32.totalorder %v5492_v7, 6 }
  0x1e   :  { %4243 = vmatprep.subr.bf16.mxu1 %v4655_v27  ;;  %vm1989_vm13 = vcmp.gt.s32.totalorder %v5492_v7, 2  ;;  %v5770_v5 = vld [vmem:[%s7640_s7 + $0x68] ss:$12 sps:$4 sm:$0xff]   ;;  %vm1991_vm14 = vcmp.gt.s32.totalorder %v5492_v7, 5  ;;  %vm2301_vm15 = vcmp.gt.s32.totalorder %v5492_v7, 3  ;;  %vm2303_vm0 = vcmp.gt.s32.totalorder %v5492_v7, 4 }
  0x1f   :  { %294 = vmatpush1.bf16.msra.mxu0 %v4643_v23  ;;  %v5576_v23 = vld [vmem:[%s7639_s6 + $0x60] ss:$12 sps:$4 sm:$0xff]   ;;  %v2267_v4 = vsel %vm1989_vm13, 1, %v7648_v1  ;;  %v2279_v13 = vsel %vm1991_vm14, 1, %v7648_v1 }
  0x20   :  { %4261 = vmatprep.subr.bf16.mxu0 %v4646_v24 }
  0x21   :  { %4244 = vmatpush3.bf16.msra.mxu1 %v4655_v27  ;;  %1957 = vperm.xlu0 %4616, %v1954_v19   ;;  %v5597_v27 = vld [vmem:[%s7639_s6 + $0x94] ss:$12 sps:$4 sm:$0xff]   ;;  %v2579_v19 = vsel %vm2301_vm15, 1, %v7648_v1 }
  0x22   :  { %312 = vmatmul.mubr.bf16.vlgmr.msra.gmra.mrb[0].mxu0 %v4644_v12  ;;  %778 = vmatprep.subr.bf16.mxu1 %v4659_v29  ;;  %v5520_v12 = vld [vmem:[%s7639_s6 + $0x18] ss:$12 sps:$4 sm:$0xff]  }
  0x23   :  { %4262 = vmatpush3.bf16.msra.mxu0 %v4646_v24  ;;  %321 = vmatprep.mubr.bf16.mxu0 %v7648_v1  ;;  %v4718_v24 = vld [vmem:[%s7637_s0 + $0x30] sm:$0xff]   ;;  %v4721_v29 = vld [vmem:[%s7637_s0 + $0x38] sm:$0xff]  }
  0x24   :  { %4263 = vmatprep.subr.bf16.mxu0 %v4650_v26  ;;  %4246 = vmatmul.mubr.bf16.vlgmr.msra.gmra.mrb[0].mxu1 %v4648_v30 }
  0x25   :  { %779 = vmatpush1.bf16.msra.mxu1 %v4657_v32  ;;  %4249 = vmatprep.mubr.bf16.mxu1 %v4652_v34  ;;  %v2266_v32 = vsel %vm1988_vm4, 1, %v7648_v1 }
  0x26   :  { %780 = vmatprep.subr.bf16.mxu1 %v4663_v33  ;;  %v5623_v33 = vld [vmem:[%s7639_s6 + $0xa8] ss:$12 sps:$4 sm:$0xff]  }
  0x27   :  { %4264 = vmatpush3.bf16.msra.mxu0 %v4650_v26  ;;  %v5591_v26 = vld [vmem:[%s7639_s6 + $0x78] ss:$12 sps:$4 sm:$0xff]  }
  0x28   :  { %4265 = vmatprep.subr.bf16.mxu0 %v4654_v28 }
  0x29   :  { %781 = vmatpush1.bf16.msra.mxu1 %v4661_v36  ;;  %v5639_v36 = vld [vmem:[%s7640_s7] ss:$12 sps:$4 sm:$0xff]  }
  0x2a   :  { %322 = vmatmul.mubr.bf16.gmra.mrb[4].mxu0 %v4648_v30  ;;  %782 = vmatprep.subr.bf16.mxu1 %v4667_v37  ;;  %v5609_v30 = vld [vmem:[%s7639_s6 + $0x90] ss:$12 sps:$4 sm:$0xff]  }
  0x2b   :  { %331 = vmatprep.mubr.bf16.mxu0 %v7648_v1  ;;  %4266 = vmatpush3.bf16.msra.mxu0 %v4654_v28  ;;  %v1966_v28 = vsel %vm1678_vm3, 1, %v7648_v1  ;;  %v5645_v37 = vld [vmem:[%s7640_s7 + $0x1c] ss:$12 sps:$4 sm:$0xff]  }
  0x2c   :  { %4267 = vmatprep.subr.bf16.mxu0 %v4660_v31  ;;  %4250 = vmatmul.mubr.bf16.gmra.mrb[4].mxu1 %v4656_v39 }
  0x2d   :  { %783 = vmatpush1.bf16.msra.mxu1 %v4665_v40  ;;  %4253 = vmatprep.mubr.bf16.mxu1 %v4664_v42  ;;  %v5661_v40 = vld [vmem:[%s7640_s7 + $0x34] ss:$12 sps:$4 sm:$0xff]  }
  0x2e   :  { %784 = vmatprep.subr.bf16.mxu1 %v4671_v41  ;;  %1969 = vperm.xlu0 %4616, %v1966_v28   ;;  %v2590_v41 = vsel %vm2302_vm7, 1, %v7648_v1 }
  0x2f   :  { %4268 = vmatpush3.bf16.msra.mxu0 %v4660_v31  ;;  %v5615_v31 = vld [vmem:[%s7639_s6 + $0xac] ss:$12 sps:$4 sm:$0xff]  }
  0x30   :  { %4269 = vmatprep.subr.bf16.mxu0 %v4668_v35 }
  0x31   :  { %785 = vmatpush1.bf16.msra.mxu1 %v4669_v44  ;;  %v1659_v44 = vsel %vm1118_vm9, 1, %v7648_v1 }
  0x32   :  { %332 = vmatmul.mubr.bf16.gmra.mrb[8].mxu0 %v4652_v34  ;;  %786 = vmatprep.subr.bf16.mxu1 %v4675_v45  ;;  %v5630_v34 = vld [vmem:[%s7640_s7 + $0x4] ss:$12 sps:$4 sm:$0xff]   ;;  %v5684_v45 = vld [vmem:[%s7640_s7 + $0x8] ss:$12 sps:$4 sm:$0xff]  }
  0x33   :  { %341 = vmatprep.mubr.bf16.mxu0 %v7648_v1  ;;  %4270 = vmatpush3.bf16.msra.mxu0 %v4668_v35  ;;  %v2278_v35 = vsel %vm1990_vm5, 1, %v7648_v1 }
  0x34   :  { %4271 = vmatprep.subr.bf16.mxu0 %v4676_v38  ;;  %4254 = vmatmul.mubr.bf16.gmra.mrb[8].mxu1 %v4672_v46 }
  0x35   :  { %787 = vmatpush1.bf16.msra.mxu1 %v4673_v48  ;;  %4257 = vmatprep.mubr.bf16.mxu1 %v4680_v49  ;;  %v1660_v48 = vsel %vm1119_vm10, 1, %v7648_v1 }
  0x36   :  { %788 = vmatprep.subr.bf16.mxu1 %v4679_v50  ;;  %2269 = vperm.xlu0 %4616, %v2266_v32   ;;  %v5714_v50 = vld [vmem:[%s7640_s7 + $0x60] ss:$12 sps:$4 sm:$0xff]  }
  0x37   :  { %4272 = vmatpush3.bf16.msra.mxu0 %v4676_v38  ;;  %v2578_v38 = vsel %vm2300_vm6, 1, %v7648_v1  ;;  %1662 = vperm.xlu1 %4617, %v1659_v44  }
  0x38   :  { %4273 = vmatprep.subr.bf16.mxu0 %v4685_v43 }
  0x39   :  { %789 = vmatpush1.bf16.msra.mxu1 %v4677_v52  ;;  %v5721_v52 = vld [vmem:[%s7640_s7 + $0x7c] ss:$12 sps:$4 sm:$0xff]  }
  0x3a   :  { %342 = vmatmul.mubr.bf16.gmra.mrb[12].mxu0 %v4656_v39  ;;  %790 = vmatprep.subr.bf16.mxu1 %v4684_v53  ;;  %v5654_v39 = vld [vmem:[%s7640_s7 + $0x18] ss:$12 sps:$4 sm:$0xff]   ;;  %v1955_v53 = vsel %vm1677_vm11, 1, %v7648_v1 }
  0x3b   :  { %351 = vmatprep.mubr.bf16.mxu0 %v7648_v1  ;;  %4274 = vmatpush3.bf16.msra.mxu0 %v4685_v43  ;;  %v5678_v43 = vld [vmem:[%s7640_s7 + $0x4c] ss:$12 sps:$4 sm:$0xff]  }
  0x3c   :  { %4275 = vmatprep.subr.bf16.mxu0 %v4690_v47  ;;  %4258 = vmatmul.mubr.bf16.gmra.mrb[12].mxu1 %v4681_v54 }
  0x3d   :  { %791 = vmatpush1.bf16.msra.mxu1 %v4682_v55  ;;  %810 = vmatprep.mubr.bf16.mxu1 %v7648_v1  ;;  %v5735_v55 = vld [vmem:[%s7640_s7 + $0x78] ss:$12 sps:$4 sm:$0xff]  }
  0x3e   :  { %792 = vmatprep.subr.bf16.mxu1 %v4688_v56  ;;  %2281 = vperm.xlu0 %4616, %v2278_v35   ;;  %v5742_v56 = vld [vmem:[%s7640_s7 + $0x94] ss:$12 sps:$4 sm:$0xff]  }
  0x3f   :  { %4276 = vmatpush3.bf16.msra.mxu0 %v4690_v47  ;;  %v5697_v47 = vld [vmem:[%s7640_s7 + $0x64] ss:$12 sps:$4 sm:$0xff]   ;;  %1665 = vperm.xlu1 %4617, %v1660_v48  }
  0x40   :  { %1257 = vmatprep.subr.bf16.mxu0 %v5405_v51 }
  0x41   :  { %793 = vmatpush1.bf16.msra.mxu1 %v4686_v57  ;;  %v1967_v57 = vsel %vm1679_vm12, 1, %v7648_v1 }
  0x42   :  { %352 = vmatmul.mubr.bf16.gmra.mrb[16].mxu0 %v4664_v42  ;;  %4293 = vmatprep.subr.bf16.mxu1 %v7650_v60  ;;  %v5671_v42 = vld [vmem:[%s7640_s7 + $0x30] ss:$12 sps:$4 sm:$0xff]  }
  0x43   :  { %361 = vmatprep.mubr.bf16.mxu0 %v7648_v1  ;;  %2581 = vperm.xlu0 %4616, %v2578_v38  }
  0x44   :  { %811 = vmatmul.mubr.bf16.vlgmr.msra.gmra.mrb[16].mxu1 %v4689_v58  ;;  %1960 = vperm.xlu1 %4617, %v1955_v53  }
  0x45   :  { %4294 = vmatpush3.bf16.msra.mxu1 %v5434_v59  ;;  %820 = vmatprep.mubr.bf16.mxu1 %v7648_v1 }
  0x46   :  { %4295 = vmatprep.subr.bf16.mxu1 %v7650_v60 }
  0x47   :  { %2593 = vperm.xlu0 %4616, %v2590_v41  }
  0x48   :  { %1972 = vperm.xlu1 %4617, %v1967_v57  }
  0x49   :  { %4296 = vmatpush3.bf16.msra.mxu1 %v5443_v61 }
  0x4a   :  { %362 = vmatmul.mubr.bf16.gmra.mrb[20].mxu0 %v4672_v46  ;;  %4297 = vmatprep.subr.bf16.mxu1 %v7650_v60  ;;  %v5690_v46 = vld [vmem:[%s7640_s7 + $0x48] ss:$12 sps:$4 sm:$0xff]  }
  0x4b   :  { %371 = vmatprep.mubr.bf16.mxu0 %v7648_v1 }
  0x4c   :  { %821 = vmatmul.mubr.bf16.gmra.mrb[20].mxu1 %v4694_v62  ;;  %2272 = vperm.xlu1 %4617, %v2267_v4  }
  0x4d   :  { %830 = vmatprep.mubr.bf16.mxu1 %v7648_v1  ;;  %4298 = vmatpush3.bf16.msra.mxu1 %v5453_v63 }
  0x4e   :  { %4299 = vmatprep.subr.bf16.mxu1 %v7650_v60 }
  0x50   :  { %2284 = vperm.xlu1 %4617, %v2279_v13  }
  0x51   :  { %4300 = vmatpush3.bf16.msra.mxu1 %v5462_v0 }
  0x52   :  { %372 = vmatmul.mubr.bf16.gmra.mrb[24].mxu0 %v4680_v49  ;;  %4301 = vmatprep.subr.bf16.mxu1 %v7650_v60  ;;  %v5705_v49 = vld [vmem:[%s7640_s7 + $0x20] ss:$12 sps:$4 sm:$0xff]  }
  0x53   :  { %381 = vmatprep.mubr.bf16.mxu0 %v7648_v1 }
  0x54   :  { %831 = vmatmul.mubr.bf16.gmra.mrb[24].mxu1 %v4700_v2  ;;  %2584 = vperm.xlu1 %4617, %v2579_v19  }
  0x55   :  { %840 = vmatprep.mubr.bf16.mxu1 %v7648_v1  ;;  %4302 = vmatpush3.bf16.msra.mxu1 %v5472_v3 }
  0x56   :  { %4303 = vmatprep.subr.bf16.mxu1 %v7650_v60 }
  0x59   :  { %4304 = vmatpush3.bf16.msra.mxu1 %v5487_v6 }
  0x5a   :  { %382 = vmatmul.mubr.bf16.gmra.mrb[28].mxu0 %v4681_v54  ;;  %4305 = vmatprep.subr.bf16.mxu1 %v7650_v60  ;;  %v5728_v54 = vld [vmem:[%s7640_s7 + $0x38] ss:$12 sps:$4 sm:$0xff]  }
  0x5b   :  { %4277 = vmatprep.mubr.bf16.mxu0 %v4689_v58  ;;  %v5749_v58 = vld [vmem:[%s7640_s7 + $0x50] ss:$12 sps:$4 sm:$0xff]  }
  0x5c   :  { %841 = vmatmul.mubr.bf16.gmra.mrb[28].mxu1 %v4703_v11 }
  0x5d   :  { %850 = vmatprep.mubr.bf16.mxu1 %v7648_v1  ;;  %4306 = vmatpush3.bf16.msra.mxu1 %v5510_v10 }
  0x5e   :  { %4307 = vmatprep.subr.bf16.mxu1 %v7650_v60 }
  0x61   :  { %4308 = vmatpush3.bf16.msra.mxu1 %v5534_v15 }
  0x62   :  { %4278 = vmatmul.mubr.bf16.vlgmr.msra.gmra.mrb[32].mxu0 %v4694_v62  ;;  %4313 = vmatprep.subr.bf16.mxu1 %v7650_v60  ;;  %v5756_v62 = vld [vmem:[%s7640_s7 + $0x90] ss:$12 sps:$4 sm:$0xff]  }
  0x63   :  { %1258 = vmatpush1.bf16.msra.mxu0 %v5498_v8  ;;  %4281 = vmatprep.mubr.bf16.mxu0 %v4700_v2  ;;  %v5763_v2 = vld [vmem:[%s7640_s7 + $0xac] ss:$12 sps:$4 sm:$0xff]  }
  0x64   :  { %1259 = vmatprep.subr.bf16.mxu0 %v5503_v9  ;;  %851 = vmatmul.mubr.bf16.gmra.mrb[32].mxu1 %v4709_v17 }
  0x65   :  { %860 = vmatprep.mubr.bf16.mxu1 %v7648_v1 }
  0x67   :  { %1260 = vmatpush1.bf16.msra.mxu0 %v5520_v12 }
  0x68   :  { %1261 = vmatprep.subr.bf16.mxu0 %v5527_v14 }
  0x6a   :  { %4282 = vmatmul.mubr.bf16.gmra.mrb[36].mxu0 %v4703_v11  ;;  %v5777_v11 = vld [vmem:[%s7640_s7 + $0xa8] ss:$12 sps:$4 sm:$0xff]  }
  0x6b   :  { %1262 = vmatpush1.bf16.msra.mxu0 %v5541_v16  ;;  %4285 = vmatprep.mubr.bf16.mxu0 %v4709_v17  ;;  %v5786_v17 = vld [vmem:[%s7640_s7 + $0x80] ss:$12 sps:$4 sm:$0xff]  }
  0x6c   :  { %1263 = vmatprep.subr.bf16.mxu0 %v5551_v18  ;;  %861 = vmatmul.mubr.bf16.gmra.mrb[36].mxu1 %v4712_v22 }
  0x6d   :  { %870 = vmatprep.mubr.bf16.mxu1 %v7648_v1 }
  0x6f   :  { %1264 = vmatpush1.bf16.msra.mxu0 %v5560_v20 }
  0x70   :  { %1265 = vmatprep.subr.bf16.mxu0 %v5566_v21 }
  0x72   :  { %4286 = vmatmul.mubr.bf16.gmra.mrb[40].mxu0 %v4712_v22  ;;  %v5797_v22 = vld [vmem:[%s7640_s7 + $0x98] ss:$12 sps:$4 sm:$0xff]  }
  0x73   :  { %1266 = vmatpush1.bf16.msra.mxu0 %v5576_v23  ;;  %4289 = vmatprep.mubr.bf16.mxu0 %v4718_v24 }
  0x74   :  { %1267 = vmatprep.subr.bf16.mxu0 %v5585_v25  ;;  %871 = vmatmul.mubr.bf16.gmra.mrb[40].mxu1 %v4718_v24  ;;  %v2591_v24 = vsel %vm2303_vm0, 1, %v7648_v1 }
  0x75   :  { %880 = vmatprep.mubr.bf16.mxu1 %v7648_v1  ;;  %2596 = vperm.xlu1 %4617, %v2591_v24  }
  0x77   :  { %1268 = vmatpush1.bf16.msra.mxu0 %v5591_v26 }
  0x78   :  { %1269 = vmatprep.subr.bf16.mxu0 %v5597_v27 }
  0x7a   :  { %4290 = vmatmul.mubr.bf16.gmra.mrb[44].mxu0 %v4721_v29 }
  0x7b   :  { %1270 = vmatpush1.bf16.msra.mxu0 %v5609_v30  ;;  %1289 = vmatprep.mubr.bf16.mxu0 %v7648_v1 }
  0x7c   :  { %1271 = vmatprep.subr.bf16.mxu0 %v5615_v31  ;;  %881 = vmatmul.mubr.bf16.gmra.mrb[44].mxu1 %v4721_v29 }
  0x7d   :  { %4309 = vmatprep.mubr.msk.bf16.mxu1 %vm5184_vm8, %v7650_v60 }
  0x7f   :  { %1272 = vmatpush1.bf16.msra.mxu0 %v5623_v33 }
  0x80   :  { %1521 = vmatprep.subr.bf16.mxu0 %v5630_v34 }
  0x82   :  { %1290 = vmatmul.mubr.bf16.vlgmr.msra.gmra.mrb[48].mxu0 %v7648_v1 }
  0x83   :  { %1522 = vmatpush1.bf16.msra.mxu0 %v5639_v36  ;;  %1553 = vmatprep.mubr.bf16.mxu0 %v7648_v1 }
  0x84   :  { %1523 = vmatprep.subr.bf16.mxu0 %v5645_v37  ;;  %4310 = vmatmul.mubr.bf16.vlgmr.msra.gmra.mrb[48].mxu1 %v7648_v1 }
  0x85   :  { %4314 = vmatpush3.bf16.msra.mxu1 %v5684_v45  ;;  %4329 = vmatprep.mubr.msk.bf16.mxu1 %vm5184_vm8, %v7650_v60 }
  0x86   :  { %4315 = vmatprep.subr.bf16.mxu1 %v7650_v60 }
  0x87   :  { %1524 = vmatpush1.bf16.msra.mxu0 %v5654_v39 }
  0x88   :  { %1525 = vmatprep.subr.bf16.mxu0 %v5661_v40 }
  0x89   :  { %4316 = vmatpush3.bf16.msra.mxu1 %v5705_v49 }
  0x8a   :  { %4317 = vmatprep.subr.bf16.mxu1 %v7650_v60 }
  0x8b   :  { %1526 = vmatpush1.bf16.msra.mxu0 %v5671_v42 }
  0x8c   :  { %1527 = vmatprep.subr.bf16.mxu0 %v5678_v43 }
  0x8d   :  { %4318 = vmatpush3.bf16.msra.mxu1 %v5728_v54 }
  0x8e   :  { %4319 = vmatprep.subr.bf16.mxu1 %v7650_v60 }
  0x8f   :  { %1528 = vmatpush1.bf16.msra.mxu0 %v5690_v46 }
  0x90   :  { %1529 = vmatprep.subr.bf16.mxu0 %v5697_v47 }
  0x91   :  { %4320 = vmatpush3.bf16.msra.mxu1 %v5749_v58 }
  0x92   :  { %4321 = vmatprep.subr.bf16.mxu1 %v7650_v60 }
  0x93   :  { %1530 = vmatpush1.bf16.msra.mxu0 %v5714_v50 }
  0x94   :  { %1531 = vmatprep.subr.bf16.mxu0 %v5721_v52 }
  0x95   :  { %4322 = vmatpush3.bf16.msra.mxu1 %v5770_v5 }
  0x96   :  { %4323 = vmatprep.subr.bf16.mxu1 %v7650_v60 }
  0x97   :  { %1532 = vmatpush1.bf16.msra.mxu0 %v5735_v55 }
  0x98   :  { %1533 = vmatprep.subr.bf16.mxu0 %v5742_v56 }
  0x99   :  { %4324 = vmatpush3.bf16.msra.mxu1 %v5786_v17 }
  0x9a   :  { %4325 = vmatprep.subr.bf16.mxu1 %v7650_v60 }
  0x9b   :  { %1534 = vmatpush1.bf16.msra.mxu0 %v5756_v62 }
  0x9c   :  { %1535 = vmatprep.subr.bf16.mxu0 %v5763_v2 }
  0x9d   :  { %4326 = vmatpush3.bf16.msra.mxu1 %v5797_v22 }
  0x9e   :  { %4327 = vmatprep.subr.bf16.mxu1 %v7650_v60 }
  0x9f   :  { %1536 = vmatpush1.bf16.msra.mxu0 %v5777_v11 }
  0xa0   :  { %1691 = vmatprep.subr.bf16.mxu0 %v5405_v51  ;;  %v5810_v51 = vld [vmem:[%s7640_s7 + $0xb0] ss:$12 sps:$4 sm:$0xff]  }
  0xa1   :  { %4328 = vmatpush3.bf16.msra.mxu1 %v5810_v51 }
  0xa2   :  { %1554 = vmatmul.mubr.bf16.vlgmr.msra.gmra.mrb[52].mxu0 %v7648_v1  ;;  %4333 = vmatprep.subr.bf16.mxu1 %v7650_v60 }
  0xa3   :  { %1692 = vmatpush1.bf16.msra.mxu0 %v5498_v8  ;;  %1723 = vmatprep.mubr.bf16.mxu0 %v7648_v1 }
  0xa4   :  { %1693 = vmatprep.subr.bf16.mxu0 %v5503_v9  ;;  %4330 = vmatmul.mubr.bf16.vlgmr.msra.gmra.mrb[52].mxu1 %v7648_v1 }
  0xa5   :  { %4334 = vmatpush3.bf16.msra.mxu1 %v5434_v59  ;;  %4349 = vmatprep.mubr.msk.bf16.mxu1 %vm5184_vm8, %v7650_v60  ;;  %v88_v59 = vlaneseq }
  0xa6   :  { %4335 = vmatprep.subr.bf16.mxu1 %v7650_v60 }
  0xa7   :  { %1694 = vmatpush1.bf16.msra.mxu0 %v5520_v12 }
  0xa8   :  { %1695 = vmatprep.subr.bf16.mxu0 %v5527_v14 }
  0xa9   :  { %4336 = vmatpush3.bf16.msra.mxu1 %v5443_v61  ;;  %v5848_v61 = vshrl.u32 %v88_v59, 7 }
  0xaa   :  { %4337 = vmatprep.subr.bf16.mxu1 %v7650_v60 }
  0xab   :  { %1696 = vmatpush1.bf16.msra.mxu0 %v5541_v16  ;;  %v7652_v16 = vsub.s32 2, %v5848_v61 }
  0xac   :  { %1697 = vmatprep.subr.bf16.mxu0 %v5551_v18 }
  0xad   :  { %4338 = vmatpush3.bf16.msra.mxu1 %v5453_v63  ;;  %v90_v63 = vsub.s32 0, %v5848_v61 }
  0xae   :  { %4339 = vmatprep.subr.bf16.mxu1 %v7650_v60 }
  0xaf   :  { %1698 = vmatpush1.bf16.msra.mxu0 %v5560_v20 }
  0xb0   :  { %1699 = vmatprep.subr.bf16.mxu0 %v5566_v21 }
  0xb1   :  { %4340 = vmatpush3.bf16.msra.mxu1 %v5462_v0  ;;  %v86_v0 = vld [vmem:[%s7642_s4] sm:$0x7] }
  0xb2   :  { %4341 = vmatprep.subr.bf16.mxu1 %v7650_v60 }
  0xb3   :  { %1700 = vmatpush1.bf16.msra.mxu0 %v5576_v23 }
  0xb4   :  { %1701 = vmatprep.subr.bf16.mxu0 %v5585_v25  ;;  %v5874_v25 = vrot.slane %v86_v0, %v7652_v16 }
  0xb5   :  { %4342 = vmatpush3.bf16.msra.mxu1 %v5472_v3  ;;  %v94_v3 = vsub.s32 1, %v5848_v61 }
  0xb6   :  { %4343 = vmatprep.subr.bf16.mxu1 %v7650_v60 }
  0xb7   :  { %1702 = vmatpush1.bf16.msra.mxu0 %v5591_v26  ;;  %v5861_v8 = vrot.slane %v86_v0, %v94_v3 }
  0xb8   :  { %1703 = vmatprep.subr.bf16.mxu0 %v5597_v27 }
  0xb9   :  { %4344 = vmatpush3.bf16.msra.mxu1 %v5487_v6  ;;  %v5857_v6 = vrot.slane %v86_v0, %v90_v63 }
  0xba   :  { %4345 = vmatprep.subr.bf16.mxu1 %v7650_v60 }
  0xbb   :  { %1704 = vmatpush1.bf16.msra.mxu0 %v5609_v30 }
  0xbc   :  { %1705 = vmatprep.subr.bf16.mxu0 %v5615_v31 }
  0xbd   :  { %4346 = vmatpush3.bf16.msra.mxu1 %v5510_v10 }
  0xbe   :  { %4347 = vmatprep.subr.bf16.mxu1 %v7650_v60 }
  0xbf   :  { %1706 = vmatpush1.bf16.msra.mxu0 %v5623_v33 }
  0xc0   :  { %1828 = vmatprep.subr.bf16.mxu0 %v5630_v34 }
  0xc1   :  { %4348 = vmatpush3.bf16.msra.mxu1 %v5534_v15 }
  0xc2   :  { %4353 = vmatprep.subr.bf16.mxu1 %v7650_v60 }
  0xf5   :  { %v313_v7 = vpop.f32.mrb[0].mxu0 }
  0xf6   :  { %v315_v9 = vpop.f32.mrb[1].mxu0  ;;  %v314_v12 = vadd.f32 %v313_v7, %v5857_v6 }
  0xf7   :  { %v317_v10 = vpop.f32.mrb[2].mxu0  ;;  %v316_v18 = vadd.f32 %v315_v9, %v5861_v8  ;;  %v4247_v31 = vpop.f32.mrb[0].mxu1 }
  0xf8   :  { %v318_v14 = vadd.f32 %v317_v10, %v5857_v6  ;;  %v319_v15 = vpop.f32.mrb[3].mxu0  ;;  %v435_v34 = vadd.f32 %v4247_v31, %v5874_v25  ;;  %v426_v35 = vpop.f32.mrb[1].mxu1 }
  0xf9   :  { %v320_v20 = vadd.f32 %v319_v15, %v5861_v8  ;;  %v427_v41 = vadd.f32 %v426_v35, %v5874_v25  ;;  %v4248_v44 = vpop.f32.mrb[2].mxu1 }
  0xfa   :  { %v5868_v21 = vpack.c.bf16 %v318_v14, %v314_v12  ;;  %v438_v53 = vadd.f32 %v4248_v44, %v5874_v25  ;;  %v429_v57 = vpop.f32.mrb[3].mxu1 }
  0xfb   :  { %v5870_v23 = vpack.c.bf16 %v320_v20, %v316_v18  ;;  %v430_v13 = vadd.f32 %v429_v57, %v5874_v25 }
  0xfc   :  { %v5888_v19 = vpack.c.bf16 %v438_v53, %v435_v34 }
  0xfd   :  { %v323_v26 = vpop.f32.mrb[4].mxu0  ;;  %v5890_v59 = vpack.c.bf16 %v430_v13, %v427_v41 }
  0xfe   :  { %v324_v27 = vadd.f32 %v323_v26, %v5857_v6  ;;  %v325_v28 = vpop.f32.mrb[5].mxu0 }
  0xff   :  { %v326_v29 = vadd.f32 %v325_v28, %v5861_v8  ;;  %v327_v30 = vpop.f32.mrb[6].mxu0  ;;  %v4251_v12 = vpop.f32.mrb[4].mxu1 }
 0x100   :  { %v328_v32 = vadd.f32 %v327_v30, %v5857_v6  ;;  %v329_v33 = vpop.f32.mrb[7].mxu0  ;;  %v451_v18 = vadd.f32 %v4251_v12, %v5874_v25  ;;  %v442_v20 = vpop.f32.mrb[5].mxu1 }
 0x101   :  { %v330_v38 = vadd.f32 %v329_v33, %v5861_v8  ;;  %v4252_v28 = vpop.f32.mrb[6].mxu1 }
 0x102   :  { %v5882_v48 = vpack.c.bf16 %v328_v32, %v324_v27  ;;  %v443_v27 = vadd.f32 %v442_v20, %v5874_v25  ;;  %v454_v30 = vadd.f32 %v4252_v28, %v5874_v25  ;;  %v445_v31 = vpop.f32.mrb[7].mxu1 }
 0x103   :  { %v5885_v4 = vpack.c.bf16 %v330_v38, %v326_v29  ;;  %v446_v33 = vadd.f32 %v445_v31, %v5874_v25 }
 0x104   :  { %v5904_v34 = vpack.c.bf16 %v454_v30, %v451_v18 }
 0x105   :  { %v333_v24 = vpop.f32.mrb[8].mxu0  ;;  %v5906_v38 = vpack.c.bf16 %v446_v33, %v443_v27 }
 0x106   :  { %v334_v0 = vadd.f32 %v333_v24, %v5857_v6  ;;  %v335_v7 = vpop.f32.mrb[9].mxu0  ;;  %7756 = vst [vmem:[#allocation5_spill] sm:$0xff] %v5904_v34 }
 0x107   :  { %v336_v9 = vadd.f32 %v335_v7, %v5861_v8  ;;  %v337_v10 = vpop.f32.mrb[10].mxu0  ;;  %v4255_v13 = vpop.f32.mrb[8].mxu1 }
 0x108   :  { %v338_v14 = vadd.f32 %v337_v10, %v5857_v6  ;;  %v339_v15 = vpop.f32.mrb[11].mxu0  ;;  %v467_v7 = vadd.f32 %v4255_v13, %v5874_v25 }
 0x109   :  { %v340_v26 = vadd.f32 %v339_v15, %v5861_v8 }
 0x10a   :  { %v5898_v29 = vpack.c.bf16 %v338_v14, %v334_v0 }
 0x10b   :  { %v5901_v32 = vpack.c.bf16 %v340_v26, %v336_v9  ;;  %v458_v9 = vpop.f32.mrb[9].mxu1 }
 0x10c   :  { %v459_v12 = vadd.f32 %v458_v9, %v5874_v25  ;;  %v4256_v14 = vpop.f32.mrb[10].mxu1 }
 0x10d   :  { %v343_v35 = vpop.f32.mrb[12].mxu0  ;;  %v470_v18 = vadd.f32 %v4256_v14, %v5874_v25  ;;  %v461_v20 = vpop.f32.mrb[11].mxu1 }
 0x10e   :  { %v344_v41 = vadd.f32 %v343_v35, %v5857_v6  ;;  %v345_v44 = vpop.f32.mrb[13].mxu0  ;;  %v462_v27 = vadd.f32 %v461_v20, %v5874_v25 }
 0x10f   :  { %v346_v53 = vadd.f32 %v345_v44, %v5861_v8  ;;  %v347_v57 = vpop.f32.mrb[14].mxu0  ;;  %v5920_v28 = vpack.c.bf16 %v470_v18, %v467_v7 }
 0x110   :  { %v348_v24 = vadd.f32 %v347_v57, %v5857_v6  ;;  %v349_v0 = vpop.f32.mrb[15].mxu0  ;;  %v5922_v31 = vpack.c.bf16 %v462_v27, %v459_v12  ;;  %v5933_v12 = vld [vmem:[%s7643_s5] sm:$0x7] }
 0x111   :  { %v350_v10 = vadd.f32 %v349_v0, %v5861_v8  ;;  %7759 = vst [vmem:[#allocation8_spill] sm:$0xff] %v5920_v28 }
 0x112   :  { %v5914_v15 = vpack.c.bf16 %v348_v24, %v344_v41  ;;  %7760 = vst [vmem:[#allocation9_spill] sm:$0xff] %v5922_v31  ;;  %v4259_v41 = vpop.f32.mrb[12].mxu1  ;;  %v1124_v31 = vunpack.c.l.bf16 %v5870_v23 }
 0x113   :  { %v5917_v26 = vpack.c.bf16 %v350_v10, %v346_v53  ;;  %v483_v53 = vadd.f32 %v4259_v41, %v5874_v25  ;;  %v474_v0 = vpop.f32.mrb[13].mxu1 }
 0x114   :  { %7757 = vst [vmem:[#allocation6_spill] sm:$0xff] %v5914_v15  ;;  %v475_v7 = vadd.f32 %v474_v0, %v5874_v25  ;;  %v4260_v10 = vpop.f32.mrb[14].mxu1 }
 0x115   :  { %7758 = vst [vmem:[#allocation7_spill] sm:$0xff] %v5917_v26  ;;  %v353_v30 = vpop.f32.mrb[16].mxu0  ;;  %v486_v18 = vadd.f32 %v4260_v10, %v5874_v25  ;;  %v477_v20 = vpop.f32.mrb[15].mxu1 }
 0x116   :  { %v354_v33 = vadd.f32 %v353_v30, %v5857_v6  ;;  %v355_v35 = vpop.f32.mrb[17].mxu0  ;;  %v478_v30 = vadd.f32 %v477_v20, %v5874_v25 }
 0x117   :  { %v356_v44 = vadd.f32 %v355_v35, %v5861_v8  ;;  %v357_v57 = vpop.f32.mrb[18].mxu0  ;;  %v5941_v35 = vpack.c.bf16 %v486_v18, %v483_v53  ;;  %v812_v0 = vpop.f32.mrb[16].mxu1 }
 0x118   :  { %v358_v13 = vadd.f32 %v357_v57, %v5857_v6  ;;  %v359_v24 = vpop.f32.mrb[19].mxu0  ;;  %v5946_v57 = vrot.slane %v5933_v12, %v90_v63  ;;  %v814_v18 = vpop.f32.mrb[17].mxu1 }
 0x119   :  { %v360_v9 = vadd.f32 %v359_v24, %v5861_v8  ;;  %7763 = vst [vmem:[#allocation12_spill] sm:$0xff] %v5941_v35  ;;  %v5948_v24 = vpack.c.bf16 %v478_v30, %v475_v7  ;;  %v816_v30 = vpop.f32.mrb[18].mxu1 }
 0x11a   :  { %v5935_v14 = vpack.c.bf16 %v358_v13, %v354_v33  ;;  %v5953_v33 = vrot.slane %v5933_v12, %v94_v3  ;;  %v813_v63 = vadd.f32 %v812_v0, %v5946_v57  ;;  %v818_v1 = vpop.f32.mrb[19].mxu1 }
 0x11b   :  { %v5938_v27 = vpack.c.bf16 %v360_v9, %v356_v44  ;;  %7764 = vst [vmem:[#allocation13_spill] sm:$0xff] %v5948_v24 }
 0x11c   :  { %7761 = vst [vmem:[#allocation10_spill] sm:$0xff] %v5935_v14  ;;  %v815_v20 = vadd.f32 %v814_v18, %v5953_v33 }
 0x11d   :  { %7762 = vst [vmem:[#allocation11_spill] sm:$0xff] %v5938_v27  ;;  %v363_v41 = vpop.f32.mrb[20].mxu0 }
 0x11e   :  { %v364_v44 = vadd.f32 %v363_v41, %v5857_v6  ;;  %v365_v13 = vpop.f32.mrb[21].mxu0  ;;  %v817_v41 = vadd.f32 %v816_v30, %v5946_v57 }
 0x11f   :  { %v366_v25 = vadd.f32 %v365_v13, %v5861_v8  ;;  %v367_v53 = vpop.f32.mrb[22].mxu0  ;;  %v819_v13 = vadd.f32 %v818_v1, %v5953_v33 }
 0x120   :  { %v368_v9 = vadd.f32 %v367_v53, %v5857_v6  ;;  %v369_v10 = vpop.f32.mrb[23].mxu0  ;;  %v5967_v16 = vpack.c.bf16 %v817_v41, %v813_v63 }
 0x121   :  { %v370_v7 = vadd.f32 %v369_v10, %v5861_v8  ;;  %v5969_v35 = vpack.c.bf16 %v819_v13, %v815_v20 }
 0x122   :  { %v5961_v3 = vpack.c.bf16 %v368_v9, %v364_v44  ;;  %7767 = vst [vmem:[#allocation16_spill] sm:$0xff] %v5967_v16  ;;  %v822_v44 = vpop.f32.mrb[20].mxu1 }
 0x123   :  { %v5964_v60 = vpack.c.bf16 %v370_v7, %v366_v25  ;;  %7768 = vst [vmem:[#allocation17_spill] sm:$0xff] %v5969_v35  ;;  %v823_v25 = vadd.f32 %v822_v44, %v5946_v57  ;;  %v824_v7 = vpop.f32.mrb[21].mxu1 }
 0x124   :  { %7765 = vst [vmem:[#allocation14_spill] sm:$0xff] %v5961_v3  ;;  %v825_v63 = vadd.f32 %v824_v7, %v5953_v33  ;;  %v826_v41 = vpop.f32.mrb[22].mxu1 }
 0x125   :  { %7766 = vst [vmem:[#allocation15_spill] sm:$0xff] %v5964_v60  ;;  %v373_v53 = vpop.f32.mrb[24].mxu0  ;;  %v827_v13 = vadd.f32 %v826_v41, %v5946_v57 }
 0x126   :  { %v374_v0 = vadd.f32 %v373_v53, %v5857_v6  ;;  %v375_v10 = vpop.f32.mrb[25].mxu0  ;;  %v828_v53 = vpop.f32.mrb[23].mxu1 }
 0x127   :  { %v376_v18 = vadd.f32 %v375_v10, %v5861_v8  ;;  %v377_v24 = vpop.f32.mrb[26].mxu0  ;;  %v829_v10 = vadd.f32 %v828_v53, %v5953_v33  ;;  %v5983_v16 = vpack.c.bf16 %v827_v13, %v823_v25 }
 0x128   :  { %v378_v9 = vadd.f32 %v377_v24, %v5857_v6  ;;  %v379_v30 = vpop.f32.mrb[27].mxu0 }
 0x129   :  { %v380_v1 = vadd.f32 %v379_v30, %v5861_v8  ;;  %7771 = vst [vmem:[#allocation20_spill] sm:$0xff] %v5983_v16  ;;  %v5985_v28 = vpack.c.bf16 %v829_v10, %v825_v63  ;;  %v7774_v10 = vsub.s32 2, %v5848_v61 }
 0x12a   :  { %v5977_v20 = vpack.c.bf16 %v378_v9, %v374_v0  ;;  %v832_v0 = vpop.f32.mrb[24].mxu1 }
 0x12b   :  { %v5980_v35 = vpack.c.bf16 %v380_v1, %v376_v18  ;;  %7772 = vst [vmem:[#allocation21_spill] sm:$0xff] %v5985_v28  ;;  %v833_v18 = vadd.f32 %v832_v0, %v5946_v57  ;;  %v834_v1 = vpop.f32.mrb[25].mxu1 }
 0x12c   :  { %7769 = vst [vmem:[#allocation18_spill] sm:$0xff] %v5977_v20  ;;  %v835_v25 = vadd.f32 %v834_v1, %v5953_v33  ;;  %v836_v13 = vpop.f32.mrb[26].mxu1 }
 0x12d   :  { %7770 = vst [vmem:[#allocation19_spill] sm:$0xff] %v5980_v35  ;;  %v383_v24 = vpop.f32.mrb[28].mxu0  ;;  %v838_v28 = vpop.f32.mrb[27].mxu1 }
 0x12e   :  { %v384_v44 = vadd.f32 %v383_v24, %v5857_v6  ;;  %v385_v30 = vpop.f32.mrb[29].mxu0  ;;  %v5998_v24 = vrot.slane %v5933_v12, %v7774_v10 }
 0x12f   :  { %v386_v7 = vadd.f32 %v385_v30, %v5861_v8  ;;  %v387_v60 = vpop.f32.mrb[30].mxu0  ;;  %v837_v30 = vadd.f32 %v836_v13, %v5946_v57  ;;  %v842_v12 = vpop.f32.mrb[28].mxu1 }
 0x130   :  { %v388_v9 = vadd.f32 %v387_v60, %v5857_v6  ;;  %v389_v41 = vpop.f32.mrb[31].mxu0  ;;  %v839_v6 = vadd.f32 %v838_v28, %v5953_v33 }
 0x131   :  { %v390_v53 = vadd.f32 %v389_v41, %v5861_v8  ;;  %v6004_v0 = vpack.c.bf16 %v837_v30, %v833_v18 }
 0x132   :  { %v5993_v63 = vpack.c.bf16 %v388_v9, %v384_v44  ;;  %v6006_v41 = vpack.c.bf16 %v839_v6, %v835_v25 }
 0x133   :  { %v6001_v60 = vpack.c.bf16 %v390_v53, %v386_v7  ;;  %7776 = vst [vmem:[#allocation24_spill] sm:$0xff] %v6004_v0  ;;  %v843_v7 = vadd.f32 %v842_v12, %v5946_v57  ;;  %v844_v53 = vpop.f32.mrb[29].mxu1 }
 0x134   :  { %7773 = vst [vmem:[#allocation22_spill] sm:$0xff] %v5993_v63  ;;  %7777 = vst [vmem:[#allocation25_spill] sm:$0xff] %v6006_v41  ;;  %v845_v18 = vadd.f32 %v844_v53, %v5953_v33  ;;  %v846_v30 = vpop.f32.mrb[30].mxu1 }
 0x135   :  { %7775 = vst [vmem:[#allocation23_spill] sm:$0xff] %v6001_v60  ;;  %v4279_v8 = vpop.f32.mrb[32].mxu0  ;;  %v847_v6 = vadd.f32 %v846_v30, %v5946_v57 }
 0x136   :  { %v934_v44 = vadd.f32 %v4279_v8, %v5998_v24  ;;  %v925_v9 = vpop.f32.mrb[33].mxu0  ;;  %v848_v8 = vpop.f32.mrb[31].mxu1 }
 0x137   :  { %v926_v61 = vadd.f32 %v925_v9, %v5998_v24  ;;  %v4280_v1 = vpop.f32.mrb[34].mxu0  ;;  %v849_v9 = vadd.f32 %v848_v8, %v5953_v33  ;;  %v6020_v63 = vpack.c.bf16 %v847_v6, %v843_v7 }
 0x138   :  { %v937_v10 = vadd.f32 %v4280_v1, %v5998_v24  ;;  %v928_v13 = vpop.f32.mrb[35].mxu0 }
 0x139   :  { %v929_v28 = vadd.f32 %v928_v13, %v5998_v24  ;;  %7780 = vst [vmem:[#allocation28_spill] sm:$0xff] %v6020_v63  ;;  %v6022_v16 = vpack.c.bf16 %v849_v9, %v845_v18 }
 0x13a   :  { %v6014_v25 = vpack.c.bf16 %v937_v10, %v934_v44  ;;  %v852_v44 = vpop.f32.mrb[32].mxu1 }
 0x13b   :  { %v6017_v60 = vpack.c.bf16 %v929_v28, %v926_v61  ;;  %7781 = vst [vmem:[#allocation29_spill] sm:$0xff] %v6022_v16  ;;  %v853_v61 = vadd.f32 %v852_v44, %v5946_v57  ;;  %v854_v28 = vpop.f32.mrb[33].mxu1 }
 0x13c   :  { %7778 = vst [vmem:[#allocation26_spill] sm:$0xff] %v6014_v25  ;;  %v855_v7 = vadd.f32 %v854_v28, %v5953_v33  ;;  %v856_v6 = vpop.f32.mrb[34].mxu1 }
 0x13d   :  { %7779 = vst [vmem:[#allocation27_spill] sm:$0xff] %v6017_v60  ;;  %v4283_v1 = vpop.f32.mrb[36].mxu0  ;;  %v857_v9 = vadd.f32 %v856_v6, %v5946_v57 }
 0x13e   :  { %v950_v12 = vadd.f32 %v4283_v1, %v5998_v24  ;;  %v941_v13 = vpop.f32.mrb[37].mxu0  ;;  %v858_v1 = vpop.f32.mrb[35].mxu1 }
 0x13f   :  { %v942_v53 = vadd.f32 %v941_v13, %v5998_v24  ;;  %v4284_v35 = vpop.f32.mrb[38].mxu0  ;;  %v859_v13 = vadd.f32 %v858_v1, %v5953_v33  ;;  %v6036_v25 = vpack.c.bf16 %v857_v9, %v853_v61 }
 0x140   :  { %v953_v10 = vadd.f32 %v4284_v35, %v5998_v24  ;;  %v944_v30 = vpop.f32.mrb[39].mxu0 }
 0x141   :  { %v945_v8 = vadd.f32 %v944_v30, %v5998_v24  ;;  %7784 = vst [vmem:[#allocation32_spill] sm:$0xff] %v6036_v25  ;;  %v6038_v20 = vpack.c.bf16 %v859_v13, %v855_v7 }
 0x142   :  { %v6030_v18 = vpack.c.bf16 %v953_v10, %v950_v12  ;;  %v862_v12 = vpop.f32.mrb[36].mxu1 }
 0x143   :  { %v6033_v60 = vpack.c.bf16 %v945_v8, %v942_v53  ;;  %7785 = vst [vmem:[#allocation33_spill] sm:$0xff] %v6038_v20  ;;  %v863_v53 = vadd.f32 %v862_v12, %v5946_v57  ;;  %v864_v8 = vpop.f32.mrb[37].mxu1 }
 0x144   :  { %7782 = vst [vmem:[#allocation30_spill] sm:$0xff] %v6030_v18  ;;  %v865_v61 = vadd.f32 %v864_v8, %v5953_v33  ;;  %v866_v9 = vpop.f32.mrb[38].mxu1 }
 0x145   :  { %7783 = vst [vmem:[#allocation31_spill] sm:$0xff] %v6033_v60  ;;  %v4287_v35 = vpop.f32.mrb[40].mxu0  ;;  %v867_v13 = vadd.f32 %v866_v9, %v5946_v57 }
 0x146   :  { %v966_v44 = vadd.f32 %v4287_v35, %v5998_v24  ;;  %v957_v30 = vpop.f32.mrb[41].mxu0  ;;  %v868_v35 = vpop.f32.mrb[39].mxu1 }
 0x147   :  { %v958_v28 = vadd.f32 %v957_v30, %v5998_v24  ;;  %v4288_v41 = vpop.f32.mrb[42].mxu0  ;;  %v869_v30 = vadd.f32 %v868_v35, %v5953_v33  ;;  %v6052_v0 = vpack.c.bf16 %v867_v13, %v863_v53  ;;  %v872_v8 = vpop.f32.mrb[40].mxu1 }
 0x148   :  { %v969_v10 = vadd.f32 %v4288_v41, %v5998_v24  ;;  %v960_v6 = vpop.f32.mrb[43].mxu0 }
 0x149   :  { %v961_v1 = vadd.f32 %v960_v6, %v5998_v24  ;;  %7788 = vst [vmem:[#allocation36_spill] sm:$0xff] %v6052_v0  ;;  %v6054_v3 = vpack.c.bf16 %v869_v30, %v865_v61 }
 0x14a   :  { %v6046_v7 = vpack.c.bf16 %v969_v10, %v966_v44 }
 0x14b   :  { %v6049_v60 = vpack.c.bf16 %v961_v1, %v958_v28  ;;  %7789 = vst [vmem:[#allocation37_spill] sm:$0xff] %v6054_v3  ;;  %v873_v28 = vadd.f32 %v872_v8, %v5946_v57  ;;  %v874_v1 = vpop.f32.mrb[41].mxu1 }
 0x14c   :  { %7786 = vst [vmem:[#allocation34_spill] sm:$0xff] %v6046_v7  ;;  %v875_v53 = vadd.f32 %v874_v1, %v5953_v33  ;;  %v876_v13 = vpop.f32.mrb[42].mxu1 }
 0x14d   :  { %7787 = vst [vmem:[#allocation35_spill] sm:$0xff] %v6049_v60  ;;  %v4291_v41 = vpop.f32.mrb[44].mxu0  ;;  %v877_v30 = vadd.f32 %v876_v13, %v5946_v57 }
 0x14e   :  { %v973_v12 = vpop.f32.mrb[45].mxu0  ;;  %v982_v44 = vadd.f32 %v4291_v41, %v5998_v24 }
 0x14f   :  { %v974_v6 = vadd.f32 %v973_v12, %v5998_v24  ;;  %v4292_v18 = vpop.f32.mrb[46].mxu0  ;;  %v878_v12 = vpop.f32.mrb[43].mxu1  ;;  %v6069_v63 = vpack.c.bf16 %v877_v30, %v873_v28 }
 0x150   :  { %v985_v10 = vadd.f32 %v4292_v18, %v5998_v24  ;;  %v976_v9 = vpop.f32.mrb[47].mxu0  ;;  %v879_v41 = vadd.f32 %v878_v12, %v5953_v33  ;;  %v1123_v18 = vunpack.c.l.bf16 %v5868_v21 }
 0x151   :  { %v977_v35 = vadd.f32 %v976_v9, %v5998_v24 }
 0x152   :  { %v6062_v61 = vpack.c.bf16 %v985_v10, %v982_v44  ;;  %v6072_v24 = vpack.c.bf16 %v879_v41, %v875_v53  ;;  %v1126_v44 = vunpack.c.h.bf16 %v5868_v21 }
 0x153   :  { %v6065_v16 = vpack.c.bf16 %v977_v35, %v974_v6  ;;  %v1127_v6 = vunpack.c.h.bf16 %v5870_v23  ;;  %v882_v35 = vpop.f32.mrb[44].mxu1 }
 0x154   :  { %v883_v28 = vadd.f32 %v882_v35, %v5946_v57  ;;  %v884_v30 = vpop.f32.mrb[45].mxu1 }
 0x155   :  { %v1291_v8 = vpop.f32.mrb[48].mxu0  ;;  %v885_v20 = vadd.f32 %v884_v30, %v5953_v33  ;;  %v886_v53 = vpop.f32.mrb[46].mxu1 }
 0x156   :  { %v1341_v9 = vadd.f32 %v1291_v8, %v1123_v18  ;;  %v1293_v1 = vpop.f32.mrb[49].mxu0  ;;  %v887_v18 = vadd.f32 %v886_v53, %v5946_v57  ;;  %v888_v21 = vpop.f32.mrb[47].mxu1  ;;  %v6083_v57 = vld [vmem:[%s7644_s8] ss:$0 sm:$0xff] }
 0x157   :  { %v1355_v10 = vadd.f32 %v1293_v1, %v1124_v31  ;;  %v1295_v13 = vpop.f32.mrb[50].mxu0  ;;  %v889_v31 = vadd.f32 %v888_v21, %v5953_v33 }
 0x158   :  { %v3909_v27 = vmul.f32 -1.442695, %v1341_v9  ;;  %v1342_v12 = vadd.f32 %v1295_v13, %v1126_v44  ;;  %v1297_v14 = vpop.f32.mrb[51].mxu0  ;;  %v1009_v23 = vpack.c.bf16 %v887_v18, %v883_v28  ;;  %v1334_v9 = vpop.f32.mrb[48].mxu1  ;;  %v1125_v28 = vunpack.c.l.bf16 %v5890_v59 }
 0x159   :  { %v1356_v60 = vadd.f32 %v1297_v14, %v1127_v6  ;;  %v1010_v8 = vpack.c.bf16 %v889_v31, %v885_v20  ;;  %v4311_v1 = vpop.f32.mrb[49].mxu1  ;;  %v3911_v13 = vmul.f32 -1.442695, %v1355_v10  ;;  %v1369_v33 = vadd.f32 %v6083_v57, %v1334_v9 }
 0x15a   :  { %4762 = vpow2.f32 %v3909_v27  ;;  %v3910_v41 = vmul.f32 -1.442695, %v1342_v12  ;;  %v1337_v44 = vpop.f32.mrb[50].mxu1  ;;  %v1128_v18 = vunpack.c.h.bf16 %v5890_v59  ;;  %v1387_v1 = vunpack.c.l.bf16 %v1009_v23 }
 0x15b   :  { %v4312_v35 = vpop.f32.mrb[51].mxu1  ;;  %v3912_v14 = vmul.f32 -1.442695, %v1356_v60 }
 0x15c   :  { %4764 = vpow2.f32 %v3910_v41 }
 0x15d   :  { %4766 = vpow2.f32 %v3911_v13 }
 0x164   :  { %v4763_v25 = vpop.eup %4762 }
 0x165   :  { %v1349_v6 = vadd.f32 1.0, %v4763_v25  ;;  %v1370_v25 = vadd.f32 %v6083_v57, %v1337_v44 }
 0x166   :  { %v4765_v30 = vpop.eup %4764 }
 0x167   :  { %4768 = vrcp.f32 %v1349_v6  ;;  %v1350_v27 = vadd.f32 1.0, %v4765_v30  ;;  %v4767_v20 = vpop.eup %4766 }
 0x168   :  { %4770 = vpow2.f32 %v3912_v14  ;;  %v1363_v41 = vadd.f32 1.0, %v4767_v20  ;;  %v1388_v14 = vunpack.c.l.bf16 %v1010_v8 }
 0x169   :  { %4772 = vrcp.f32 %v1350_v27  ;;  %v1390_v27 = vunpack.c.h.bf16 %v1009_v23 }
 0x171   :  { %v4769_v12 = vpop.eup %4768 }
 0x172   :  { %v4771_v10 = vpop.eup %4770  ;;  %v1371_v60 = vmul.f32 %v4769_v12, %v1369_v33  ;;  %v1391_v12 = vunpack.c.h.bf16 %v1010_v8 }
 0x173   :  { %v4773_v53 = vpop.eup %4772  ;;  %v1364_v13 = vadd.f32 1.0, %v4771_v10  ;;  %v6089_v10 = vpop.permute.xlu0 %1650 }
 0x174   :  { %v1373_v21 = vadd.f32 %v1371_v60, %v1125_v28  ;;  %v1372_v31 = vmul.f32 %v4773_v53, %v1370_v25  ;;  %7790 = vst [vmem:[#allocation38_spill] sm:$0xff] %v6089_v10  ;;  %vm1655_vm1 = vcmp.eq.s32.totalorder %v6089_v10, 1 }
 0x175   :  { %v1555_v35 = vpop.f32.mrb[52].mxu0 }
 0x176   :  { %4774 = vtanh.f32 %v1373_v21  ;;  %v1374_v9 = vadd.f32 %v1372_v31, %v1128_v18  ;;  %v1605_v6 = vadd.f32 %v1555_v35, %v1387_v1  ;;  %v1557_v30 = vpop.f32.mrb[53].mxu0 }
 0x177   :  { %4776 = vrcp.f32 %v1363_v41  ;;  %v1619_v34 = vadd.f32 %v1557_v30, %v1388_v14  ;;  %v1559_v33 = vpop.f32.mrb[54].mxu0  ;;  %v1598_v60 = vpop.f32.mrb[52].mxu1 }
 0x178   :  { %4778 = vtanh.f32 %v1374_v9  ;;  %v3937_v44 = vmul.f32 -1.442695, %v1605_v6  ;;  %v1606_v20 = vadd.f32 %v1559_v33, %v1390_v27  ;;  %v1561_v26 = vpop.f32.mrb[55].mxu0  ;;  %v4331_v53 = vpop.f32.mrb[53].mxu1 }
 0x179   :  { %4780 = vrcp.f32 %v1364_v13  ;;  %v1620_v59 = vadd.f32 %v1561_v26, %v1391_v12  ;;  %v1601_v41 = vpop.f32.mrb[54].mxu1  ;;  %v3939_v31 = vmul.f32 -1.442695, %v1619_v34  ;;  %v6092_v13 = vpop.permute.xlu0 %1653 }
 0x17a   :  { %4782 = vpow2.f32 %v3937_v44  ;;  %v3938_v28 = vmul.f32 -1.442695, %v1606_v20  ;;  %v4332_v8 = vpop.f32.mrb[55].mxu1  ;;  %7791 = vst [vmem:[#allocation39_spill] sm:$0xff] %v6092_v13  ;;  %vm7725_vm2 = vcmp.eq.s32.totalorder %v6092_v13, 1 }
 0x17b   :  { %v3940_v26 = vmul.f32 -1.442695, %v1620_v59  ;;  %vm3941_vm3 = vmpackc.low %vm7725_vm2, %vm1655_vm1 }
 0x17c   :  { %4784 = vpow2.f32 %v3938_v28  ;;  %v6118_v28 = vld [vmem:[%s7646_s9] ss:$0 sm:$0xff] }
 0x17d   :  { %4786 = vpow2.f32 %v3939_v31  ;;  %v1633_v53 = vadd.f32 %v6118_v28, %v1598_v60  ;;  %v1634_v60 = vadd.f32 %v6118_v28, %v1601_v41  ;;  %v6217_v41 = vld [vmem:[%s7639_s6 + $0x34] ss:$12 sps:$4 sm:$0xff]  }
 0x180   :  { %v4775_v25 = vpop.eup %4774 }
 0x181   :  { %v4777_v18 = vpop.eup %4776  ;;  %v1377_v23 = vsub.f32 0.0, %v4775_v25 }
 0x182   :  { %v4779_v21 = vpop.eup %4778 }
 0x183   :  { %v4781_v1 = vpop.eup %4780  ;;  %v1378_v35 = vsub.f32 0.0, %v4779_v21  ;;  %v1379_v14 = vmul.f32 %v4777_v18, %v1377_v23  ;;  %v7793_v18 = vmov 0  }
 0x184   :  { %v4783_v9 = vpop.eup %4782 }
 0x185   :  { %v1613_v6 = vadd.f32 1.0, %v4783_v9  ;;  %v1380_v30 = vmul.f32 %v4781_v1, %v1378_v35  ;;  %v1381_v27 = vadd.f32 %v4775_v25, %v1379_v14  ;;  %v7792_v25 = vmov 0.0   ;;  %v6224_v9 = vld [vmem:[%s7639_s6 + $0x30] ss:$12 sps:$4 sm:$0xff]  }
 0x186   :  { %v4785_v33 = vpop.eup %4784  ;;  %v1392_v1 = vunpack.c.h.bf16 %v6062_v61 }
 0x187   :  { %4788 = vrcp.f32 %v1613_v6  ;;  %v1614_v12 = vadd.f32 1.0, %v4785_v33  ;;  %v1382_v34 = vadd.f32 %v4779_v21, %v1380_v30  ;;  %v6097_v44 = vsel %vm1655_vm1, %v1381_v27, 0.0  ;;  %v4787_v23 = vpop.eup %4786  ;;  %v6236_v6 = vld [vmem:[%s7639_s6 + $0x4c] ss:$12 sps:$4 sm:$0xff]   ;;  %v6243_v30 = vld [vmem:[%s7639_s6 + $0x48] ss:$12 sps:$4 sm:$0xff]  }
 0x188   :  { %4790 = vpow2.f32 %v3940_v26  ;;  %1671 = vst [vmem:[%s7645_s10] sm:$0xff] %v6097_v44  ;;  %v1627_v8 = vadd.f32 1.0, %v4787_v23  ;;  %v6230_v26 = vld [vmem:[%s7639_s6 + $0x38] ss:$12 sps:$4 sm:$0xff]   ;;  %v6287_v23 = vld [vmem:[%s7639_s6 + $0x80] ss:$12 sps:$4 sm:$0xff]  }
 0x189   :  { %4792 = vrcp.f32 %v1614_v12  ;;  %v3942_v20 = vpack.c.bf16 %v1382_v34, %v1381_v27  ;;  %v6105_v59 = vsel %vm7725_vm2, %v1382_v34, 0.0  ;;  %v6249_v27 = vld [vmem:[%s7639_s6 + $0x50] ss:$12 sps:$4 sm:$0xff]   ;;  %v6262_v12 = vld [vmem:[%s7639_s6 + $0x60] ss:$12 sps:$4 sm:$0xff]   ;;  %7801 = vst [vmem:[#allocation47_spill] sm:$0xff] %v6287_v23 }
 0x18a   :  { %1672 = vst [vmem:[%s7645_s10 + $0x8] sm:$0xff] %v6105_v59  ;;  %v6255_v33 = vld [vmem:[%s7639_s6 + $0x64] ss:$12 sps:$4 sm:$0xff]   ;;  %7797 = vst [vmem:[#allocation43_spill] sm:$0xff] %v6262_v12  ;;  %v6268_v34 = vld [vmem:[%s7639_s6 + $0x68] ss:$12 sps:$4 sm:$0xff]  }
 0x18b   :  { %3943 = vmatmul.mubr.msk.bf16.vlgmr.msra.gmra.mrb[56].mxu0 %vm3941_vm3, %v3942_v20  ;;  %4350 = vmatmul.mubr.msk.bf16.vlgmr.msra.gmra.mrb[56].mxu1 %vm3941_vm3, %v3942_v20  ;;  %7796 = vst [vmem:[#allocation42_spill] sm:$0xff] %v6255_v33  ;;  %7798 = vst [vmem:[#allocation44_spill] sm:$0xff] %v6268_v34  ;;  %v6274_v20 = vld [vmem:[%s7639_s6 + $0x7c] ss:$12 sps:$4 sm:$0xff]  }
 0x18c   :  { %1829 = vmatpush1.bf16.msra.mxu0 %v5639_v36  ;;  %4354 = vmatpush3.bf16.msra.mxu1 %v5684_v45  ;;  %7799 = vst [vmem:[#allocation45_spill] sm:$0xff] %v6274_v20 }
 0x18d   :  { %1830 = vmatprep.subr.bf16.mxu0 %v5645_v37  ;;  %4355 = vmatprep.subr.bf16.mxu1 %v7792_v25  ;;  %v1389_v37 = vunpack.c.l.bf16 %v6062_v61  ;;  %v6211_v61 = vld [vmem:[%s7639_s6 + $0x20] ss:$12 sps:$4 sm:$0xff]  }
 0x18e   :  { %1860 = vmatprep.mubr.bf16.mxu0 %v7793_v18  ;;  %4369 = vmatprep.mubr.msk.bf16.mxu1 %vm5184_vm8, %v7792_v25 }
 0x190   :  { %1831 = vmatpush1.bf16.msra.mxu0 %v5654_v39  ;;  %4356 = vmatpush3.bf16.msra.mxu1 %v5705_v49 }
 0x191   :  { %v4789_v21 = vpop.eup %4788  ;;  %1832 = vmatprep.subr.bf16.mxu0 %v5661_v40  ;;  %4357 = vmatprep.subr.bf16.mxu1 %v7792_v25 }
 0x192   :  { %v4791_v36 = vpop.eup %4790  ;;  %v1635_v45 = vmul.f32 %v4789_v21, %v1633_v53  ;;  %v6281_v53 = vld [vmem:[%s7639_s6 + $0x78] ss:$12 sps:$4 sm:$0xff]   ;;  %v6293_v21 = vld [vmem:[%s7639_s6 + $0x94] ss:$12 sps:$4 sm:$0xff]  }
 0x193   :  { %v4793_v31 = vpop.eup %4792  ;;  %v1628_v39 = vadd.f32 1.0, %v4791_v36  ;;  %7800 = vst [vmem:[#allocation46_spill] sm:$0xff] %v6281_v53  ;;  %7802 = vst [vmem:[#allocation48_spill] sm:$0xff] %v6293_v21  ;;  %v6300_v36 = vld [vmem:[%s7639_s6 + $0x90] ss:$12 sps:$4 sm:$0xff]  }
 0x194   :  { %v1637_v35 = vadd.f32 %v1635_v45, %v1389_v37  ;;  %v1636_v14 = vmul.f32 %v4793_v31, %v1634_v60  ;;  %1833 = vmatpush1.bf16.msra.mxu0 %v5671_v42  ;;  %4358 = vmatpush3.bf16.msra.mxu1 %v5728_v54  ;;  %7803 = vst [vmem:[#allocation49_spill] sm:$0xff] %v6300_v36  ;;  %v6306_v37 = vld [vmem:[%s7639_s6 + $0x98] ss:$12 sps:$4 sm:$0xff]   ;;  %v6319_v60 = vld [vmem:[%s7639_s6 + $0xa8] ss:$12 sps:$4 sm:$0xff]  }
 0x195   :  { %1834 = vmatprep.subr.bf16.mxu0 %v5678_v43  ;;  %4359 = vmatprep.subr.bf16.mxu1 %v7792_v25  ;;  %v6147_v43 = vpop.permute.xlu1 %1662  ;;  %7804 = vst [vmem:[#allocation50_spill] sm:$0xff] %v6306_v37  ;;  %v6312_v45 = vld [vmem:[%s7639_s6 + $0xac] ss:$12 sps:$4 sm:$0xff]   ;;  %7806 = vst [vmem:[#allocation52_spill] sm:$0xff] %v6319_v60  ;;  %v6325_v31 = vld [vmem:[%s7639_s6 + $0xb0] ss:$12 sps:$4 sm:$0xff]  }
 0x196   :  { %4794 = vtanh.f32 %v1637_v35  ;;  %v1638_v40 = vadd.f32 %v1636_v14, %v1392_v1  ;;  %7794 = vst [vmem:[#allocation40_spill] sm:$0xff] %v6147_v43  ;;  %vm1667_vm4 = vcmp.eq.s32.totalorder %v6147_v43, 1  ;;  %7805 = vst [vmem:[#allocation51_spill] sm:$0xff] %v6312_v45  ;;  %v1684_v1 = vunpack.c.l.bf16 %v5882_v48 }
 0x197   :  { %4796 = vrcp.f32 %v1627_v8  ;;  %7807 = vst [vmem:[#allocation53_spill] sm:$0xff] %v6325_v31  ;;  %v6331_v8 = vld [vmem:[%s7640_s7 + $0x4] ss:$12 sps:$4 sm:$0xff]  }
 0x198   :  { %4798 = vtanh.f32 %v1638_v40  ;;  %1835 = vmatpush1.bf16.msra.mxu0 %v5690_v46  ;;  %4360 = vmatpush3.bf16.msra.mxu1 %v5749_v58  ;;  %7808 = vst [vmem:[#allocation54_spill] sm:$0xff] %v6331_v8 }
 0x199   :  { %1836 = vmatprep.subr.bf16.mxu0 %v5697_v47  ;;  %4361 = vmatprep.subr.bf16.mxu1 %v7792_v25  ;;  %4800 = vrcp.f32 %v1628_v39  ;;  %v1685_v39 = vunpack.c.l.bf16 %v5885_v4 }
 0x19c   :  { %1837 = vmatpush1.bf16.msra.mxu0 %v5714_v50  ;;  %4362 = vmatpush3.bf16.msra.mxu1 %v5770_v5  ;;  %v6159_v5 = vpop.permute.xlu1 %1665 }
 0x19d   :  { %1838 = vmatprep.subr.bf16.mxu0 %v5721_v52  ;;  %4363 = vmatprep.subr.bf16.mxu1 %v7792_v25  ;;  %7795 = vst [vmem:[#allocation41_spill] sm:$0xff] %v6159_v5  ;;  %vm1668_vm5 = vcmp.eq.s32.totalorder %v6159_v5, 1 }
 0x19e   :  { %vm3951_vm6 = vmpackc.low %vm1668_vm5, %vm1667_vm4 }
 0x1a0   :  { %v4795_v42 = vpop.eup %4794  ;;  %1839 = vmatpush1.bf16.msra.mxu0 %v5735_v55  ;;  %4364 = vmatpush3.bf16.msra.mxu1 %v5786_v17  ;;  %v6189_v17 = vld [vmem:[%s7639_s6 + $0x8] ss:$12 sps:$4 sm:$0xff]  }
 0x1a1   :  { %v4797_v46 = vpop.eup %4796  ;;  %v1641_v47 = vsub.f32 0.0, %v4795_v42  ;;  %1840 = vmatprep.subr.bf16.mxu0 %v5742_v56  ;;  %4365 = vmatprep.subr.bf16.mxu1 %v7792_v25 }
 0x1a2   :  { %v4799_v49 = vpop.eup %4798 }
 0x1a3   :  { %v1642_v50 = vsub.f32 0.0, %v4799_v49  ;;  %v1643_v54 = vmul.f32 %v4797_v46, %v1641_v47  ;;  %v4801_v58 = vpop.eup %4800  ;;  %v1687_v47 = vunpack.c.h.bf16 %v5882_v48 }
 0x1a4   :  { %1841 = vmatpush1.bf16.msra.mxu0 %v5756_v62  ;;  %4366 = vmatpush3.bf16.msra.mxu1 %v5797_v22  ;;  %v6195_v22 = vld [vmem:[%s7639_s6 + $0x1c] ss:$12 sps:$4 sm:$0xff]  }
 0x1a5   :  { %1842 = vmatprep.subr.bf16.mxu0 %v5763_v2  ;;  %4367 = vmatprep.subr.bf16.mxu1 %v7792_v25  ;;  %v1644_v52 = vmul.f32 %v4801_v58, %v1642_v50  ;;  %v6157_v55 = vadd.f32 %v4795_v42, %v1643_v54  ;;  %v6172_v2 = vld [vmem:[%s7639_s6 + $0x4] ss:$12 sps:$4 sm:$0xff]   ;;  %v1688_v58 = vunpack.c.h.bf16 %v5885_v4 }
 0x1a7   :  { %v6163_v56 = vadd.f32 %v4799_v49, %v1644_v52 }
 0x1a8   :  { %1843 = vmatpush1.bf16.msra.mxu0 %v5777_v11  ;;  %4368 = vmatpush3.bf16.msra.mxu1 %v5810_v51  ;;  %v6183_v11 = vld [vmem:[%s7639_s6] ss:$12 sps:$4 sm:$0xff]   ;;  %v6205_v51 = vld [vmem:[%s7639_s6 + $0x18] ss:$12 sps:$4 sm:$0xff]  }
 0x1a9   :  { %v3952_v62 = vpack.c.bf16 %v6163_v56, %v6157_v55  ;;  %2003 = vmatprep.subr.bf16.mxu0 %v6172_v2  ;;  %4373 = vmatprep.subr.bf16.mxu1 %v7792_v25 }
 0x1ab   :  { %3953 = vmatmul.mubr.msk.bf16.vlgmr.msra.gmra.mrb[60].mxu0 %vm3951_vm6, %v3952_v62  ;;  %4370 = vmatmul.mubr.msk.bf16.vlgmr.msra.gmra.mrb[60].mxu1 %vm3951_vm6, %v3952_v62 }
 0x1ac   :  { %2004 = vmatpush1.bf16.msra.mxu0 %v6183_v11  ;;  %4374 = vmatpush3.bf16.msra.mxu1 %v6189_v17 }
 0x1ad   :  { %2005 = vmatprep.subr.bf16.mxu0 %v6195_v22  ;;  %4375 = vmatprep.subr.bf16.mxu1 %v7792_v25 }
 0x1ae   :  { %2035 = vmatprep.mubr.bf16.mxu0 %v7793_v18  ;;  %4389 = vmatprep.mubr.msk.bf16.mxu1 %vm5184_vm8, %v7792_v25 }
 0x1b0   :  { %2006 = vmatpush1.bf16.msra.mxu0 %v6205_v51  ;;  %4376 = vmatpush3.bf16.msra.mxu1 %v6211_v61 }
 0x1b1   :  { %2007 = vmatprep.subr.bf16.mxu0 %v6217_v41  ;;  %4377 = vmatprep.subr.bf16.mxu1 %v7792_v25 }
 0x1b4   :  { %2008 = vmatpush1.bf16.msra.mxu0 %v6224_v9  ;;  %4378 = vmatpush3.bf16.msra.mxu1 %v6230_v26 }
 0x1b5   :  { %2009 = vmatprep.subr.bf16.mxu0 %v6236_v6  ;;  %4379 = vmatprep.subr.bf16.mxu1 %v7792_v25 }
 0x1b8   :  { %2010 = vmatpush1.bf16.msra.mxu0 %v6243_v30  ;;  %4380 = vmatpush3.bf16.msra.mxu1 %v6249_v27 }
 0x1b9   :  { %2011 = vmatprep.subr.bf16.mxu0 %v6255_v33  ;;  %4381 = vmatprep.subr.bf16.mxu1 %v7792_v25 }
 0x1bc   :  { %2012 = vmatpush1.bf16.msra.mxu0 %v6262_v12  ;;  %4382 = vmatpush3.bf16.msra.mxu1 %v6268_v34 }
 0x1bd   :  { %2013 = vmatprep.subr.bf16.mxu0 %v6274_v20  ;;  %4383 = vmatprep.subr.bf16.mxu1 %v7792_v25 }
 0x1c0   :  { %2014 = vmatpush1.bf16.msra.mxu0 %v6281_v53  ;;  %4384 = vmatpush3.bf16.msra.mxu1 %v6287_v23 }
 0x1c1   :  { %2015 = vmatprep.subr.bf16.mxu0 %v6293_v21  ;;  %4385 = vmatprep.subr.bf16.mxu1 %v7792_v25 }
 0x1c4   :  { %2016 = vmatpush1.bf16.msra.mxu0 %v6300_v36  ;;  %4386 = vmatpush3.bf16.msra.mxu1 %v6306_v37 }
 0x1c5   :  { %2017 = vmatprep.subr.bf16.mxu0 %v6312_v45  ;;  %4387 = vmatprep.subr.bf16.mxu1 %v7792_v25 }
 0x1c8   :  { %2018 = vmatpush1.bf16.msra.mxu0 %v6319_v60  ;;  %4388 = vmatpush3.bf16.msra.mxu1 %v6325_v31 }
 0x1c9   :  { %2140 = vmatprep.subr.bf16.mxu0 %v6331_v8  ;;  %4393 = vmatprep.subr.bf16.mxu1 %v7792_v25 }
 0x25e   :  { %v1725_v35 = vpop.f32.mrb[56].mxu0  ;;  %v1768_v14 = vpop.f32.mrb[56].mxu1 }
 0x25f   :  { %v1775_v40 = vadd.f32 %v1725_v35, %v1684_v1  ;;  %v1727_v42 = vpop.f32.mrb[57].mxu0  ;;  %v4351_v46 = vpop.f32.mrb[57].mxu1  ;;  %v1803_v4 = vadd.f32 %v6083_v57, %v1768_v14  ;;  %v1822_v14 = vunpack.c.l.bf16 %v6072_v24 }
 0x260   :  { %v1789_v49 = vadd.f32 %v1727_v42, %v1685_v39  ;;  %v1729_v50 = vpop.f32.mrb[58].mxu0  ;;  %v1771_v54 = vpop.f32.mrb[58].mxu1 }
 0x261   :  { %v3947_v52 = vmul.f32 -1.442695, %v1775_v40  ;;  %v1776_v62 = vadd.f32 %v1729_v50, %v1687_v47  ;;  %v1731_v13 = vpop.f32.mrb[59].mxu0  ;;  %v4352_v10 = vpop.f32.mrb[59].mxu1  ;;  %v1821_v50 = vunpack.c.l.bf16 %v6069_v63 }
 0x262   :  { %v1790_v15 = vadd.f32 %v1731_v13, %v1688_v58  ;;  %v3949_v3 = vmul.f32 -1.442695, %v1789_v49  ;;  %v1686_v10 = vunpack.c.l.bf16 %v5888_v19 }
 0x263   :  { %4802 = vpow2.f32 %v3947_v52  ;;  %v3948_v7 = vmul.f32 -1.442695, %v1776_v62 }
 0x264   :  { %v3950_v1 = vmul.f32 -1.442695, %v1790_v15  ;;  %v1689_v15 = vunpack.c.h.bf16 %v5888_v19 }
 0x265   :  { %4804 = vpow2.f32 %v3948_v7  ;;  %v1804_v7 = vadd.f32 %v6083_v57, %v1771_v54  ;;  %v1824_v54 = vunpack.c.h.bf16 %v6069_v63 }
 0x266   :  { %4806 = vpow2.f32 %v3949_v3 }
 0x26d   :  { %v4803_v0 = vpop.eup %4802 }
 0x26e   :  { %v1783_v35 = vadd.f32 1.0, %v4803_v0 }
 0x26f   :  { %v4805_v46 = vpop.eup %4804 }
 0x270   :  { %4808 = vrcp.f32 %v1783_v35  ;;  %v1784_v48 = vadd.f32 1.0, %v4805_v46  ;;  %v4807_v39 = vpop.eup %4806 }
 0x271   :  { %4810 = vpow2.f32 %v3950_v1  ;;  %v1797_v49 = vadd.f32 1.0, %v4807_v39 }
 0x272   :  { %4812 = vrcp.f32 %v1784_v48 }
 0x27a   :  { %v4809_v40 = vpop.eup %4808 }
 0x27b   :  { %v4811_v42 = vpop.eup %4810  ;;  %v1805_v13 = vmul.f32 %v4809_v40, %v1803_v4  ;;  %v1825_v40 = vunpack.c.h.bf16 %v6072_v24 }
 0x27c   :  { %v4813_v47 = vpop.eup %4812  ;;  %v1798_v58 = vadd.f32 1.0, %v4811_v42 }
 0x27d   :  { %v1807_v0 = vadd.f32 %v1805_v13, %v1686_v10  ;;  %v1806_v3 = vmul.f32 %v4813_v47, %v1804_v7 }
 0x27e   :  { %v1862_v52 = vpop.f32.mrb[60].mxu0  ;;  %v6344_v62 = vpop.f32.mrb[60].mxu1 }
 0x27f   :  { %4814 = vtanh.f32 %v1807_v0  ;;  %v1808_v1 = vadd.f32 %v1806_v3, %v1689_v15  ;;  %v1912_v35 = vadd.f32 %v1862_v52, %v1821_v50  ;;  %v1864_v46 = vpop.f32.mrb[61].mxu0  ;;  %v4371_v48 = vpop.f32.mrb[61].mxu1 }
 0x280   :  { %4816 = vrcp.f32 %v1797_v49  ;;  %v1926_v39 = vadd.f32 %v1864_v46, %v1822_v14  ;;  %v1866_v19 = vpop.f32.mrb[62].mxu0  ;;  %v6348_v4 = vpop.f32.mrb[62].mxu1 }
 0x281   :  { %4818 = vtanh.f32 %v1808_v1  ;;  %v3957_v42 = vmul.f32 -1.442695, %v1912_v35  ;;  %v1913_v10 = vadd.f32 %v1866_v19, %v1824_v54  ;;  %v1868_v13 = vpop.f32.mrb[63].mxu0  ;;  %v4372_v7 = vpop.f32.mrb[63].mxu1 }
 0x282   :  { %4820 = vrcp.f32 %v1798_v58  ;;  %v1927_v47 = vadd.f32 %v1868_v13, %v1825_v40  ;;  %v3959_v50 = vmul.f32 -1.442695, %v1926_v39  ;;  %v6353_v19 = vpop.permute.xlu0 %1957  ;;  %v6356_v40 = vpop.permute.xlu1 %1960 }
 0x283   :  { %4822 = vpow2.f32 %v3957_v42  ;;  %v3958_v15 = vmul.f32 -1.442695, %v1913_v10  ;;  %7809 = vst [vmem:[#allocation55_spill] sm:$0xff] %v6353_v19  ;;  %vm1962_vm7 = vcmp.eq.s32.totalorder %v6353_v19, 1  ;;  %7810 = vst [vmem:[#allocation56_spill] sm:$0xff] %v6356_v40  ;;  %vm1963_vm9 = vcmp.eq.s32.totalorder %v6356_v40, 1 }
 0x284   :  { %v3960_v35 = vmul.f32 -1.442695, %v1927_v47  ;;  %v6519_v19 = vld [vmem:[%s7640_s7 + $0x90] ss:$12 sps:$4 sm:$0xff]  }
 0x285   :  { %4824 = vpow2.f32 %v3958_v15  ;;  %v6390_v15 = vld [vmem:[%s7640_s7 + $0x8] ss:$12 sps:$4 sm:$0xff]   ;;  %7815 = vst [vmem:[#allocation61_spill] sm:$0xff] %v6519_v19 }
 0x286   :  { %4826 = vpow2.f32 %v3959_v50  ;;  %v6408_v50 = vld [vmem:[%s7640_s7 + $0x18] ss:$12 sps:$4 sm:$0xff]  }
 0x289   :  { %v4815_v0 = vpop.eup %4814 }
 0x28a   :  { %v4817_v3 = vpop.eup %4816  ;;  %v1811_v63 = vsub.f32 %v6097_v44, %v4815_v0 }
 0x28b   :  { %v4819_v49 = vpop.eup %4818 }
 0x28c   :  { %v4821_v52 = vpop.eup %4820  ;;  %v1812_v14 = vsub.f32 %v6105_v59, %v4819_v49  ;;  %v1813_v24 = vmul.f32 %v4817_v3, %v1811_v63  ;;  %v1940_v63 = vadd.f32 %v6118_v28, %v6344_v62  ;;  %v1941_v62 = vadd.f32 %v6118_v28, %v6348_v4  ;;  %v6437_v4 = vld [vmem:[%s7640_s7 + $0x38] ss:$12 sps:$4 sm:$0xff]  }
 0x28d   :  { %v4823_v1 = vpop.eup %4822 }
 0x28e   :  { %v1920_v46 = vadd.f32 1.0, %v4823_v1  ;;  %v1814_v48 = vmul.f32 %v4821_v52, %v1812_v14  ;;  %v1815_v54 = vadd.f32 %v4815_v0, %v1813_v24  ;;  %v6396_v0 = vld [vmem:[%s7640_s7 + $0x1c] ss:$12 sps:$4 sm:$0xff]   ;;  %v6414_v52 = vld [vmem:[%s7640_s7 + $0x20] ss:$12 sps:$4 sm:$0xff]   ;;  %v1823_v24 = vunpack.c.l.bf16 %v6065_v16 }
 0x28f   :  { %v4825_v58 = vpop.eup %4824 }
 0x290   :  { %4828 = vrcp.f32 %v1920_v46  ;;  %v1921_v42 = vadd.f32 1.0, %v4825_v58  ;;  %v1816_v39 = vadd.f32 %v4819_v49, %v1814_v48  ;;  %v1978_v10 = vsel %vm1962_vm7, %v1815_v54, 0.0  ;;  %v4827_v3 = vpop.eup %4826 }
 0x291   :  { %4830 = vpow2.f32 %v3960_v35  ;;  %v6364_v13 = vsel %vm1962_vm7, %v1815_v54, %v6097_v44  ;;  %3961 = vst [vmem:[%s7645_s10 + $0x10] sm:$0xff] %v1978_v10  ;;  %v6423_v35 = vld [vmem:[%s7640_s7 + $0x34] ss:$12 sps:$4 sm:$0xff]   ;;  %v1934_v48 = vadd.f32 1.0, %v4827_v3  ;;  %v1826_v54 = vunpack.c.h.bf16 %v6065_v16  ;;  %v6443_v16 = vld [vmem:[%s7640_s7 + $0x4c] ss:$12 sps:$4 sm:$0xff]  }
 0x292   :  { %4832 = vrcp.f32 %v1921_v42  ;;  %v6369_v7 = vsel %vm1963_vm9, %v1816_v39, %v6105_v59  ;;  %v1979_v47 = vsel %vm1963_vm9, %v1816_v39, 0.0  ;;  %v6384_v59 = vld [vmem:[%s7640_s7] ss:$12 sps:$4 sm:$0xff]   ;;  %v6431_v39 = vld [vmem:[%s7640_s7 + $0x30] ss:$12 sps:$4 sm:$0xff]  }
 0x293   :  { %3962 = vst [vmem:[%s7645_s10 + $0x18] sm:$0xff] %v1979_v47  ;;  %v2002_v44 = vpack.c.bf16 %v6369_v7, %v6364_v13  ;;  %v6456_v3 = vld [vmem:[%s7640_s7 + $0x50] ss:$12 sps:$4 sm:$0xff]  }
 0x295   :  { %2036 = vmatmul.mubr.bf16.vlgmr.msra.gmra.mrb[64].mxu0 %v2002_v44  ;;  %4390 = vmatmul.mubr.bf16.vlgmr.msra.gmra.mrb[64].mxu1 %v2002_v44  ;;  %v6450_v44 = vld [vmem:[%s7640_s7 + $0x48] ss:$12 sps:$4 sm:$0xff]  }
 0x296   :  { %2141 = vmatpush1.bf16.msra.mxu0 %v6384_v59  ;;  %4394 = vmatpush3.bf16.msra.mxu1 %v6390_v15 }
 0x297   :  { %2142 = vmatprep.subr.bf16.mxu0 %v6396_v0  ;;  %4395 = vmatprep.subr.bf16.mxu1 %v7792_v25 }
 0x298   :  { %2172 = vmatprep.mubr.bf16.mxu0 %v7793_v18  ;;  %4409 = vmatprep.mubr.msk.bf16.mxu1 %vm5184_vm8, %v7792_v25 }
 0x29a   :  { %v4829_v49 = vpop.eup %4828  ;;  %2143 = vmatpush1.bf16.msra.mxu0 %v6408_v50  ;;  %4396 = vmatpush3.bf16.msra.mxu1 %v6414_v52 }
 0x29b   :  { %v4831_v14 = vpop.eup %4830  ;;  %v1942_v1 = vmul.f32 %v4829_v49, %v1940_v63  ;;  %2144 = vmatprep.subr.bf16.mxu0 %v6423_v35  ;;  %4397 = vmatprep.subr.bf16.mxu1 %v7792_v25  ;;  %v6462_v63 = vld [vmem:[%s7640_s7 + $0x64] ss:$12 sps:$4 sm:$0xff]   ;;  %v6469_v49 = vld [vmem:[%s7640_s7 + $0x60] ss:$12 sps:$4 sm:$0xff]  }
 0x29c   :  { %v4833_v46 = vpop.eup %4832  ;;  %v1935_v47 = vadd.f32 1.0, %v4831_v14  ;;  %v6475_v14 = vld [vmem:[%s7640_s7 + $0x68] ss:$12 sps:$4 sm:$0xff]  }
 0x29d   :  { %v1944_v58 = vadd.f32 %v1942_v1, %v1823_v24  ;;  %v1943_v42 = vmul.f32 %v4833_v46, %v1941_v62  ;;  %v6481_v24 = vld [vmem:[%s7640_s7 + $0x7c] ss:$12 sps:$4 sm:$0xff]   ;;  %v6488_v62 = vsel %vm1667_vm4, %v6157_v55, 0.0  ;;  %v6506_v55 = vld [vmem:[%s7640_s7 + $0x94] ss:$12 sps:$4 sm:$0xff]  }
 0x29e   :  { %2145 = vmatpush1.bf16.msra.mxu0 %v6431_v39  ;;  %4398 = vmatpush3.bf16.msra.mxu1 %v6437_v4  ;;  %7811 = vst [vmem:[#allocation57_spill] sm:$0xff] %v6488_v62  ;;  %7813 = vst [vmem:[#allocation59_spill] sm:$0xff] %v6506_v55 }
 0x29f   :  { %4834 = vtanh.f32 %v1944_v58  ;;  %v1945_v10 = vadd.f32 %v1943_v42, %v1826_v54  ;;  %2146 = vmatprep.subr.bf16.mxu0 %v6443_v16  ;;  %4399 = vmatprep.subr.bf16.mxu1 %v7792_v25  ;;  %v6499_v54 = vld [vmem:[%s7640_s7 + $0x80] ss:$12 sps:$4 sm:$0xff]  }
 0x2a0   :  { %4836 = vrcp.f32 %v1934_v48  ;;  %v6493_v48 = vld [vmem:[%s7640_s7 + $0x78] ss:$12 sps:$4 sm:$0xff]   ;;  %7812 = vst [vmem:[#allocation58_spill] sm:$0xff] %v6499_v54 }
 0x2a1   :  { %4838 = vtanh.f32 %v1945_v10  ;;  %v6513_v10 = vsel %vm1668_vm5, %v6163_v56, 0.0 }
 0x2a2   :  { %2147 = vmatpush1.bf16.msra.mxu0 %v6450_v44  ;;  %4400 = vmatpush3.bf16.msra.mxu1 %v6456_v3  ;;  %4840 = vrcp.f32 %v1935_v47  ;;  %7814 = vst [vmem:[#allocation60_spill] sm:$0xff] %v6513_v10 }
 0x2a3   :  { %2148 = vmatprep.subr.bf16.mxu0 %v6462_v63  ;;  %4401 = vmatprep.subr.bf16.mxu1 %v7792_v25 }
 0x2a6   :  { %2149 = vmatpush1.bf16.msra.mxu0 %v6469_v49  ;;  %4402 = vmatpush3.bf16.msra.mxu1 %v6475_v14 }
 0x2a7   :  { %2150 = vmatprep.subr.bf16.mxu0 %v6481_v24  ;;  %4403 = vmatprep.subr.bf16.mxu1 %v7792_v25 }
 0x2a9   :  { %v4835_v1 = vpop.eup %4834 }
 0x2aa   :  { %v4837_v46 = vpop.eup %4836  ;;  %2151 = vmatpush1.bf16.msra.mxu0 %v6493_v48  ;;  %4404 = vmatpush3.bf16.msra.mxu1 %v6499_v54  ;;  %v1948_v58 = vsub.f32 %v6488_v62, %v4835_v1 }
 0x2ab   :  { %v4839_v42 = vpop.eup %4838  ;;  %2152 = vmatprep.subr.bf16.mxu0 %v6506_v55  ;;  %4405 = vmatprep.subr.bf16.mxu1 %v7792_v25  ;;  %v6525_v55 = vld [vmem:[%s7640_s7 + $0x98] ss:$12 sps:$4 sm:$0xff]  }
 0x2ac   :  { %v1949_v47 = vsub.f32 %v6513_v10, %v4839_v42  ;;  %v1950_v43 = vmul.f32 %v4837_v46, %v1948_v58  ;;  %v4841_v40 = vpop.eup %4840  ;;  %v6533_v46 = vld [vmem:[%s7640_s7 + $0xac] ss:$12 sps:$4 sm:$0xff]   ;;  %v6537_v58 = vpop.permute.xlu0 %1969 }
 0x2ad   :  { %7817 = vst [vmem:[#allocation63_spill] sm:$0xff] %v6537_v58  ;;  %vm1974_vm10 = vcmp.eq.s32.totalorder %v6537_v58, 1 }
 0x2ae   :  { %2153 = vmatpush1.bf16.msra.mxu0 %v6519_v19  ;;  %4406 = vmatpush3.bf16.msra.mxu1 %v6525_v55  ;;  %v1951_v56 = vmul.f32 %v4841_v40, %v1949_v47  ;;  %v6528_v5 = vadd.f32 %v4835_v1, %v1950_v43  ;;  %v6539_v19 = vpop.permute.xlu1 %1972  ;;  %v6548_v43 = vld [vmem:[%s7640_s7 + $0xa8] ss:$12 sps:$4 sm:$0xff]   ;;  %v6554_v40 = vld [vmem:[%s7640_s7 + $0xb0] ss:$12 sps:$4 sm:$0xff]  }
 0x2af   :  { %2154 = vmatprep.subr.bf16.mxu0 %v6533_v46  ;;  %4407 = vmatprep.subr.bf16.mxu1 %v7792_v25  ;;  %7818 = vst [vmem:[#allocation64_spill] sm:$0xff] %v6539_v19  ;;  %vm1975_vm11 = vcmp.eq.s32.totalorder %v6539_v19, 1 }
 0x2b0   :  { %7816 = vst [vmem:[#allocation62_spill] sm:$0xff] %v6528_v5  ;;  %v6541_v54 = vadd.f32 %v4839_v42, %v1951_v56  ;;  %v6561_v1 = vsel %vm1974_vm10, %v6528_v5, %v6488_v62  ;;  %v1996_v56 = vunpack.c.l.bf16 %v5898_v29  ;;  %v1997_v62 = vunpack.c.l.bf16 %v5901_v32 }
 0x2b1   :  { %v1999_v5 = vunpack.c.h.bf16 %v5898_v29 }
 0x2b2   :  { %7819 = vst [vmem:[#allocation65_spill] sm:$0xff] %v6541_v54  ;;  %2155 = vmatpush1.bf16.msra.mxu0 %v6548_v43  ;;  %4408 = vmatpush3.bf16.msra.mxu1 %v6554_v40  ;;  %v6567_v42 = vsel %vm1975_vm11, %v6541_v54, %v6513_v10 }
 0x2b3   :  { %v2139_v47 = vpack.c.bf16 %v6567_v42, %v6561_v1  ;;  %2315 = vmatprep.subr.bf16.mxu0 %v6172_v2  ;;  %4413 = vmatprep.subr.bf16.mxu1 %v7792_v25 }
 0x2b5   :  { %2173 = vmatmul.mubr.bf16.vlgmr.msra.gmra.mrb[68].mxu0 %v2139_v47  ;;  %4410 = vmatmul.mubr.bf16.vlgmr.msra.gmra.mrb[68].mxu1 %v2139_v47 }
 0x2b6   :  { %2316 = vmatpush1.bf16.msra.mxu0 %v6183_v11  ;;  %4414 = vmatpush3.bf16.msra.mxu1 %v6189_v17 }
 0x2b7   :  { %2317 = vmatprep.subr.bf16.mxu0 %v6195_v22  ;;  %4415 = vmatprep.subr.bf16.mxu1 %v7792_v25 }
 0x2b8   :  { %2347 = vmatprep.mubr.bf16.mxu0 %v7793_v18  ;;  %4429 = vmatprep.mubr.msk.bf16.mxu1 %vm5184_vm8, %v7792_v25 }
 0x2ba   :  { %2318 = vmatpush1.bf16.msra.mxu0 %v6205_v51  ;;  %4416 = vmatpush3.bf16.msra.mxu1 %v6211_v61 }
 0x2bb   :  { %2319 = vmatprep.subr.bf16.mxu0 %v6217_v41  ;;  %4417 = vmatprep.subr.bf16.mxu1 %v7792_v25 }
 0x2be   :  { %2320 = vmatpush1.bf16.msra.mxu0 %v6224_v9  ;;  %4418 = vmatpush3.bf16.msra.mxu1 %v6230_v26 }
 0x2bf   :  { %2321 = vmatprep.subr.bf16.mxu0 %v6236_v6  ;;  %4419 = vmatprep.subr.bf16.mxu1 %v7792_v25 }
 0x2c2   :  { %2322 = vmatpush1.bf16.msra.mxu0 %v6243_v30  ;;  %4420 = vmatpush3.bf16.msra.mxu1 %v6249_v27 }
 0x2c3   :  { %2323 = vmatprep.subr.bf16.mxu0 %v6255_v33  ;;  %4421 = vmatprep.subr.bf16.mxu1 %v7792_v25 }
 0x2c6   :  { %2324 = vmatpush1.bf16.msra.mxu0 %v6262_v12  ;;  %4422 = vmatpush3.bf16.msra.mxu1 %v6268_v34 }
 0x2c7   :  { %2325 = vmatprep.subr.bf16.mxu0 %v6274_v20  ;;  %4423 = vmatprep.subr.bf16.mxu1 %v7792_v25 }
 0x2ca   :  { %2326 = vmatpush1.bf16.msra.mxu0 %v6281_v53  ;;  %4424 = vmatpush3.bf16.msra.mxu1 %v6287_v23 }
 0x2cb   :  { %2327 = vmatprep.subr.bf16.mxu0 %v6293_v21  ;;  %4425 = vmatprep.subr.bf16.mxu1 %v7792_v25 }
 0x2ce   :  { %2328 = vmatpush1.bf16.msra.mxu0 %v6300_v36  ;;  %4426 = vmatpush3.bf16.msra.mxu1 %v6306_v37 }
 0x2cf   :  { %2329 = vmatprep.subr.bf16.mxu0 %v6312_v45  ;;  %4427 = vmatprep.subr.bf16.mxu1 %v7792_v25 }
 0x2d2   :  { %2330 = vmatpush1.bf16.msra.mxu0 %v6319_v60  ;;  %4428 = vmatpush3.bf16.msra.mxu1 %v6325_v31  ;;  %v2000_v31 = vunpack.c.h.bf16 %v5901_v32 }
 0x2d3   :  { %2452 = vmatprep.subr.bf16.mxu0 %v6331_v8  ;;  %4433 = vmatprep.subr.bf16.mxu1 %v7792_v25 }
 0x368   :  { %v2037_v47 = vpop.f32.mrb[64].mxu0  ;;  %v2080_v10 = vpop.f32.mrb[64].mxu1 }
 0x369   :  { %v2087_v19 = vadd.f32 %v2037_v47, %v1996_v56  ;;  %v2039_v54 = vpop.f32.mrb[65].mxu0  ;;  %v4391_v58 = vpop.f32.mrb[65].mxu1  ;;  %v2115_v32 = vadd.f32 %v6083_v57, %v2080_v10  ;;  %v7821_v10 = vld [vmem:[#allocation37_spill] sm:$0xff] }
 0x36a   :  { %v2101_v45 = vadd.f32 %v2039_v54, %v1997_v62  ;;  %v2041_v37 = vpop.f32.mrb[66].mxu0  ;;  %v2083_v60 = vpop.f32.mrb[66].mxu1 }
 0x36b   :  { %v3963_v36 = vmul.f32 -1.442695, %v2087_v19  ;;  %v2088_v8 = vadd.f32 %v2041_v37, %v1999_v5  ;;  %v2043_v21 = vpop.f32.mrb[67].mxu0  ;;  %v4392_v23 = vpop.f32.mrb[67].mxu1 }
 0x36c   :  { %v2102_v53 = vadd.f32 %v2043_v21, %v2000_v31  ;;  %v3965_v34 = vmul.f32 -1.442695, %v2101_v45  ;;  %v1998_v23 = vunpack.c.l.bf16 %v5906_v38  ;;  %v7820_v31 = vld [vmem:[#allocation36_spill] sm:$0xff] }
 0x36d   :  { %4842 = vpow2.f32 %v3963_v36  ;;  %v3964_v20 = vmul.f32 -1.442695, %v2088_v8  ;;  %v2133_v8 = vunpack.c.l.bf16 %v7820_v31 }
 0x36e   :  { %v3966_v56 = vmul.f32 -1.442695, %v2102_v53 }
 0x36f   :  { %4844 = vpow2.f32 %v3964_v20  ;;  %v2116_v20 = vadd.f32 %v6083_v57, %v2083_v60  ;;  %v2136_v57 = vunpack.c.h.bf16 %v7820_v31 }
 0x370   :  { %4846 = vpow2.f32 %v3965_v34 }
 0x377   :  { %v4843_v12 = vpop.eup %4842 }
 0x378   :  { %v2095_v47 = vadd.f32 1.0, %v4843_v12  ;;  %v2001_v12 = vunpack.c.h.bf16 %v5906_v38 }
 0x379   :  { %v4845_v58 = vpop.eup %4844 }
 0x37a   :  { %4848 = vrcp.f32 %v2095_v47  ;;  %v2096_v29 = vadd.f32 1.0, %v4845_v58  ;;  %v4847_v62 = vpop.eup %4846  ;;  %v2134_v47 = vunpack.c.l.bf16 %v7821_v10 }
 0x37b   :  { %4850 = vpow2.f32 %v3966_v56  ;;  %v2109_v45 = vadd.f32 1.0, %v4847_v62 }
 0x37c   :  { %4852 = vrcp.f32 %v2096_v29 }
 0x384   :  { %v4849_v5 = vpop.eup %4848 }
 0x385   :  { %v4851_v37 = vpop.eup %4850  ;;  %v2117_v21 = vmul.f32 %v4849_v5, %v2115_v32 }
 0x386   :  { %v4853_v36 = vpop.eup %4852  ;;  %v2110_v19 = vadd.f32 1.0, %v4851_v37 }
 0x387   :  { %v2119_v53 = vadd.f32 %v2117_v21, %v1998_v23  ;;  %v2118_v34 = vmul.f32 %v4853_v36, %v2116_v20  ;;  %v2137_v23 = vunpack.c.h.bf16 %v7821_v10 }
 0x388   :  { %v2174_v54 = vpop.f32.mrb[68].mxu0  ;;  %v6617_v56 = vpop.f32.mrb[68].mxu1 }
 0x389   :  { %4854 = vtanh.f32 %v2119_v53  ;;  %v2120_v58 = vadd.f32 %v2118_v34, %v2001_v12  ;;  %v2224_v29 = vadd.f32 %v2174_v54, %v2133_v8  ;;  %v2176_v32 = vpop.f32.mrb[69].mxu0  ;;  %v4411_v5 = vpop.f32.mrb[69].mxu1 }
 0x38a   :  { %4856 = vrcp.f32 %v2109_v45  ;;  %v2238_v60 = vadd.f32 %v2176_v32, %v2134_v47  ;;  %v2178_v38 = vpop.f32.mrb[70].mxu0  ;;  %v2220_v62 = vpop.f32.mrb[70].mxu1 }
 0x38b   :  { %4858 = vtanh.f32 %v2120_v58  ;;  %v3967_v37 = vmul.f32 -1.442695, %v2224_v29  ;;  %v2225_v21 = vadd.f32 %v2178_v38, %v2136_v57  ;;  %v2180_v20 = vpop.f32.mrb[71].mxu0  ;;  %v4412_v36 = vpop.f32.mrb[71].mxu1 }
 0x38c   :  { %4860 = vrcp.f32 %v2110_v19  ;;  %v2239_v33 = vadd.f32 %v2180_v20, %v2137_v23  ;;  %v3969_v8 = vmul.f32 -1.442695, %v2238_v60  ;;  %v6624_v38 = vpop.permute.xlu0 %2269  ;;  %v6627_v23 = vpop.permute.xlu1 %2272 }
 0x38d   :  { %4862 = vpow2.f32 %v3967_v37  ;;  %v3968_v12 = vmul.f32 -1.442695, %v2225_v21  ;;  %7822 = vst [vmem:[#allocation36_spill] sm:$0xff] %v6624_v38  ;;  %vm2274_vm12 = vcmp.eq.s32.totalorder %v6624_v38, 1  ;;  %7823 = vst [vmem:[#allocation37_spill] sm:$0xff] %v6627_v23  ;;  %vm2275_vm13 = vcmp.eq.s32.totalorder %v6627_v23, 1 }
 0x38e   :  { %v3970_v29 = vmul.f32 -1.442695, %v2239_v33 }
 0x38f   :  { %4864 = vpow2.f32 %v3968_v12  ;;  %v2252_v12 = vadd.f32 %v6118_v28, %v6617_v56 }
 0x390   :  { %4866 = vpow2.f32 %v3969_v8 }
 0x393   :  { %v4855_v53 = vpop.eup %4854 }
 0x394   :  { %v4857_v34 = vpop.eup %4856  ;;  %v2123_v31 = vsub.f32 %v6364_v13, %v4855_v53 }
 0x395   :  { %v4859_v45 = vpop.eup %4858 }
 0x396   :  { %v4861_v54 = vpop.eup %4860  ;;  %v2125_v47 = vmul.f32 %v4857_v34, %v2123_v31  ;;  %v2124_v10 = vsub.f32 %v6369_v7, %v4859_v45  ;;  %v7824_v31 = vld [vmem:[#allocation34_spill] sm:$0xff] }
 0x397   :  { %v4863_v58 = vpop.eup %4862 }
 0x398   :  { %v2126_v32 = vmul.f32 %v4861_v54, %v2124_v10  ;;  %v2232_v5 = vadd.f32 1.0, %v4863_v58  ;;  %v2127_v57 = vadd.f32 %v4855_v53, %v2125_v47  ;;  %v2253_v54 = vadd.f32 %v6118_v28, %v2220_v62 }
 0x399   :  { %v4865_v19 = vpop.eup %4864  ;;  %v2138_v58 = vunpack.c.h.bf16 %v7824_v31 }
 0x39a   :  { %4868 = vrcp.f32 %v2232_v5  ;;  %v2233_v37 = vadd.f32 1.0, %v4865_v19  ;;  %v2128_v60 = vadd.f32 %v4859_v45, %v2126_v32  ;;  %v2290_v33 = vsel %vm2274_vm12, %v2127_v57, 0.0  ;;  %v7825_v19 = vld [vmem:[#allocation58_spill] sm:$0xff] }
 0x39b   :  { %4870 = vpow2.f32 %v3970_v29  ;;  %v6635_v21 = vsel %vm2274_vm12, %v2127_v57, %v6364_v13  ;;  %3971 = vst [vmem:[%s7645_s10 + $0x20] sm:$0xff] %v2290_v33  ;;  %v2135_v45 = vunpack.c.l.bf16 %v7824_v31  ;;  %v6694_v31 = vpop.permute.xlu1 %2284 }
 0x39c   :  { %4872 = vrcp.f32 %v2233_v37  ;;  %v6640_v20 = vsel %vm2275_vm13, %v2128_v60, %v6369_v7  ;;  %v2291_v36 = vsel %vm2275_vm13, %v2128_v60, 0.0  ;;  %v4867_v7 = vpop.eup %4866  ;;  %v7826_v60 = vld [vmem:[#allocation59_spill] sm:$0xff]  ;;  %vm2287_vm15 = vcmp.eq.s32.totalorder %v6694_v31, 1 }
 0x39d   :  { %3972 = vst [vmem:[%s7645_s10 + $0x28] sm:$0xff] %v2291_v36  ;;  %v2314_v13 = vpack.c.bf16 %v6640_v20, %v6635_v21  ;;  %v2246_v10 = vadd.f32 1.0, %v4867_v7  ;;  %7830 = vst [vmem:[#allocation59_spill] sm:$0xff] %v6694_v31 }
 0x39f   :  { %2348 = vmatmul.mubr.bf16.vlgmr.msra.gmra.mrb[72].mxu0 %v2314_v13  ;;  %4430 = vmatmul.mubr.bf16.vlgmr.msra.gmra.mrb[72].mxu1 %v2314_v13 }
 0x3a0   :  { %2453 = vmatpush1.bf16.msra.mxu0 %v6384_v59  ;;  %4434 = vmatpush3.bf16.msra.mxu1 %v6390_v15 }
 0x3a1   :  { %2454 = vmatprep.subr.bf16.mxu0 %v6396_v0  ;;  %4435 = vmatprep.subr.bf16.mxu1 %v7792_v25 }
 0x3a2   :  { %2484 = vmatprep.mubr.bf16.mxu0 %v7793_v18  ;;  %4449 = vmatprep.mubr.msk.bf16.mxu1 %vm5184_vm8, %v7792_v25 }
 0x3a4   :  { %v4869_v53 = vpop.eup %4868  ;;  %2455 = vmatpush1.bf16.msra.mxu0 %v6408_v50  ;;  %4436 = vmatpush3.bf16.msra.mxu1 %v6414_v52 }
 0x3a5   :  { %v4871_v34 = vpop.eup %4870  ;;  %v2254_v8 = vmul.f32 %v4869_v53, %v2252_v12  ;;  %2456 = vmatprep.subr.bf16.mxu0 %v6423_v35  ;;  %4437 = vmatprep.subr.bf16.mxu1 %v7792_v25  ;;  %v7827_v12 = vld [vmem:[#allocation61_spill] sm:$0xff] }
 0x3a6   :  { %v4873_v47 = vpop.eup %4872  ;;  %v2247_v5 = vadd.f32 1.0, %v4871_v34  ;;  %v6692_v34 = vpop.permute.xlu0 %2281 }
 0x3a7   :  { %v2256_v56 = vadd.f32 %v2254_v8, %v2135_v45  ;;  %v2255_v29 = vmul.f32 %v4873_v47, %v2253_v54  ;;  %7829 = vst [vmem:[#allocation58_spill] sm:$0xff] %v6692_v34  ;;  %vm2286_vm14 = vcmp.eq.s32.totalorder %v6692_v34, 1 }
 0x3a8   :  { %2457 = vmatpush1.bf16.msra.mxu0 %v6431_v39  ;;  %4438 = vmatpush3.bf16.msra.mxu1 %v6437_v4 }
 0x3a9   :  { %4874 = vtanh.f32 %v2256_v56  ;;  %v2257_v32 = vadd.f32 %v2255_v29, %v2138_v58  ;;  %2458 = vmatprep.subr.bf16.mxu0 %v6443_v16  ;;  %4439 = vmatprep.subr.bf16.mxu1 %v7792_v25  ;;  %v7846_v29 = vld [vmem:[#allocation7_spill] sm:$0xff] }
 0x3aa   :  { %4876 = vrcp.f32 %v2246_v10 }
 0x3ab   :  { %4878 = vtanh.f32 %v2257_v32  ;;  %v2309_v32 = vunpack.c.l.bf16 %v7846_v29 }
 0x3ac   :  { %2459 = vmatpush1.bf16.msra.mxu0 %v6450_v44  ;;  %4440 = vmatpush3.bf16.msra.mxu1 %v6456_v3  ;;  %4880 = vrcp.f32 %v2247_v5 }
 0x3ad   :  { %2460 = vmatprep.subr.bf16.mxu0 %v6462_v63  ;;  %4441 = vmatprep.subr.bf16.mxu1 %v7792_v25 }
 0x3b0   :  { %2461 = vmatpush1.bf16.msra.mxu0 %v6469_v49  ;;  %4442 = vmatpush3.bf16.msra.mxu1 %v6475_v14 }
 0x3b1   :  { %2462 = vmatprep.subr.bf16.mxu0 %v6481_v24  ;;  %4443 = vmatprep.subr.bf16.mxu1 %v7792_v25 }
 0x3b3   :  { %v4875_v28 = vpop.eup %4874 }
 0x3b4   :  { %v4877_v62 = vpop.eup %4876  ;;  %v2260_v57 = vsub.f32 %v6561_v1, %v4875_v28  ;;  %2463 = vmatpush1.bf16.msra.mxu0 %v6493_v48  ;;  %4444 = vmatpush3.bf16.msra.mxu1 %v7825_v19 }
 0x3b5   :  { %v4879_v37 = vpop.eup %4878  ;;  %2464 = vmatprep.subr.bf16.mxu0 %v7826_v60  ;;  %4445 = vmatprep.subr.bf16.mxu1 %v7792_v25 }
 0x3b6   :  { %v2262_v33 = vmul.f32 %v4877_v62, %v2260_v57  ;;  %v2261_v36 = vsub.f32 %v6567_v42, %v4879_v37  ;;  %v4881_v13 = vpop.eup %4880 }
 0x3b8   :  { %v2263_v7 = vmul.f32 %v4881_v13, %v2261_v36  ;;  %2465 = vmatpush1.bf16.msra.mxu0 %v7827_v12  ;;  %4446 = vmatpush3.bf16.msra.mxu1 %v6525_v55  ;;  %v6688_v53 = vadd.f32 %v4875_v28, %v2262_v33  ;;  %v2312_v13 = vunpack.c.h.bf16 %v7846_v29 }
 0x3b9   :  { %2466 = vmatprep.subr.bf16.mxu0 %v6533_v46  ;;  %4447 = vmatprep.subr.bf16.mxu1 %v7792_v25 }
 0x3ba   :  { %7828 = vst [vmem:[#allocation34_spill] sm:$0xff] %v6688_v53  ;;  %v6696_v45 = vadd.f32 %v4879_v37, %v2263_v7  ;;  %v6706_v8 = vsel %vm2286_vm14, %v6688_v53, %v6561_v1  ;;  %v7844_v1 = vld [vmem:[#allocation54_spill] sm:$0xff] }
 0x3bc   :  { %7831 = vst [vmem:[#allocation61_spill] sm:$0xff] %v6696_v45  ;;  %2467 = vmatpush1.bf16.msra.mxu0 %v6548_v43  ;;  %4448 = vmatpush3.bf16.msra.mxu1 %v6554_v40  ;;  %v6712_v54 = vsel %vm2287_vm15, %v6696_v45, %v6567_v42  ;;  %v7845_v42 = vld [vmem:[#allocation6_spill] sm:$0xff] }
 0x3bd   :  { %v2451_v47 = vpack.c.bf16 %v6712_v54, %v6706_v8  ;;  %2622 = vmatprep.subr.bf16.mxu0 %v6172_v2  ;;  %4453 = vmatprep.subr.bf16.mxu1 %v7792_v25  ;;  %v7832_v2 = vld [vmem:[#allocation42_spill] sm:$0xff]  ;;  %v2308_v10 = vunpack.c.l.bf16 %v7845_v42  ;;  %v2311_v57 = vunpack.c.h.bf16 %v7845_v42 }
 0x3bf   :  { %2485 = vmatmul.mubr.bf16.vlgmr.msra.gmra.mrb[76].mxu0 %v2451_v47  ;;  %4450 = vmatmul.mubr.bf16.vlgmr.msra.gmra.mrb[76].mxu1 %v2451_v47 }
 0x3c0   :  { %2623 = vmatpush1.bf16.msra.mxu0 %v6183_v11  ;;  %4454 = vmatpush3.bf16.msra.mxu1 %v6189_v17  ;;  %v7833_v11 = vld [vmem:[#allocation43_spill] sm:$0xff]  ;;  %v7834_v17 = vld [vmem:[#allocation44_spill] sm:$0xff] }
 0x3c1   :  { %2624 = vmatprep.subr.bf16.mxu0 %v6195_v22  ;;  %4455 = vmatprep.subr.bf16.mxu1 %v7792_v25  ;;  %v7835_v22 = vld [vmem:[#allocation45_spill] sm:$0xff] }
 0x3c2   :  { %2654 = vmatprep.mubr.bf16.mxu0 %v7793_v18  ;;  %4469 = vmatprep.mubr.msk.bf16.mxu1 %vm5184_vm8, %v7792_v25 }
 0x3c4   :  { %2625 = vmatpush1.bf16.msra.mxu0 %v6205_v51  ;;  %4456 = vmatpush3.bf16.msra.mxu1 %v6211_v61  ;;  %v7836_v51 = vld [vmem:[#allocation46_spill] sm:$0xff]  ;;  %v7837_v61 = vld [vmem:[#allocation47_spill] sm:$0xff] }
 0x3c5   :  { %2626 = vmatprep.subr.bf16.mxu0 %v6217_v41  ;;  %4457 = vmatprep.subr.bf16.mxu1 %v7792_v25  ;;  %v7838_v41 = vld [vmem:[#allocation48_spill] sm:$0xff] }
 0x3c8   :  { %2627 = vmatpush1.bf16.msra.mxu0 %v6224_v9  ;;  %4458 = vmatpush3.bf16.msra.mxu1 %v6230_v26  ;;  %v7839_v9 = vld [vmem:[#allocation49_spill] sm:$0xff]  ;;  %v7840_v26 = vld [vmem:[#allocation50_spill] sm:$0xff] }
 0x3c9   :  { %2628 = vmatprep.subr.bf16.mxu0 %v6236_v6  ;;  %4459 = vmatprep.subr.bf16.mxu1 %v7792_v25  ;;  %v7841_v6 = vld [vmem:[#allocation51_spill] sm:$0xff] }
 0x3cc   :  { %2629 = vmatpush1.bf16.msra.mxu0 %v6243_v30  ;;  %4460 = vmatpush3.bf16.msra.mxu1 %v6249_v27  ;;  %v7842_v30 = vld [vmem:[#allocation52_spill] sm:$0xff]  ;;  %v7843_v27 = vld [vmem:[#allocation53_spill] sm:$0xff] }
 0x3cd   :  { %2630 = vmatprep.subr.bf16.mxu0 %v7832_v2  ;;  %4461 = vmatprep.subr.bf16.mxu1 %v7792_v25 }
 0x3d0   :  { %2631 = vmatpush1.bf16.msra.mxu0 %v7833_v11  ;;  %4462 = vmatpush3.bf16.msra.mxu1 %v7834_v17 }
 0x3d1   :  { %2632 = vmatprep.subr.bf16.mxu0 %v7835_v22  ;;  %4463 = vmatprep.subr.bf16.mxu1 %v7792_v25 }
 0x3d4   :  { %2633 = vmatpush1.bf16.msra.mxu0 %v7836_v51  ;;  %4464 = vmatpush3.bf16.msra.mxu1 %v7837_v61 }
 0x3d5   :  { %2634 = vmatprep.subr.bf16.mxu0 %v7838_v41  ;;  %4465 = vmatprep.subr.bf16.mxu1 %v7792_v25 }
 0x3d8   :  { %2635 = vmatpush1.bf16.msra.mxu0 %v7839_v9  ;;  %4466 = vmatpush3.bf16.msra.mxu1 %v7840_v26 }
 0x3d9   :  { %2636 = vmatprep.subr.bf16.mxu0 %v7841_v6  ;;  %4467 = vmatprep.subr.bf16.mxu1 %v7792_v25 }
 0x3dc   :  { %2637 = vmatpush1.bf16.msra.mxu0 %v7842_v30  ;;  %4468 = vmatpush3.bf16.msra.mxu1 %v7843_v27  ;;  %v6760_v27 = vld [vmem:[%s7644_s8] ss:$0 sm:$0xff] }
 0x3dd   :  { %2759 = vmatprep.subr.bf16.mxu0 %v7844_v1  ;;  %4473 = vmatprep.subr.bf16.mxu1 %v7792_v25  ;;  %7847 = vst [vmem:[#allocation42_spill] sm:$0xff] %v6760_v27 }
 0x472   :  { %v2349_v58 = vpop.f32.mrb[72].mxu0  ;;  %v2392_v56 = vpop.f32.mrb[72].mxu1 }
 0x473   :  { %v2399_v5 = vadd.f32 %v2349_v58, %v2308_v10  ;;  %v2351_v28 = vpop.f32.mrb[73].mxu0  ;;  %v4431_v62 = vpop.f32.mrb[73].mxu1  ;;  %v2427_v1 = vadd.f32 %v6760_v27, %v2392_v56  ;;  %v7848_v58 = vld [vmem:[#allocation5_spill] sm:$0xff] }
 0x474   :  { %v2413_v37 = vadd.f32 %v2351_v28, %v2309_v32  ;;  %v2353_v33 = vpop.f32.mrb[74].mxu0  ;;  %v2395_v36 = vpop.f32.mrb[74].mxu1  ;;  %v2310_v29 = vunpack.c.l.bf16 %v7848_v58 }
 0x475   :  { %v3973_v7 = vmul.f32 -1.442695, %v2399_v5  ;;  %v2400_v47 = vadd.f32 %v2353_v33, %v2311_v57  ;;  %v2355_v2 = vpop.f32.mrb[75].mxu0  ;;  %v4432_v11 = vpop.f32.mrb[75].mxu1  ;;  %v2428_v5 = vadd.f32 %v6760_v27, %v2395_v36  ;;  %v2313_v57 = vunpack.c.h.bf16 %v7848_v58 }
 0x476   :  { %v2414_v17 = vadd.f32 %v2355_v2, %v2312_v13  ;;  %v3975_v51 = vmul.f32 -1.442695, %v2413_v37  ;;  %v7849_v13 = vld [vmem:[#allocation32_spill] sm:$0xff] }
 0x477   :  { %4882 = vpow2.f32 %v3973_v7  ;;  %v3974_v22 = vmul.f32 -1.442695, %v2400_v47  ;;  %v2445_v7 = vunpack.c.l.bf16 %v7849_v13  ;;  %v2448_v36 = vunpack.c.h.bf16 %v7849_v13 }
 0x478   :  { %v3976_v41 = vmul.f32 -1.442695, %v2414_v17  ;;  %v7850_v17 = vld [vmem:[#allocation33_spill] sm:$0xff] }
 0x479   :  { %4884 = vpow2.f32 %v3974_v22  ;;  %v2446_v56 = vunpack.c.l.bf16 %v7850_v17 }
 0x47a   :  { %4886 = vpow2.f32 %v3975_v51 }
 0x481   :  { %v4883_v61 = vpop.eup %4882 }
 0x482   :  { %v2407_v9 = vadd.f32 1.0, %v4883_v61 }
 0x483   :  { %v4885_v26 = vpop.eup %4884 }
 0x484   :  { %4888 = vrcp.f32 %v2407_v9  ;;  %v2408_v6 = vadd.f32 1.0, %v4885_v26  ;;  %v4887_v30 = vpop.eup %4886 }
 0x485   :  { %4890 = vpow2.f32 %v3976_v41  ;;  %v2421_v62 = vadd.f32 1.0, %v4887_v30  ;;  %v2449_v30 = vunpack.c.h.bf16 %v7850_v17 }
 0x486   :  { %4892 = vrcp.f32 %v2408_v6 }
 0x48e   :  { %v4889_v42 = vpop.eup %4888 }
 0x48f   :  { %v4891_v10 = vpop.eup %4890  ;;  %v2429_v32 = vmul.f32 %v4889_v42, %v2427_v1 }
 0x490   :  { %v4893_v28 = vpop.eup %4892  ;;  %v2422_v47 = vadd.f32 1.0, %v4891_v10 }
 0x491   :  { %v2431_v37 = vadd.f32 %v2429_v32, %v2310_v29  ;;  %v2430_v33 = vmul.f32 %v4893_v28, %v2428_v5 }
 0x492   :  { %v2486_v2 = vpop.f32.mrb[76].mxu0  ;;  %v2529_v11 = vpop.f32.mrb[76].mxu1 }
 0x493   :  { %4894 = vtanh.f32 %v2431_v37  ;;  %v2432_v22 = vadd.f32 %v2430_v33, %v2313_v57  ;;  %v2536_v51 = vadd.f32 %v2486_v2, %v2445_v7  ;;  %v2488_v61 = vpop.f32.mrb[77].mxu0  ;;  %v4451_v41 = vpop.f32.mrb[77].mxu1 }
 0x494   :  { %4896 = vrcp.f32 %v2421_v62  ;;  %v2550_v9 = vadd.f32 %v2488_v61, %v2446_v56  ;;  %v2490_v26 = vpop.f32.mrb[78].mxu0  ;;  %v2532_v6 = vpop.f32.mrb[78].mxu1 }
 0x495   :  { %4898 = vtanh.f32 %v2432_v22  ;;  %v3977_v1 = vmul.f32 -1.442695, %v2536_v51  ;;  %v2537_v42 = vadd.f32 %v2490_v26, %v2448_v36  ;;  %v2492_v10 = vpop.f32.mrb[79].mxu0  ;;  %v4452_v58 = vpop.f32.mrb[79].mxu1 }
 0x496   :  { %4900 = vrcp.f32 %v2422_v47  ;;  %v2551_v29 = vadd.f32 %v2492_v10, %v2449_v30  ;;  %v3979_v37 = vmul.f32 -1.442695, %v2550_v9  ;;  %v6774_v61 = vpop.permute.xlu0 %2581  ;;  %v6776_v41 = vpop.permute.xlu1 %2584 }
 0x497   :  { %4902 = vpow2.f32 %v3977_v1  ;;  %v3978_v32 = vmul.f32 -1.442695, %v2537_v42  ;;  %vm2586_vm0 = vcmp.eq.s32.totalorder %v6774_v61, 1  ;;  %vm2587_vm3 = vcmp.eq.s32.totalorder %v6776_v41, 1  ;;  %v7874_v61 = vld [vmem:[#allocation14_spill] sm:$0xff] }
 0x498   :  { %v3980_v17 = vmul.f32 -1.442695, %v2551_v29  ;;  %v2906_v41 = vunpack.c.l.bf16 %v7874_v61 }
 0x499   :  { %4904 = vpow2.f32 %v3978_v32 }
 0x49a   :  { %4906 = vpow2.f32 %v3979_v37  ;;  %v6915_v37 = vld [vmem:[%s7639_s6 + $0x30] ss:$12 sps:$4 sm:$0xff]  }
 0x49d   :  { %v4895_v5 = vpop.eup %4894 }
 0x49e   :  { %v4897_v28 = vpop.eup %4896  ;;  %v2435_v57 = vsub.f32 %v6635_v21, %v4895_v5 }
 0x49f   :  { %v4899_v62 = vpop.eup %4898 }
 0x4a0   :  { %v4901_v33 = vpop.eup %4900  ;;  %v2437_v13 = vmul.f32 %v4897_v28, %v2435_v57  ;;  %v2436_v7 = vsub.f32 %v6640_v20, %v4899_v62 }
 0x4a1   :  { %v4903_v2 = vpop.eup %4902 }
 0x4a2   :  { %v2438_v56 = vmul.f32 %v4901_v33, %v2436_v7  ;;  %v2544_v22 = vadd.f32 1.0, %v4903_v2  ;;  %v6772_v51 = vadd.f32 %v4895_v5, %v2437_v13  ;;  %v6921_v33 = vld [vmem:[%s7639_s6 + $0x38] ss:$12 sps:$4 sm:$0xff]   ;;  %v6934_v7 = vld [vmem:[%s7639_s6 + $0x48] ss:$12 sps:$4 sm:$0xff]  }
 0x4a3   :  { %v4905_v47 = vpop.eup %4904  ;;  %v6927_v13 = vld [vmem:[%s7639_s6 + $0x4c] ss:$12 sps:$4 sm:$0xff]   ;;  %v6940_v2 = vld [vmem:[%s7639_s6 + $0x50] ss:$12 sps:$4 sm:$0xff]  }
 0x4a4   :  { %4908 = vrcp.f32 %v2544_v22  ;;  %v2545_v36 = vadd.f32 1.0, %v4905_v47  ;;  %v6778_v26 = vadd.f32 %v4899_v62, %v2438_v56  ;;  %v6786_v9 = vsel %vm2586_vm0, %v6772_v51, %v6635_v21  ;;  %v4907_v21 = vpop.eup %4906  ;;  %v6908_v62 = vld [vmem:[%s7639_s6 + $0x34] ss:$12 sps:$4 sm:$0xff]   ;;  %7852 = vst [vmem:[#allocation43_spill] sm:$0xff] %v6940_v2  ;;  %v6965_v47 = vld [vmem:[%s7639_s6 + $0x7c] ss:$12 sps:$4 sm:$0xff]  }
 0x4a5   :  { %4910 = vpow2.f32 %v3980_v17  ;;  %v2558_v5 = vadd.f32 1.0, %v4907_v21  ;;  %v6946_v17 = vld [vmem:[%s7639_s6 + $0x64] ss:$12 sps:$4 sm:$0xff]   ;;  %v6953_v56 = vld [vmem:[%s7639_s6 + $0x60] ss:$12 sps:$4 sm:$0xff]   ;;  %7856 = vst [vmem:[#allocation47_spill] sm:$0xff] %v6965_v47 }
 0x4a6   :  { %4912 = vrcp.f32 %v2545_v36  ;;  %v6792_v30 = vsel %vm2587_vm3, %v6778_v26, %v6640_v20  ;;  %v6806_v20 = vld [vmem:[%s7646_s9] ss:$0 sm:$0xff]  ;;  %7853 = vst [vmem:[#allocation44_spill] sm:$0xff] %v6946_v17  ;;  %7854 = vst [vmem:[#allocation45_spill] sm:$0xff] %v6953_v56  ;;  %v6959_v22 = vld [vmem:[%s7639_s6 + $0x68] ss:$12 sps:$4 sm:$0xff]  }
 0x4a7   :  { %v2621_v1 = vpack.c.bf16 %v6792_v30, %v6786_v9  ;;  %v2564_v42 = vadd.f32 %v6806_v20, %v2529_v11  ;;  %v2565_v29 = vadd.f32 %v6806_v20, %v2532_v6  ;;  %v6902_v6 = vld [vmem:[%s7639_s6 + $0x20] ss:$12 sps:$4 sm:$0xff]   ;;  %7855 = vst [vmem:[#allocation46_spill] sm:$0xff] %v6959_v22  ;;  %v6972_v36 = vld [vmem:[%s7639_s6 + $0x78] ss:$12 sps:$4 sm:$0xff]  }
 0x4a8   :  { %7857 = vst [vmem:[#allocation48_spill] sm:$0xff] %v6972_v36  ;;  %v6984_v21 = vld [vmem:[%s7639_s6 + $0x94] ss:$12 sps:$4 sm:$0xff]  }
 0x4a9   :  { %2655 = vmatmul.mubr.bf16.vlgmr.msra.gmra.mrb[80].mxu0 %v2621_v1  ;;  %4470 = vmatmul.mubr.bf16.vlgmr.msra.gmra.mrb[80].mxu1 %v2621_v1  ;;  %v6978_v1 = vld [vmem:[%s7639_s6 + $0x80] ss:$12 sps:$4 sm:$0xff]   ;;  %7859 = vst [vmem:[#allocation50_spill] sm:$0xff] %v6984_v21 }
 0x4aa   :  { %2760 = vmatpush1.bf16.msra.mxu0 %v6384_v59  ;;  %4474 = vmatpush3.bf16.msra.mxu1 %v6390_v15  ;;  %7858 = vst [vmem:[#allocation49_spill] sm:$0xff] %v6978_v1 }
 0x4ab   :  { %2761 = vmatprep.subr.bf16.mxu0 %v6396_v0  ;;  %4475 = vmatprep.subr.bf16.mxu1 %v7792_v25  ;;  %v7851_v0 = vld [vmem:[#allocation35_spill] sm:$0xff] }
 0x4ac   :  { %2791 = vmatprep.mubr.bf16.mxu0 %v7793_v18  ;;  %4489 = vmatprep.mubr.msk.bf16.mxu1 %vm5184_vm8, %v7792_v25  ;;  %v2447_v10 = vunpack.c.l.bf16 %v7851_v0  ;;  %v2450_v28 = vunpack.c.h.bf16 %v7851_v0  ;;  %v7010_v0 = vld [vmem:[%s7639_s6 + $0xa8] ss:$12 sps:$4 sm:$0xff]  }
 0x4ad   :  { %7863 = vst [vmem:[#allocation54_spill] sm:$0xff] %v7010_v0 }
 0x4ae   :  { %v4909_v59 = vpop.eup %4908  ;;  %2762 = vmatpush1.bf16.msra.mxu0 %v6408_v50  ;;  %4476 = vmatpush3.bf16.msra.mxu1 %v6414_v52 }
 0x4af   :  { %v4911_v15 = vpop.eup %4910  ;;  %v2566_v58 = vmul.f32 %v4909_v59, %v2564_v42  ;;  %2763 = vmatprep.subr.bf16.mxu0 %v6423_v35  ;;  %4477 = vmatprep.subr.bf16.mxu1 %v7792_v25  ;;  %v6991_v42 = vld [vmem:[%s7639_s6 + $0x90] ss:$12 sps:$4 sm:$0xff]   ;;  %v6997_v59 = vld [vmem:[%s7639_s6 + $0x98] ss:$12 sps:$4 sm:$0xff]  }
 0x4b0   :  { %v4913_v32 = vpop.eup %4912  ;;  %v2559_v52 = vadd.f32 1.0, %v4911_v15  ;;  %7860 = vst [vmem:[#allocation51_spill] sm:$0xff] %v6991_v42  ;;  %7861 = vst [vmem:[#allocation52_spill] sm:$0xff] %v6997_v59  ;;  %v7003_v15 = vld [vmem:[%s7639_s6 + $0xac] ss:$12 sps:$4 sm:$0xff]  }
 0x4b1   :  { %v2568_v11 = vadd.f32 %v2566_v58, %v2447_v10  ;;  %v2567_v57 = vmul.f32 %v4913_v32, %v2565_v29  ;;  %7862 = vst [vmem:[#allocation53_spill] sm:$0xff] %v7003_v15  ;;  %v7016_v10 = vld [vmem:[%s7639_s6 + $0xb0] ss:$12 sps:$4 sm:$0xff]   ;;  %v7866_v29 = vld [vmem:[#allocation10_spill] sm:$0xff] }
 0x4b2   :  { %2764 = vmatpush1.bf16.msra.mxu0 %v6431_v39  ;;  %4478 = vmatpush3.bf16.msra.mxu1 %v6437_v4  ;;  %7864 = vst [vmem:[#allocation6_spill] sm:$0xff] %v7016_v10  ;;  %v7022_v58 = vld [vmem:[%s7640_s7 + $0x4] ss:$12 sps:$4 sm:$0xff]   ;;  %v2615_v32 = vunpack.c.l.bf16 %v7866_v29 }
 0x4b3   :  { %4914 = vtanh.f32 %v2568_v11  ;;  %v2569_v50 = vadd.f32 %v2567_v57, %v2450_v28  ;;  %2765 = vmatprep.subr.bf16.mxu0 %v6443_v16  ;;  %4479 = vmatprep.subr.bf16.mxu1 %v7792_v25  ;;  %7865 = vst [vmem:[#allocation7_spill] sm:$0xff] %v7022_v58  ;;  %v7867_v11 = vld [vmem:[#allocation11_spill] sm:$0xff] }
 0x4b4   :  { %4916 = vrcp.f32 %v2558_v5  ;;  %v2616_v57 = vunpack.c.l.bf16 %v7867_v11 }
 0x4b5   :  { %4918 = vtanh.f32 %v2569_v50 }
 0x4b6   :  { %2766 = vmatpush1.bf16.msra.mxu0 %v6450_v44  ;;  %4480 = vmatpush3.bf16.msra.mxu1 %v6456_v3  ;;  %4920 = vrcp.f32 %v2559_v52 }
 0x4b7   :  { %2767 = vmatprep.subr.bf16.mxu0 %v6462_v63  ;;  %4481 = vmatprep.subr.bf16.mxu1 %v7792_v25 }
 0x4ba   :  { %2768 = vmatpush1.bf16.msra.mxu0 %v6469_v49  ;;  %4482 = vmatpush3.bf16.msra.mxu1 %v6475_v14  ;;  %v6834_v49 = vpop.permute.xlu0 %2593  ;;  %v6836_v14 = vpop.permute.xlu1 %2596 }
 0x4bb   :  { %2769 = vmatprep.subr.bf16.mxu0 %v6481_v24  ;;  %4483 = vmatprep.subr.bf16.mxu1 %v7792_v25  ;;  %vm2598_vm6 = vcmp.eq.s32.totalorder %v6834_v49, 1  ;;  %vm2599_vm2 = vcmp.eq.s32.totalorder %v6836_v14, 1  ;;  %v7087_v49 = vld [vmem:[%s7640_s7 + $0x1c] ss:$12 sps:$4 sm:$0xff]  }
 0x4bd   :  { %v4915_v35 = vpop.eup %4914 }
 0x4be   :  { %v4917_v39 = vpop.eup %4916  ;;  %v2572_v4 = vsub.f32 %v6706_v8, %v4915_v35  ;;  %2770 = vmatpush1.bf16.msra.mxu0 %v6493_v48  ;;  %4484 = vmatpush3.bf16.msra.mxu1 %v7825_v19 }
 0x4bf   :  { %v4919_v16 = vpop.eup %4918  ;;  %2771 = vmatprep.subr.bf16.mxu0 %v7826_v60  ;;  %4485 = vmatprep.subr.bf16.mxu1 %v7792_v25 }
 0x4c0   :  { %v2574_v44 = vmul.f32 %v4917_v39, %v2572_v4  ;;  %v2573_v3 = vsub.f32 %v6712_v54, %v4919_v16  ;;  %v4921_v63 = vpop.eup %4920  ;;  %v2618_v39 = vunpack.c.h.bf16 %v7866_v29 }
 0x4c2   :  { %v2575_v24 = vmul.f32 %v4921_v63, %v2573_v3  ;;  %2772 = vmatpush1.bf16.msra.mxu0 %v7827_v12  ;;  %4486 = vmatpush3.bf16.msra.mxu1 %v6525_v55  ;;  %v6840_v48 = vadd.f32 %v4915_v35, %v2574_v44  ;;  %v6880_v12 = vld [vmem:[%s7639_s6 + $0x8] ss:$12 sps:$4 sm:$0xff]   ;;  %v2619_v3 = vunpack.c.h.bf16 %v7867_v11 }
 0x4c3   :  { %2773 = vmatprep.subr.bf16.mxu0 %v6533_v46  ;;  %4487 = vmatprep.subr.bf16.mxu1 %v7792_v25 }
 0x4c4   :  { %v6844_v19 = vadd.f32 %v4919_v16, %v2575_v24  ;;  %v6854_v55 = vsel %vm2598_vm6, %v6840_v48, %v6706_v8  ;;  %v6886_v8 = vld [vmem:[%s7639_s6 + $0x1c] ss:$12 sps:$4 sm:$0xff]  }
 0x4c6   :  { %2774 = vmatpush1.bf16.msra.mxu0 %v6548_v43  ;;  %4488 = vmatpush3.bf16.msra.mxu1 %v6554_v40  ;;  %v6860_v46 = vsel %vm2599_vm2, %v6844_v19, %v6712_v54  ;;  %v6867_v43 = vld [vmem:[%s7639_s6 + $0x4] ss:$12 sps:$4 sm:$0xff]   ;;  %v6874_v40 = vld [vmem:[%s7639_s6] ss:$12 sps:$4 sm:$0xff]  }
 0x4c7   :  { %v2758_v60 = vpack.c.bf16 %v6860_v46, %v6854_v55  ;;  %2913 = vmatprep.subr.bf16.mxu0 %v6867_v43  ;;  %4493 = vmatprep.subr.bf16.mxu1 %v7792_v25  ;;  %v6896_v54 = vld [vmem:[%s7639_s6 + $0x18] ss:$12 sps:$4 sm:$0xff]  }
 0x4c9   :  { %2792 = vmatmul.mubr.bf16.vlgmr.msra.gmra.mrb[84].mxu0 %v2758_v60  ;;  %4490 = vmatmul.mubr.bf16.vlgmr.msra.gmra.mrb[84].mxu1 %v2758_v60 }
 0x4ca   :  { %2914 = vmatpush1.bf16.msra.mxu0 %v6874_v40  ;;  %4494 = vmatpush3.bf16.msra.mxu1 %v6880_v12 }
 0x4cb   :  { %2915 = vmatprep.subr.bf16.mxu0 %v6886_v8  ;;  %4495 = vmatprep.subr.bf16.mxu1 %v7792_v25 }
 0x4cc   :  { %2945 = vmatprep.mubr.bf16.mxu0 %v7793_v18  ;;  %4509 = vmatprep.mubr.msk.bf16.mxu1 %vm5184_vm8, %v7792_v25 }
 0x4ce   :  { %2916 = vmatpush1.bf16.msra.mxu0 %v6896_v54  ;;  %4496 = vmatpush3.bf16.msra.mxu1 %v6902_v6 }
 0x4cf   :  { %2917 = vmatprep.subr.bf16.mxu0 %v6908_v62  ;;  %4497 = vmatprep.subr.bf16.mxu1 %v7792_v25 }
 0x4d2   :  { %2918 = vmatpush1.bf16.msra.mxu0 %v6915_v37  ;;  %4498 = vmatpush3.bf16.msra.mxu1 %v6921_v33 }
 0x4d3   :  { %2919 = vmatprep.subr.bf16.mxu0 %v6927_v13  ;;  %4499 = vmatprep.subr.bf16.mxu1 %v7792_v25 }
 0x4d6   :  { %2920 = vmatpush1.bf16.msra.mxu0 %v6934_v7  ;;  %4500 = vmatpush3.bf16.msra.mxu1 %v6940_v2 }
 0x4d7   :  { %2921 = vmatprep.subr.bf16.mxu0 %v6946_v17  ;;  %4501 = vmatprep.subr.bf16.mxu1 %v7792_v25 }
 0x4da   :  { %2922 = vmatpush1.bf16.msra.mxu0 %v6953_v56  ;;  %4502 = vmatpush3.bf16.msra.mxu1 %v6959_v22 }
 0x4db   :  { %2923 = vmatprep.subr.bf16.mxu0 %v6965_v47  ;;  %4503 = vmatprep.subr.bf16.mxu1 %v7792_v25 }
 0x4de   :  { %2924 = vmatpush1.bf16.msra.mxu0 %v6972_v36  ;;  %4504 = vmatpush3.bf16.msra.mxu1 %v6978_v1 }
 0x4df   :  { %2925 = vmatprep.subr.bf16.mxu0 %v6984_v21  ;;  %4505 = vmatprep.subr.bf16.mxu1 %v7792_v25 }
 0x4e2   :  { %2926 = vmatpush1.bf16.msra.mxu0 %v6991_v42  ;;  %4506 = vmatpush3.bf16.msra.mxu1 %v6997_v59 }
 0x4e3   :  { %2927 = vmatprep.subr.bf16.mxu0 %v7003_v15  ;;  %4507 = vmatprep.subr.bf16.mxu1 %v7792_v25 }
 0x4e6   :  { %2928 = vmatpush1.bf16.msra.mxu0 %v7010_v0  ;;  %4508 = vmatpush3.bf16.msra.mxu1 %v7016_v10 }
 0x4e7   :  { %3050 = vmatprep.subr.bf16.mxu0 %v7022_v58  ;;  %4513 = vmatprep.subr.bf16.mxu1 %v7792_v25 }
 0x57c   :  { %v2656_v5 = vpop.f32.mrb[80].mxu0  ;;  %v2699_v28 = vpop.f32.mrb[80].mxu1 }
 0x57d   :  { %v2706_v50 = vadd.f32 %v2656_v5, %v2615_v32  ;;  %v2658_v52 = vpop.f32.mrb[81].mxu0  ;;  %v4471_v35 = vpop.f32.mrb[81].mxu1  ;;  %v2734_v11 = vadd.f32 %v6760_v27, %v2699_v28  ;;  %v7870_v28 = vld [vmem:[#allocation29_spill] sm:$0xff] }
 0x57e   :  { %v2720_v4 = vadd.f32 %v2658_v52, %v2616_v57  ;;  %v2660_v16 = vpop.f32.mrb[82].mxu0  ;;  %v2702_v44 = vpop.f32.mrb[82].mxu1 }
 0x57f   :  { %v3983_v63 = vmul.f32 -1.442695, %v2706_v50  ;;  %v2707_v24 = vadd.f32 %v2660_v16, %v2618_v39  ;;  %v2662_v60 = vpop.f32.mrb[83].mxu0  ;;  %v4472_v23 = vpop.f32.mrb[83].mxu1 }
 0x580   :  { %v2721_v38 = vadd.f32 %v2662_v60, %v2619_v3  ;;  %v3985_v45 = vmul.f32 -1.442695, %v2720_v4  ;;  %v7868_v23 = vld [vmem:[#allocation9_spill] sm:$0xff] }
 0x581   :  { %4922 = vpow2.f32 %v3983_v63  ;;  %v3984_v31 = vmul.f32 -1.442695, %v2707_v24  ;;  %v2617_v39 = vunpack.c.l.bf16 %v7868_v23  ;;  %v7869_v63 = vld [vmem:[#allocation28_spill] sm:$0xff] }
 0x582   :  { %v3986_v32 = vmul.f32 -1.442695, %v2721_v38  ;;  %v2620_v38 = vunpack.c.h.bf16 %v7868_v23  ;;  %v2752_v24 = vunpack.c.l.bf16 %v7869_v63 }
 0x583   :  { %4924 = vpow2.f32 %v3984_v31  ;;  %v2735_v31 = vadd.f32 %v6760_v27, %v2702_v44  ;;  %v2755_v44 = vunpack.c.h.bf16 %v7869_v63 }
 0x584   :  { %4926 = vpow2.f32 %v3985_v45 }
 0x58b   :  { %v4923_v34 = vpop.eup %4922 }
 0x58c   :  { %v2714_v5 = vadd.f32 1.0, %v4923_v34 }
 0x58d   :  { %v4925_v35 = vpop.eup %4924 }
 0x58e   :  { %4928 = vrcp.f32 %v2714_v5  ;;  %v2715_v29 = vadd.f32 1.0, %v4925_v35  ;;  %v4927_v57 = vpop.eup %4926  ;;  %v2753_v35 = vunpack.c.l.bf16 %v7870_v28 }
 0x58f   :  { %4930 = vpow2.f32 %v3986_v32  ;;  %v2728_v3 = vadd.f32 1.0, %v4927_v57 }
 0x590   :  { %4932 = vrcp.f32 %v2715_v29 }
 0x598   :  { %v4929_v50 = vpop.eup %4928 }
 0x599   :  { %v4931_v52 = vpop.eup %4930  ;;  %v2736_v16 = vmul.f32 %v4929_v50, %v2734_v11 }
 0x59a   :  { %v4933_v4 = vpop.eup %4932  ;;  %v2729_v60 = vadd.f32 1.0, %v4931_v52 }
 0x59b   :  { %v2738_v34 = vadd.f32 %v2736_v16, %v2617_v39  ;;  %v2737_v45 = vmul.f32 %v4933_v4, %v2735_v31  ;;  %v2756_v16 = vunpack.c.h.bf16 %v7870_v28 }
 0x59c   :  { %v2793_v32 = vpop.f32.mrb[84].mxu0  ;;  %v7035_v5 = vpop.f32.mrb[84].mxu1 }
 0x59d   :  { %4934 = vtanh.f32 %v2738_v34  ;;  %v2739_v29 = vadd.f32 %v2737_v45, %v2620_v38  ;;  %v2843_v53 = vadd.f32 %v2793_v32, %v2752_v24  ;;  %v2795_v11 = vpop.f32.mrb[85].mxu0  ;;  %v4491_v50 = vpop.f32.mrb[85].mxu1 }
 0x59e   :  { %4936 = vrcp.f32 %v2728_v3  ;;  %v2857_v57 = vadd.f32 %v2795_v11, %v2753_v35  ;;  %v2797_v23 = vpop.f32.mrb[86].mxu0  ;;  %v7039_v39 = vpop.f32.mrb[86].mxu1 }
 0x59f   :  { %4938 = vtanh.f32 %v2739_v29  ;;  %v3987_v52 = vmul.f32 -1.442695, %v2843_v53  ;;  %v2844_v31 = vadd.f32 %v2797_v23, %v2755_v44  ;;  %v2799_v4 = vpop.f32.mrb[87].mxu0  ;;  %v4492_v27 = vpop.f32.mrb[87].mxu1  ;;  %v2607_v23 = vsel %vm2598_vm6, %v6840_v48, 0.0 }
 0x5a0   :  { %4940 = vrcp.f32 %v2729_v60  ;;  %v2858_v34 = vadd.f32 %v2799_v4, %v2756_v16  ;;  %v3989_v32 = vmul.f32 -1.442695, %v2857_v57  ;;  %v2608_v57 = vsel %vm2599_vm2, %v6844_v19, 0.0 }
 0x5a1   :  { %4942 = vpow2.f32 %v3987_v52  ;;  %v3988_v38 = vmul.f32 -1.442695, %v2844_v31 }
 0x5a2   :  { %v3990_v53 = vmul.f32 -1.442695, %v2858_v34 }
 0x5a3   :  { %4944 = vpow2.f32 %v3988_v38 }
 0x5a4   :  { %4946 = vpow2.f32 %v3989_v32  ;;  %v7105_v32 = vld [vmem:[%s7640_s7 + $0x20] ss:$12 sps:$4 sm:$0xff]  }
 0x5a7   :  { %v4935_v45 = vpop.eup %4934 }
 0x5a8   :  { %v4937_v24 = vpop.eup %4936  ;;  %v2742_v3 = vsub.f32 %v6786_v9, %v4935_v45 }
 0x5a9   :  { %v4939_v63 = vpop.eup %4938 }
 0x5aa   :  { %v4941_v35 = vpop.eup %4940  ;;  %v2744_v11 = vmul.f32 %v4937_v24, %v2742_v3  ;;  %v2743_v28 = vsub.f32 %v6792_v30, %v4939_v63  ;;  %v2871_v24 = vadd.f32 %v6806_v20, %v7035_v5  ;;  %v2872_v5 = vadd.f32 %v6806_v20, %v7039_v39  ;;  %v7128_v39 = vld [vmem:[%s7640_s7 + $0x38] ss:$12 sps:$4 sm:$0xff]  }
 0x5ab   :  { %v4943_v29 = vpop.eup %4942 }
 0x5ac   :  { %v2745_v50 = vmul.f32 %v4941_v35, %v2743_v28  ;;  %v2851_v44 = vadd.f32 1.0, %v4943_v29  ;;  %v2746_v27 = vadd.f32 %v4935_v45, %v2744_v11  ;;  %v7871_v11 = vld [vmem:[#allocation30_spill] sm:$0xff] }
 0x5ad   :  { %v4945_v60 = vpop.eup %4944  ;;  %v2754_v28 = vunpack.c.l.bf16 %v7871_v11 }
 0x5ae   :  { %4948 = vrcp.f32 %v2851_v44  ;;  %v2852_v16 = vadd.f32 1.0, %v4945_v60  ;;  %v2747_v52 = vadd.f32 %v4939_v63, %v2745_v50  ;;  %v7053_v31 = vsel %vm2598_vm6, %v2746_v27, %v6786_v9  ;;  %v7075_v9 = vld [vmem:[%s7640_s7] ss:$12 sps:$4 sm:$0xff]   ;;  %v4947_v14 = vpop.eup %4946  ;;  %v7099_v63 = vld [vmem:[%s7640_s7 + $0x18] ss:$12 sps:$4 sm:$0xff]  }
 0x5af   :  { %4950 = vpow2.f32 %v3990_v53  ;;  %v2889_v4 = vsel %vm2598_vm6, %v2746_v27, 0.0  ;;  %v7114_v53 = vld [vmem:[%s7640_s7 + $0x34] ss:$12 sps:$4 sm:$0xff]   ;;  %v2865_v44 = vadd.f32 1.0, %v4947_v14  ;;  %v2757_v27 = vunpack.c.h.bf16 %v7871_v11 }
 0x5b0   :  { %4952 = vrcp.f32 %v2852_v16  ;;  %v7060_v48 = vsel %vm2599_vm2, %v2747_v52, %v6792_v30  ;;  %v2890_v34 = vsel %vm2599_vm2, %v2747_v52, 0.0  ;;  %v3795_v38 = vadd.f32 %v2889_v4, %v2607_v23  ;;  %v7081_v30 = vld [vmem:[%s7640_s7 + $0x8] ss:$12 sps:$4 sm:$0xff]   ;;  %v7122_v16 = vld [vmem:[%s7640_s7 + $0x30] ss:$12 sps:$4 sm:$0xff]  }
 0x5b1   :  { %v2912_v19 = vpack.c.bf16 %v7060_v48, %v7053_v31  ;;  %v3796_v45 = vadd.f32 %v2890_v34, %v2608_v57  ;;  %v7134_v4 = vld [vmem:[%s7640_s7 + $0x4c] ss:$12 sps:$4 sm:$0xff]   ;;  %v7141_v34 = vld [vmem:[%s7640_s7 + $0x48] ss:$12 sps:$4 sm:$0xff]  }
 0x5b2   :  { %4045 = vst [vmem:[%s7645_s10 + $0x40] sm:$0xff] %v3795_v38  ;;  %v7147_v38 = vld [vmem:[%s7640_s7 + $0x50] ss:$12 sps:$4 sm:$0xff]   ;;  %v7166_v14 = vld [vmem:[%s7640_s7 + $0x68] ss:$12 sps:$4 sm:$0xff]  }
 0x5b3   :  { %2946 = vmatmul.mubr.bf16.vlgmr.msra.gmra.mrb[88].mxu0 %v2912_v19  ;;  %4046 = vst [vmem:[%s7645_s10 + $0x48] sm:$0xff] %v3796_v45  ;;  %4510 = vmatmul.mubr.bf16.vlgmr.msra.gmra.mrb[88].mxu1 %v2912_v19  ;;  %v7153_v19 = vld [vmem:[%s7640_s7 + $0x64] ss:$12 sps:$4 sm:$0xff]   ;;  %v7160_v45 = vld [vmem:[%s7640_s7 + $0x60] ss:$12 sps:$4 sm:$0xff]  }
 0x5b4   :  { %3051 = vmatpush1.bf16.msra.mxu0 %v7075_v9  ;;  %4514 = vmatpush3.bf16.msra.mxu1 %v7081_v30 }
 0x5b5   :  { %3052 = vmatprep.subr.bf16.mxu0 %v7087_v49  ;;  %4515 = vmatprep.subr.bf16.mxu1 %v7792_v25 }
 0x5b6   :  { %3082 = vmatprep.mubr.bf16.mxu0 %v7793_v18  ;;  %4529 = vmatprep.mubr.msk.bf16.mxu1 %vm5184_vm8, %v7792_v25 }
 0x5b8   :  { %v4949_v3 = vpop.eup %4948  ;;  %3053 = vmatpush1.bf16.msra.mxu0 %v7099_v63  ;;  %4516 = vmatpush3.bf16.msra.mxu1 %v7105_v32 }
 0x5b9   :  { %v4951_v35 = vpop.eup %4950  ;;  %v2873_v29 = vmul.f32 %v4949_v3, %v2871_v24  ;;  %3054 = vmatprep.subr.bf16.mxu0 %v7114_v53  ;;  %4517 = vmatprep.subr.bf16.mxu1 %v7792_v25  ;;  %v7172_v24 = vld [vmem:[%s7640_s7 + $0x7c] ss:$12 sps:$4 sm:$0xff]  }
 0x5ba   :  { %v4953_v50 = vpop.eup %4952  ;;  %v2866_v57 = vadd.f32 1.0, %v4951_v35 }
 0x5bb   :  { %v2875_v60 = vadd.f32 %v2873_v29, %v2754_v28  ;;  %v2874_v23 = vmul.f32 %v4953_v50, %v2872_v5  ;;  %v7180_v28 = vld [vmem:[%s7640_s7 + $0x78] ss:$12 sps:$4 sm:$0xff]   ;;  %v7186_v29 = vld [vmem:[%s7640_s7 + $0x80] ss:$12 sps:$4 sm:$0xff]  }
 0x5bc   :  { %3055 = vmatpush1.bf16.msra.mxu0 %v7122_v16  ;;  %4518 = vmatpush3.bf16.msra.mxu1 %v7128_v39  ;;  %v7192_v50 = vld [vmem:[%s7640_s7 + $0x94] ss:$12 sps:$4 sm:$0xff]  }
 0x5bd   :  { %4954 = vtanh.f32 %v2875_v60  ;;  %v2876_v52 = vadd.f32 %v2874_v23, %v2757_v27  ;;  %3056 = vmatprep.subr.bf16.mxu0 %v7134_v4  ;;  %4519 = vmatprep.subr.bf16.mxu1 %v7792_v25  ;;  %7872 = vst [vmem:[#allocation5_spill] sm:$0xff] %v7192_v50 }
 0x5be   :  { %4956 = vrcp.f32 %v2865_v44 }
 0x5bf   :  { %4958 = vtanh.f32 %v2876_v52  ;;  %v7200_v52 = vld [vmem:[%s7640_s7 + $0x90] ss:$12 sps:$4 sm:$0xff]  }
 0x5c0   :  { %3057 = vmatpush1.bf16.msra.mxu0 %v7141_v34  ;;  %4520 = vmatpush3.bf16.msra.mxu1 %v7147_v38  ;;  %4960 = vrcp.f32 %v2866_v57  ;;  %7873 = vst [vmem:[#allocation32_spill] sm:$0xff] %v7200_v52  ;;  %v7206_v57 = vld [vmem:[%s7640_s7 + $0x98] ss:$12 sps:$4 sm:$0xff]  }
 0x5c1   :  { %3058 = vmatprep.subr.bf16.mxu0 %v7153_v19  ;;  %4521 = vmatprep.subr.bf16.mxu1 %v7792_v25 }
 0x5c4   :  { %3059 = vmatpush1.bf16.msra.mxu0 %v7160_v45  ;;  %4522 = vmatpush3.bf16.msra.mxu1 %v7166_v14 }
 0x5c5   :  { %3060 = vmatprep.subr.bf16.mxu0 %v7172_v24  ;;  %4523 = vmatprep.subr.bf16.mxu1 %v7792_v25 }
 0x5c7   :  { %v4955_v3 = vpop.eup %4954 }
 0x5c8   :  { %v4957_v35 = vpop.eup %4956  ;;  %v2879_v11 = vsub.f32 %v6854_v55, %v4955_v3  ;;  %3061 = vmatpush1.bf16.msra.mxu0 %v7180_v28  ;;  %4524 = vmatpush3.bf16.msra.mxu1 %v7186_v29 }
 0x5c9   :  { %v4959_v5 = vpop.eup %4958  ;;  %3062 = vmatprep.subr.bf16.mxu0 %v7192_v50  ;;  %4525 = vmatprep.subr.bf16.mxu1 %v7792_v25 }
 0x5ca   :  { %v2881_v44 = vmul.f32 %v4957_v35, %v2879_v11  ;;  %v2880_v27 = vsub.f32 %v6860_v46, %v4959_v5  ;;  %v4961_v60 = vpop.eup %4960  ;;  %v7212_v35 = vld [vmem:[%s7640_s7 + $0xac] ss:$12 sps:$4 sm:$0xff]   ;;  %v2602_v11 = vsel %vm2586_vm0, %v6772_v51, 0.0  ;;  %v7233_v51 = vld [vmem:[%s7640_s7 + $0xb0] ss:$12 sps:$4 sm:$0xff]  }
 0x5cc   :  { %v2882_v23 = vmul.f32 %v4961_v60, %v2880_v27  ;;  %3063 = vmatpush1.bf16.msra.mxu0 %v7200_v52  ;;  %4526 = vmatpush3.bf16.msra.mxu1 %v7206_v57  ;;  %v2883_v50 = vadd.f32 %v4955_v3, %v2881_v44  ;;  %v2603_v3 = vsel %vm2587_vm3, %v6778_v26, 0.0  ;;  %v7227_v44 = vld [vmem:[%s7640_s7 + $0xa8] ss:$12 sps:$4 sm:$0xff]  }
 0x5cd   :  { %3064 = vmatprep.subr.bf16.mxu0 %v7212_v35  ;;  %4527 = vmatprep.subr.bf16.mxu1 %v7792_v25 }
 0x5ce   :  { %v2884_v27 = vadd.f32 %v4959_v5, %v2882_v23  ;;  %v2896_v60 = vsel %vm2586_vm0, %v2883_v50, 0.0  ;;  %v7239_v5 = vsel %vm2586_vm0, %v2883_v50, %v6854_v55  ;;  %v7875_v50 = vld [vmem:[#allocation15_spill] sm:$0xff] }
 0x5cf   :  { %v2898_v52 = vadd.f32 %v2896_v60, %v2602_v11 }
 0x5d0   :  { %3065 = vmatpush1.bf16.msra.mxu0 %v7227_v44  ;;  %4528 = vmatpush3.bf16.msra.mxu1 %v7233_v51  ;;  %v7244_v26 = vsel %vm2587_vm3, %v2884_v27, %v6860_v46  ;;  %v2897_v23 = vsel %vm2587_vm3, %v2884_v27, 0.0 }
 0x5d1   :  { %v2899_v11 = vadd.f32 %v2897_v23, %v2603_v3  ;;  %3995 = vst [vmem:[%s7645_s10 + $0x30] sm:$0xff] %v2898_v52  ;;  %v3049_v60 = vpack.c.bf16 %v7244_v26, %v7239_v5  ;;  %3204 = vmatprep.subr.bf16.mxu0 %v6867_v43  ;;  %4533 = vmatprep.subr.bf16.mxu1 %v7792_v25  ;;  %v2907_v52 = vunpack.c.l.bf16 %v7875_v50 }
 0x5d3   :  { %3996 = vst [vmem:[%s7645_s10 + $0x38] sm:$0xff] %v2899_v11  ;;  %3083 = vmatmul.mubr.bf16.vlgmr.msra.gmra.mrb[92].mxu0 %v3049_v60  ;;  %4530 = vmatmul.mubr.bf16.vlgmr.msra.gmra.mrb[92].mxu1 %v3049_v60  ;;  %v2909_v11 = vunpack.c.h.bf16 %v7874_v61 }
 0x5d4   :  { %3205 = vmatpush1.bf16.msra.mxu0 %v6874_v40  ;;  %4534 = vmatpush3.bf16.msra.mxu1 %v6880_v12 }
 0x5d5   :  { %3206 = vmatprep.subr.bf16.mxu0 %v6886_v8  ;;  %4535 = vmatprep.subr.bf16.mxu1 %v7792_v25 }
 0x5d6   :  { %3236 = vmatprep.mubr.bf16.mxu0 %v7793_v18  ;;  %4549 = vmatprep.mubr.msk.bf16.mxu1 %vm5184_vm8, %v7792_v25 }
 0x5d8   :  { %3207 = vmatpush1.bf16.msra.mxu0 %v6896_v54  ;;  %4536 = vmatpush3.bf16.msra.mxu1 %v6902_v6 }
 0x5d9   :  { %3208 = vmatprep.subr.bf16.mxu0 %v6908_v62  ;;  %4537 = vmatprep.subr.bf16.mxu1 %v7792_v25 }
 0x5dc   :  { %3209 = vmatpush1.bf16.msra.mxu0 %v6915_v37  ;;  %4538 = vmatpush3.bf16.msra.mxu1 %v6921_v33 }
 0x5dd   :  { %3210 = vmatprep.subr.bf16.mxu0 %v6927_v13  ;;  %4539 = vmatprep.subr.bf16.mxu1 %v7792_v25 }
 0x5e0   :  { %3211 = vmatpush1.bf16.msra.mxu0 %v6934_v7  ;;  %4540 = vmatpush3.bf16.msra.mxu1 %v6940_v2 }
 0x5e1   :  { %3212 = vmatprep.subr.bf16.mxu0 %v6946_v17  ;;  %4541 = vmatprep.subr.bf16.mxu1 %v7792_v25 }
 0x5e4   :  { %3213 = vmatpush1.bf16.msra.mxu0 %v6953_v56  ;;  %4542 = vmatpush3.bf16.msra.mxu1 %v6959_v22 }
 0x5e5   :  { %3214 = vmatprep.subr.bf16.mxu0 %v6965_v47  ;;  %4543 = vmatprep.subr.bf16.mxu1 %v7792_v25 }
 0x5e8   :  { %3215 = vmatpush1.bf16.msra.mxu0 %v6972_v36  ;;  %4544 = vmatpush3.bf16.msra.mxu1 %v6978_v1 }
 0x5e9   :  { %3216 = vmatprep.subr.bf16.mxu0 %v6984_v21  ;;  %4545 = vmatprep.subr.bf16.mxu1 %v7792_v25 }
 0x5ec   :  { %3217 = vmatpush1.bf16.msra.mxu0 %v6991_v42  ;;  %4546 = vmatpush3.bf16.msra.mxu1 %v6997_v59 }
 0x5ed   :  { %3218 = vmatprep.subr.bf16.mxu0 %v7003_v15  ;;  %4547 = vmatprep.subr.bf16.mxu1 %v7792_v25 }
 0x5f0   :  { %3219 = vmatpush1.bf16.msra.mxu0 %v7010_v0  ;;  %4548 = vmatpush3.bf16.msra.mxu1 %v7016_v10  ;;  %v2910_v10 = vunpack.c.h.bf16 %v7875_v50  ;;  %v7876_v50 = vld [vmem:[#allocation42_spill] sm:$0xff] }
 0x5f1   :  { %3341 = vmatprep.subr.bf16.mxu0 %v7022_v58  ;;  %4553 = vmatprep.subr.bf16.mxu1 %v7792_v25 }
 0x686   :  { %v2947_v55 = vpop.f32.mrb[88].mxu0  ;;  %v2990_v46 = vpop.f32.mrb[88].mxu1 }
 0x687   :  { %v2997_v27 = vadd.f32 %v2947_v55, %v2906_v41  ;;  %v2949_v3 = vpop.f32.mrb[89].mxu0  ;;  %v4511_v23 = vpop.f32.mrb[89].mxu1 }
 0x688   :  { %v3011_v60 = vadd.f32 %v2949_v3, %v2907_v52  ;;  %v2951_v15 = vpop.f32.mrb[90].mxu0  ;;  %v2993_v0 = vpop.f32.mrb[90].mxu1 }
 0x689   :  { %v3997_v59 = vmul.f32 -1.442695, %v2997_v27  ;;  %v2998_v58 = vadd.f32 %v2951_v15, %v2909_v11  ;;  %v2953_v42 = vpop.f32.mrb[91].mxu0  ;;  %v4512_v21 = vpop.f32.mrb[91].mxu1  ;;  %v3025_v27 = vadd.f32 %v7876_v50, %v2990_v46  ;;  %v7878_v11 = vld [vmem:[#allocation24_spill] sm:$0xff]  ;;  %v7879_v46 = vld [vmem:[#allocation25_spill] sm:$0xff] }
 0x68a   :  { %v3012_v1 = vadd.f32 %v2953_v42, %v2910_v10  ;;  %v3999_v47 = vmul.f32 -1.442695, %v3011_v60  ;;  %v7877_v21 = vld [vmem:[#allocation8_spill] sm:$0xff]  ;;  %v3043_v60 = vunpack.c.l.bf16 %v7878_v11 }
 0x68b   :  { %4962 = vpow2.f32 %v3997_v59  ;;  %v3998_v36 = vmul.f32 -1.442695, %v2998_v58  ;;  %v2908_v42 = vunpack.c.l.bf16 %v7877_v21 }
 0x68c   :  { %v4000_v41 = vmul.f32 -1.442695, %v3012_v1 }
 0x68d   :  { %4964 = vpow2.f32 %v3998_v36  ;;  %v3026_v36 = vadd.f32 %v7876_v50, %v2993_v0  ;;  %v3046_v0 = vunpack.c.h.bf16 %v7878_v11 }
 0x68e   :  { %4966 = vpow2.f32 %v3999_v47 }
 0x695   :  { %v4963_v22 = vpop.eup %4962 }
 0x696   :  { %v3005_v55 = vadd.f32 1.0, %v4963_v22  ;;  %v2911_v22 = vunpack.c.h.bf16 %v7877_v21 }
 0x697   :  { %v4965_v23 = vpop.eup %4964 }
 0x698   :  { %4968 = vrcp.f32 %v3005_v55  ;;  %v3006_v61 = vadd.f32 1.0, %v4965_v23  ;;  %v4967_v52 = vpop.eup %4966 }
 0x699   :  { %4970 = vpow2.f32 %v4000_v41  ;;  %v3019_v58 = vadd.f32 1.0, %v4967_v52 }
 0x69a   :  { %4972 = vrcp.f32 %v3006_v61  ;;  %v3044_v61 = vunpack.c.l.bf16 %v7879_v46 }
 0x6a2   :  { %v4969_v15 = vpop.eup %4968 }
 0x6a3   :  { %v4971_v3 = vpop.eup %4970  ;;  %v3027_v59 = vmul.f32 %v4969_v15, %v3025_v27 }
 0x6a4   :  { %v4973_v10 = vpop.eup %4972  ;;  %v3020_v41 = vadd.f32 1.0, %v4971_v3 }
 0x6a5   :  { %v3029_v1 = vadd.f32 %v3027_v59, %v2908_v42  ;;  %v3028_v47 = vmul.f32 %v4973_v10, %v3026_v36  ;;  %v3047_v42 = vunpack.c.h.bf16 %v7879_v46 }
 0x6a6   :  { %v3084_v55 = vpop.f32.mrb[92].mxu0  ;;  %v7302_v23 = vpop.f32.mrb[92].mxu1 }
 0x6a7   :  { %4974 = vtanh.f32 %v3029_v1  ;;  %v3030_v56 = vadd.f32 %v3028_v47, %v2911_v22  ;;  %v3134_v17 = vadd.f32 %v3084_v55, %v3043_v60  ;;  %v3086_v27 = vpop.f32.mrb[93].mxu0  ;;  %v4531_v15 = vpop.f32.mrb[93].mxu1 }
 0x6a8   :  { %4976 = vrcp.f32 %v3019_v58  ;;  %v3148_v52 = vadd.f32 %v3086_v27, %v3044_v61  ;;  %v3088_v50 = vpop.f32.mrb[94].mxu0  ;;  %v3130_v21 = vpop.f32.mrb[94].mxu1 }
 0x6a9   :  { %4978 = vtanh.f32 %v3030_v56  ;;  %v4001_v3 = vmul.f32 -1.442695, %v3134_v17  ;;  %v3135_v59 = vadd.f32 %v3088_v50, %v3046_v0  ;;  %v3090_v36 = vpop.f32.mrb[95].mxu0  ;;  %v4532_v10 = vpop.f32.mrb[95].mxu1  ;;  %v7880_v50 = vld [vmem:[#allocation34_spill] sm:$0xff] }
 0x6aa   :  { %4980 = vrcp.f32 %v3020_v41  ;;  %v3149_v2 = vadd.f32 %v3090_v36, %v3047_v42  ;;  %v4003_v60 = vmul.f32 -1.442695, %v3148_v52  ;;  %v7882_v10 = vld [vmem:[#allocation61_spill] sm:$0xff] }
 0x6ab   :  { %4982 = vpow2.f32 %v4001_v3  ;;  %v4002_v22 = vmul.f32 -1.442695, %v3135_v59  ;;  %v2295_v3 = vsel %vm2286_vm14, %v7880_v50, 0.0  ;;  %v7885_v52 = vld [vmem:[#allocation5_spill] sm:$0xff] }
 0x6ac   :  { %v4004_v17 = vmul.f32 -1.442695, %v3149_v2 }
 0x6ad   :  { %4984 = vpow2.f32 %v4002_v22  ;;  %v2296_v22 = vsel %vm2287_vm15, %v7882_v10, 0.0 }
 0x6ae   :  { %4986 = vpow2.f32 %v4003_v60 }
 0x6b1   :  { %v4975_v1 = vpop.eup %4974 }
 0x6b2   :  { %v4977_v47 = vpop.eup %4976  ;;  %v3033_v11 = vsub.f32 %v7053_v31, %v4975_v1 }
 0x6b3   :  { %v4979_v58 = vpop.eup %4978 }
 0x6b4   :  { %v4981_v55 = vpop.eup %4980  ;;  %v3035_v61 = vmul.f32 %v4977_v47, %v3033_v11  ;;  %v3034_v46 = vsub.f32 %v7060_v48, %v4979_v58 }
 0x6b5   :  { %v4983_v56 = vpop.eup %4982 }
 0x6b6   :  { %v3036_v27 = vmul.f32 %v4981_v55, %v3034_v46  ;;  %v3142_v15 = vadd.f32 1.0, %v4983_v56  ;;  %v3037_v0 = vadd.f32 %v4975_v1, %v3035_v61  ;;  %v7884_v56 = vld [vmem:[#allocation31_spill] sm:$0xff] }
 0x6b7   :  { %v4985_v41 = vpop.eup %4984  ;;  %v3048_v50 = vunpack.c.h.bf16 %v7884_v56 }
 0x6b8   :  { %4988 = vrcp.f32 %v3142_v15  ;;  %v3143_v59 = vadd.f32 1.0, %v4985_v41  ;;  %v3038_v36 = vadd.f32 %v4979_v58, %v3036_v27  ;;  %v7318_v2 = vsel %vm2286_vm14, %v3037_v0, %v7053_v31  ;;  %v4987_v31 = vpop.eup %4986 }
 0x6b9   :  { %4990 = vpow2.f32 %v4004_v17  ;;  %v3180_v1 = vsel %vm2286_vm14, %v3037_v0, 0.0  ;;  %v3045_v17 = vunpack.c.l.bf16 %v7884_v56  ;;  %v3163_v15 = vadd.f32 %v6806_v20, %v3130_v21 }
 0x6ba   :  { %4992 = vrcp.f32 %v3143_v59  ;;  %v7325_v47 = vsel %vm2287_vm15, %v3038_v36, %v7060_v48  ;;  %v3181_v11 = vsel %vm2287_vm15, %v3038_v36, 0.0  ;;  %v3797_v58 = vadd.f32 %v3180_v1, %v2295_v3 }
 0x6bb   :  { %v3203_v60 = vpack.c.bf16 %v7325_v47, %v7318_v2  ;;  %v3798_v55 = vadd.f32 %v3181_v11, %v2296_v22  ;;  %v3162_v48 = vadd.f32 %v6806_v20, %v7302_v23  ;;  %v3156_v41 = vadd.f32 1.0, %v4987_v31 }
 0x6bc   :  { %4047 = vst [vmem:[%s7645_s10 + $0x50] sm:$0xff] %v3797_v58 }
 0x6bd   :  { %3237 = vmatmul.mubr.bf16.vlgmr.msra.gmra.mrb[96].mxu0 %v3203_v60  ;;  %4048 = vst [vmem:[%s7645_s10 + $0x58] sm:$0xff] %v3798_v55  ;;  %4550 = vmatmul.mubr.bf16.vlgmr.msra.gmra.mrb[96].mxu1 %v3203_v60  ;;  %v7886_v60 = vld [vmem:[#allocation32_spill] sm:$0xff] }
 0x6be   :  { %3342 = vmatpush1.bf16.msra.mxu0 %v7075_v9  ;;  %4554 = vmatpush3.bf16.msra.mxu1 %v7081_v30 }
 0x6bf   :  { %3343 = vmatprep.subr.bf16.mxu0 %v7087_v49  ;;  %4555 = vmatprep.subr.bf16.mxu1 %v7792_v25 }
 0x6c0   :  { %3373 = vmatprep.mubr.bf16.mxu0 %v7793_v18  ;;  %4569 = vmatprep.mubr.msk.bf16.mxu1 %vm5184_vm8, %v7792_v25 }
 0x6c2   :  { %v4989_v61 = vpop.eup %4988  ;;  %3344 = vmatpush1.bf16.msra.mxu0 %v7099_v63  ;;  %4556 = vmatpush3.bf16.msra.mxu1 %v7105_v32 }
 0x6c3   :  { %v4991_v46 = vpop.eup %4990  ;;  %v3164_v27 = vmul.f32 %v4989_v61, %v3162_v48  ;;  %3345 = vmatprep.subr.bf16.mxu0 %v7114_v53  ;;  %4557 = vmatprep.subr.bf16.mxu1 %v7792_v25  ;;  %v4007_v48 = vld [vmem:[%s7645_s10 + $0x20] sm:$0xff] }
 0x6c4   :  { %v4993_v0 = vpop.eup %4992  ;;  %v3157_v59 = vadd.f32 1.0, %v4991_v46 }
 0x6c5   :  { %v3166_v23 = vadd.f32 %v3164_v27, %v3045_v17  ;;  %v3165_v42 = vmul.f32 %v4993_v0, %v3163_v15  ;;  %v4008_v0 = vld [vmem:[%s7645_s10 + $0x28] sm:$0xff] }
 0x6c6   :  { %3346 = vmatpush1.bf16.msra.mxu0 %v7122_v16  ;;  %4558 = vmatpush3.bf16.msra.mxu1 %v7128_v39 }
 0x6c7   :  { %4994 = vtanh.f32 %v3166_v23  ;;  %v3167_v3 = vadd.f32 %v3165_v42, %v3048_v50  ;;  %3347 = vmatprep.subr.bf16.mxu0 %v7134_v4  ;;  %4559 = vmatprep.subr.bf16.mxu1 %v7792_v25  ;;  %v7901_v23 = vld [vmem:[#allocation6_spill] sm:$0xff]  ;;  %v7902_v42 = vld [vmem:[#allocation7_spill] sm:$0xff] }
 0x6c8   :  { %4996 = vrcp.f32 %v3156_v41 }
 0x6c9   :  { %4998 = vtanh.f32 %v3167_v3  ;;  %v7903_v3 = vld [vmem:[#allocation18_spill] sm:$0xff] }
 0x6ca   :  { %3348 = vmatpush1.bf16.msra.mxu0 %v7141_v34  ;;  %4560 = vmatpush3.bf16.msra.mxu1 %v7147_v38  ;;  %5000 = vrcp.f32 %v3157_v59  ;;  %v3197_v59 = vunpack.c.l.bf16 %v7903_v3 }
 0x6cb   :  { %3349 = vmatprep.subr.bf16.mxu0 %v7153_v19  ;;  %4561 = vmatprep.subr.bf16.mxu1 %v7792_v25 }
 0x6ce   :  { %3350 = vmatpush1.bf16.msra.mxu0 %v7160_v45  ;;  %4562 = vmatpush3.bf16.msra.mxu1 %v7166_v14 }
 0x6cf   :  { %3351 = vmatprep.subr.bf16.mxu0 %v7172_v24  ;;  %4563 = vmatprep.subr.bf16.mxu1 %v7792_v25 }
 0x6d1   :  { %v4995_v20 = vpop.eup %4994 }
 0x6d2   :  { %v4997_v21 = vpop.eup %4996  ;;  %v3170_v36 = vsub.f32 %v7239_v5, %v4995_v20  ;;  %3352 = vmatpush1.bf16.msra.mxu0 %v7180_v28  ;;  %4564 = vmatpush3.bf16.msra.mxu1 %v7186_v29 }
 0x6d3   :  { %v4999_v10 = vpop.eup %4998  ;;  %3353 = vmatprep.subr.bf16.mxu0 %v7885_v52  ;;  %4565 = vmatprep.subr.bf16.mxu1 %v7792_v25 }
 0x6d4   :  { %v3172_v22 = vmul.f32 %v4997_v21, %v3170_v36  ;;  %v3171_v1 = vsub.f32 %v7244_v26, %v4999_v10  ;;  %v5001_v11 = vpop.eup %5000  ;;  %v7904_v36 = vld [vmem:[#allocation19_spill] sm:$0xff] }
 0x6d5   :  { %v3201_v61 = vunpack.c.h.bf16 %v7904_v36 }
 0x6d6   :  { %v3173_v58 = vmul.f32 %v5001_v11, %v3171_v1  ;;  %3354 = vmatpush1.bf16.msra.mxu0 %v7886_v60  ;;  %4566 = vmatpush3.bf16.msra.mxu1 %v7206_v57  ;;  %v3174_v55 = vadd.f32 %v4995_v20, %v3172_v22 }
 0x6d7   :  { %3355 = vmatprep.subr.bf16.mxu0 %v7212_v35  ;;  %4567 = vmatprep.subr.bf16.mxu1 %v7792_v25 }
 0x6d8   :  { %v3175_v31 = vadd.f32 %v4999_v10, %v3173_v58  ;;  %v3187_v46 = vsel %vm2274_vm12, %v3174_v55, 0.0  ;;  %v7385_v17 = vsel %vm2274_vm12, %v3174_v55, %v7239_v5  ;;  %v3198_v10 = vunpack.c.l.bf16 %v7904_v36 }
 0x6d9   :  { %v3189_v56 = vadd.f32 %v4007_v48, %v3187_v46  ;;  %v3200_v58 = vunpack.c.h.bf16 %v7903_v3 }
 0x6da   :  { %3356 = vmatpush1.bf16.msra.mxu0 %v7227_v44  ;;  %4568 = vmatpush3.bf16.msra.mxu1 %v7233_v51  ;;  %v7390_v15 = vsel %vm2275_vm13, %v3175_v31, %v7244_v26  ;;  %v3188_v41 = vsel %vm2275_vm13, %v3175_v31, 0.0  ;;  %v7900_v26 = vld [vmem:[#allocation54_spill] sm:$0xff] }
 0x6db   :  { %v3190_v50 = vadd.f32 %v4008_v0, %v3188_v41  ;;  %4009 = vst [vmem:[%s7645_s10 + $0x20] sm:$0xff] %v3189_v56  ;;  %v3340_v5 = vpack.c.bf16 %v7390_v15, %v7385_v17  ;;  %3495 = vmatprep.subr.bf16.mxu0 %v6867_v43  ;;  %4573 = vmatprep.subr.bf16.mxu1 %v7792_v25  ;;  %v7889_v43 = vld [vmem:[#allocation43_spill] sm:$0xff] }
 0x6dd   :  { %4010 = vst [vmem:[%s7645_s10 + $0x28] sm:$0xff] %v3190_v50  ;;  %3374 = vmatmul.mubr.bf16.vlgmr.msra.gmra.mrb[100].mxu0 %v3340_v5  ;;  %4570 = vmatmul.mubr.bf16.vlgmr.msra.gmra.mrb[100].mxu1 %v3340_v5 }
 0x6de   :  { %3496 = vmatpush1.bf16.msra.mxu0 %v6874_v40  ;;  %4574 = vmatpush3.bf16.msra.mxu1 %v6880_v12  ;;  %v7890_v40 = vld [vmem:[#allocation44_spill] sm:$0xff]  ;;  %v7891_v12 = vld [vmem:[#allocation45_spill] sm:$0xff] }
 0x6df   :  { %3497 = vmatprep.subr.bf16.mxu0 %v6886_v8  ;;  %4575 = vmatprep.subr.bf16.mxu1 %v7792_v25  ;;  %v7892_v8 = vld [vmem:[#allocation46_spill] sm:$0xff] }
 0x6e0   :  { %3527 = vmatprep.mubr.bf16.mxu0 %v7793_v18  ;;  %4589 = vmatprep.mubr.msk.bf16.mxu1 %vm5184_vm8, %v7792_v25 }
 0x6e2   :  { %3498 = vmatpush1.bf16.msra.mxu0 %v6896_v54  ;;  %4576 = vmatpush3.bf16.msra.mxu1 %v6902_v6  ;;  %v7893_v54 = vld [vmem:[#allocation47_spill] sm:$0xff]  ;;  %v7894_v6 = vld [vmem:[#allocation48_spill] sm:$0xff] }
 0x6e3   :  { %3499 = vmatprep.subr.bf16.mxu0 %v6908_v62  ;;  %4577 = vmatprep.subr.bf16.mxu1 %v7792_v25  ;;  %v7895_v62 = vld [vmem:[#allocation49_spill] sm:$0xff] }
 0x6e6   :  { %3500 = vmatpush1.bf16.msra.mxu0 %v6915_v37  ;;  %4578 = vmatpush3.bf16.msra.mxu1 %v6921_v33  ;;  %v7896_v37 = vld [vmem:[#allocation50_spill] sm:$0xff]  ;;  %v7897_v33 = vld [vmem:[#allocation51_spill] sm:$0xff] }
 0x6e7   :  { %3501 = vmatprep.subr.bf16.mxu0 %v6927_v13  ;;  %4579 = vmatprep.subr.bf16.mxu1 %v7792_v25  ;;  %v7898_v13 = vld [vmem:[#allocation52_spill] sm:$0xff] }
 0x6ea   :  { %3502 = vmatpush1.bf16.msra.mxu0 %v6934_v7  ;;  %4580 = vmatpush3.bf16.msra.mxu1 %v7889_v43  ;;  %v7899_v7 = vld [vmem:[#allocation53_spill] sm:$0xff] }
 0x6eb   :  { %3503 = vmatprep.subr.bf16.mxu0 %v7890_v40  ;;  %4581 = vmatprep.subr.bf16.mxu1 %v7792_v25 }
 0x6ee   :  { %3504 = vmatpush1.bf16.msra.mxu0 %v7891_v12  ;;  %4582 = vmatpush3.bf16.msra.mxu1 %v7892_v8 }
 0x6ef   :  { %3505 = vmatprep.subr.bf16.mxu0 %v7893_v54  ;;  %4583 = vmatprep.subr.bf16.mxu1 %v7792_v25 }
 0x6f2   :  { %3506 = vmatpush1.bf16.msra.mxu0 %v7894_v6  ;;  %4584 = vmatpush3.bf16.msra.mxu1 %v7895_v62  ;;  %v7449_v62 = vld [vmem:[%s7644_s8] ss:$0 sm:$0xff] }
 0x6f3   :  { %3507 = vmatprep.subr.bf16.mxu0 %v7896_v37  ;;  %4585 = vmatprep.subr.bf16.mxu1 %v7792_v25 }
 0x6f6   :  { %3508 = vmatpush1.bf16.msra.mxu0 %v7897_v33  ;;  %4586 = vmatpush3.bf16.msra.mxu1 %v7898_v13 }
 0x6f7   :  { %3509 = vmatprep.subr.bf16.mxu0 %v7899_v7  ;;  %4587 = vmatprep.subr.bf16.mxu1 %v7792_v25  ;;  %v7905_v7 = vld [vmem:[#allocation13_spill] sm:$0xff] }
 0x6fa   :  { %3510 = vmatpush1.bf16.msra.mxu0 %v7900_v26  ;;  %4588 = vmatpush3.bf16.msra.mxu1 %v7901_v23  ;;  %v3199_v26 = vunpack.c.l.bf16 %v7905_v7 }
 0x6fb   :  { %3631 = vmatprep.subr.bf16.mxu0 %v7902_v42  ;;  %4593 = vmatprep.subr.bf16.mxu1 %v7792_v25 }
 0x790   :  { %v3238_v20 = vpop.f32.mrb[96].mxu0  ;;  %v3281_v21 = vpop.f32.mrb[96].mxu1 }
 0x791   :  { %v3288_v22 = vadd.f32 %v3238_v20, %v3197_v59  ;;  %v3240_v1 = vpop.f32.mrb[97].mxu0  ;;  %v4551_v11 = vpop.f32.mrb[97].mxu1  ;;  %v3316_v37 = vadd.f32 %v7449_v62, %v3281_v21  ;;  %v3202_v20 = vunpack.c.h.bf16 %v7905_v7  ;;  %v7907_v21 = vld [vmem:[#allocation21_spill] sm:$0xff] }
 0x792   :  { %v3302_v55 = vadd.f32 %v3240_v1, %v3198_v10  ;;  %v3242_v31 = vpop.f32.mrb[98].mxu0  ;;  %v3284_v48 = vpop.f32.mrb[98].mxu1 }
 0x793   :  { %v4011_v46 = vmul.f32 -1.442695, %v3288_v22  ;;  %v3289_v56 = vadd.f32 %v3242_v31, %v3200_v58  ;;  %v3244_v27 = vpop.f32.mrb[99].mxu0  ;;  %v4552_v0 = vpop.f32.mrb[99].mxu1  ;;  %v3317_v42 = vadd.f32 %v7449_v62, %v3284_v48  ;;  %v7906_v22 = vld [vmem:[#allocation20_spill] sm:$0xff]  ;;  %v3335_v31 = vunpack.c.l.bf16 %v7907_v21 }
 0x794   :  { %v3303_v41 = vadd.f32 %v3244_v27, %v3201_v61  ;;  %v4013_v5 = vmul.f32 -1.442695, %v3302_v55  ;;  %v3334_v1 = vunpack.c.l.bf16 %v7906_v22  ;;  %v3337_v48 = vunpack.c.h.bf16 %v7906_v22 }
 0x795   :  { %5002 = vpow2.f32 %v4011_v46  ;;  %v4012_v50 = vmul.f32 -1.442695, %v3289_v56 }
 0x796   :  { %v4014_v40 = vmul.f32 -1.442695, %v3303_v41 }
 0x797   :  { %5004 = vpow2.f32 %v4012_v50 }
 0x798   :  { %5006 = vpow2.f32 %v4013_v5  ;;  %v3338_v5 = vunpack.c.h.bf16 %v7907_v21 }
 0x79f   :  { %v5003_v43 = vpop.eup %5002 }
 0x7a0   :  { %v3296_v12 = vadd.f32 1.0, %v5003_v43 }
 0x7a1   :  { %v5005_v8 = vpop.eup %5004 }
 0x7a2   :  { %5008 = vrcp.f32 %v3296_v12  ;;  %v3297_v54 = vadd.f32 1.0, %v5005_v8  ;;  %v5007_v6 = vpop.eup %5006 }
 0x7a3   :  { %5010 = vpow2.f32 %v4014_v40  ;;  %v3310_v59 = vadd.f32 1.0, %v5007_v6 }
 0x7a4   :  { %5012 = vrcp.f32 %v3297_v54 }
 0x7ac   :  { %v5009_v33 = vpop.eup %5008 }
 0x7ad   :  { %v5011_v13 = vpop.eup %5010  ;;  %v3318_v23 = vmul.f32 %v5009_v33, %v3316_v37 }
 0x7ae   :  { %v5013_v3 = vpop.eup %5012  ;;  %v3311_v11 = vadd.f32 1.0, %v5011_v13 }
 0x7af   :  { %v3320_v36 = vadd.f32 %v3318_v23, %v3199_v26  ;;  %v3319_v10 = vmul.f32 %v5013_v3, %v3317_v42 }
 0x7b0   :  { %v3375_v58 = vpop.f32.mrb[100].mxu0  ;;  %v7456_v55 = vpop.f32.mrb[100].mxu1 }
 0x7b1   :  { %5014 = vtanh.f32 %v3320_v36  ;;  %v3321_v61 = vadd.f32 %v3319_v10, %v3202_v20  ;;  %v3425_v46 = vadd.f32 %v3375_v58, %v3334_v1  ;;  %v3377_v56 = vpop.f32.mrb[101].mxu0  ;;  %v4571_v27 = vpop.f32.mrb[101].mxu1 }
 0x7b2   :  { %5016 = vrcp.f32 %v3310_v59  ;;  %v3439_v0 = vadd.f32 %v3377_v56, %v3335_v31  ;;  %v3379_v41 = vpop.f32.mrb[102].mxu0  ;;  %v3421_v50 = vpop.f32.mrb[102].mxu1 }
 0x7b3   :  { %5018 = vtanh.f32 %v3321_v61  ;;  %v4015_v43 = vmul.f32 -1.442695, %v3425_v46  ;;  %v3426_v40 = vadd.f32 %v3379_v41, %v3337_v48  ;;  %v3381_v12 = vpop.f32.mrb[103].mxu0  ;;  %v4572_v8 = vpop.f32.mrb[103].mxu1  ;;  %v7910_v46 = vld [vmem:[#allocation65_spill] sm:$0xff] }
 0x7b4   :  { %5020 = vrcp.f32 %v3311_v11  ;;  %v3440_v54 = vadd.f32 %v3381_v12, %v3338_v5  ;;  %v4017_v26 = vmul.f32 -1.442695, %v3439_v0  ;;  %v7908_v11 = vld [vmem:[#allocation62_spill] sm:$0xff]  ;;  %v1984_v27 = vsel %vm1975_vm11, %v7910_v46, 0.0 }
 0x7b5   :  { %5022 = vpow2.f32 %v4015_v43  ;;  %v4016_v6 = vmul.f32 -1.442695, %v3426_v40  ;;  %v1983_v21 = vsel %vm1974_vm10, %v7908_v11, 0.0 }
 0x7b6   :  { %v4018_v20 = vmul.f32 -1.442695, %v3440_v54 }
 0x7b7   :  { %5024 = vpow2.f32 %v4016_v6 }
 0x7b8   :  { %5026 = vpow2.f32 %v4017_v26 }
 0x7bb   :  { %v5015_v37 = vpop.eup %5014 }
 0x7bc   :  { %v5017_v33 = vpop.eup %5016  ;;  %v3324_v13 = vsub.f32 %v7318_v2, %v5015_v37 }
 0x7bd   :  { %v5019_v7 = vpop.eup %5018 }
 0x7be   :  { %v5021_v23 = vpop.eup %5020  ;;  %v3326_v42 = vmul.f32 %v5017_v33, %v3324_v13  ;;  %v3325_v3 = vsub.f32 %v7325_v47, %v5019_v7 }
 0x7bf   :  { %v5023_v59 = vpop.eup %5022 }
 0x7c0   :  { %v3327_v36 = vmul.f32 %v5021_v23, %v3325_v3  ;;  %v3433_v10 = vadd.f32 1.0, %v5023_v59  ;;  %v3328_v22 = vadd.f32 %v5015_v37, %v3326_v42  ;;  %v7916_v3 = vld [vmem:[#allocation23_spill] sm:$0xff] }
 0x7c1   :  { %v5025_v1 = vpop.eup %5024  ;;  %v3489_v59 = vunpack.c.l.bf16 %v7916_v3 }
 0x7c2   :  { %5028 = vrcp.f32 %v3433_v10  ;;  %v3434_v31 = vadd.f32 1.0, %v5025_v1  ;;  %v3329_v61 = vadd.f32 %v5019_v7, %v3327_v36  ;;  %v7472_v48 = vsel %vm1974_vm10, %v3328_v22, %v7318_v2  ;;  %v5027_v2 = vpop.eup %5026 }
 0x7c3   :  { %5030 = vpow2.f32 %v4018_v20  ;;  %v3471_v0 = vsel %vm1974_vm10, %v3328_v22, 0.0  ;;  %v3447_v33 = vadd.f32 1.0, %v5027_v2 }
 0x7c4   :  { %5032 = vrcp.f32 %v3434_v31  ;;  %v7479_v41 = vsel %vm1975_vm11, %v3329_v61, %v7325_v47  ;;  %v3472_v5 = vsel %vm1975_vm11, %v3329_v61, 0.0  ;;  %v3799_v43 = vadd.f32 %v3471_v0, %v1983_v21  ;;  %v7501_v47 = vld [vmem:[%s7646_s9] ss:$0 sm:$0xff] }
 0x7c5   :  { %v3494_v40 = vpack.c.bf16 %v7479_v41, %v7472_v48  ;;  %v3800_v12 = vadd.f32 %v3472_v5, %v1984_v27  ;;  %v3454_v6 = vadd.f32 %v7501_v47, %v3421_v50  ;;  %v3492_v21 = vunpack.c.h.bf16 %v7916_v3 }
 0x7c6   :  { %4049 = vst [vmem:[%s7645_s10 + $0x60] sm:$0xff] %v3799_v43 }
 0x7c7   :  { %3528 = vmatmul.mubr.bf16.vlgmr.msra.gmra.mrb[104].mxu0 %v3494_v40  ;;  %4050 = vst [vmem:[%s7645_s10 + $0x68] sm:$0xff] %v3800_v12  ;;  %4590 = vmatmul.mubr.bf16.vlgmr.msra.gmra.mrb[104].mxu1 %v3494_v40 }
 0x7c8   :  { %3632 = vmatpush1.bf16.msra.mxu0 %v7075_v9  ;;  %4594 = vmatpush3.bf16.msra.mxu1 %v7081_v30  ;;  %v3453_v9 = vadd.f32 %v7501_v47, %v7456_v55 }
 0x7c9   :  { %3633 = vmatprep.subr.bf16.mxu0 %v7087_v49  ;;  %4595 = vmatprep.subr.bf16.mxu1 %v7792_v25  ;;  %v7912_v49 = vld [vmem:[#allocation26_spill] sm:$0xff] }
 0x7ca   :  { %3663 = vmatprep.mubr.bf16.mxu0 %v7793_v18  ;;  %4609 = vmatprep.mubr.msk.bf16.mxu1 %vm5184_vm8, %v7792_v25  ;;  %v3336_v18 = vunpack.c.l.bf16 %v7912_v49  ;;  %v3339_v13 = vunpack.c.h.bf16 %v7912_v49 }
 0x7cc   :  { %v5029_v8 = vpop.eup %5028  ;;  %3634 = vmatpush1.bf16.msra.mxu0 %v7099_v63  ;;  %4596 = vmatpush3.bf16.msra.mxu1 %v7105_v32 }
 0x7cd   :  { %v5031_v30 = vpop.eup %5030  ;;  %v3455_v54 = vmul.f32 %v5029_v8, %v3453_v9  ;;  %3635 = vmatprep.subr.bf16.mxu0 %v7114_v53  ;;  %4597 = vmatprep.subr.bf16.mxu1 %v7792_v25 }
 0x7ce   :  { %v5033_v37 = vpop.eup %5032  ;;  %v3448_v32 = vadd.f32 1.0, %v5031_v30 }
 0x7cf   :  { %v3457_v55 = vadd.f32 %v3455_v54, %v3336_v18  ;;  %v3456_v7 = vmul.f32 %v5033_v37, %v3454_v6  ;;  %v7917_v54 = vld [vmem:[#allocation12_spill] sm:$0xff] }
 0x7d0   :  { %3636 = vmatpush1.bf16.msra.mxu0 %v7122_v16  ;;  %4598 = vmatpush3.bf16.msra.mxu1 %v7128_v39  ;;  %v3490_v6 = vunpack.c.l.bf16 %v7917_v54 }
 0x7d1   :  { %5034 = vtanh.f32 %v3457_v55  ;;  %v3458_v63 = vadd.f32 %v3456_v7, %v3339_v13  ;;  %3637 = vmatprep.subr.bf16.mxu0 %v7134_v4  ;;  %4599 = vmatprep.subr.bf16.mxu1 %v7792_v25  ;;  %v3493_v7 = vunpack.c.h.bf16 %v7917_v54 }
 0x7d2   :  { %5036 = vrcp.f32 %v3447_v33 }
 0x7d3   :  { %5038 = vtanh.f32 %v3458_v63 }
 0x7d4   :  { %3638 = vmatpush1.bf16.msra.mxu0 %v7141_v34  ;;  %4600 = vmatpush3.bf16.msra.mxu1 %v7147_v38  ;;  %5040 = vrcp.f32 %v3448_v32 }
 0x7d5   :  { %3639 = vmatprep.subr.bf16.mxu0 %v7153_v19  ;;  %4601 = vmatprep.subr.bf16.mxu1 %v7792_v25 }
 0x7d8   :  { %3640 = vmatpush1.bf16.msra.mxu0 %v7160_v45  ;;  %4602 = vmatpush3.bf16.msra.mxu1 %v7166_v14 }
 0x7d9   :  { %3641 = vmatprep.subr.bf16.mxu0 %v7172_v24  ;;  %4603 = vmatprep.subr.bf16.mxu1 %v7792_v25 }
 0x7db   :  { %v5035_v53 = vpop.eup %5034 }
 0x7dc   :  { %v5037_v16 = vpop.eup %5036  ;;  %v3461_v39 = vsub.f32 %v7385_v17, %v5035_v53  ;;  %3642 = vmatpush1.bf16.msra.mxu0 %v7180_v28  ;;  %4604 = vmatpush3.bf16.msra.mxu1 %v7186_v29  ;;  %v4021_v28 = vld [vmem:[%s7645_s10 + $0x10] sm:$0xff] }
 0x7dd   :  { %v5039_v4 = vpop.eup %5038  ;;  %3643 = vmatprep.subr.bf16.mxu0 %v7885_v52  ;;  %4605 = vmatprep.subr.bf16.mxu1 %v7792_v25 }
 0x7de   :  { %v3463_v34 = vmul.f32 %v5037_v16, %v3461_v39  ;;  %v3462_v38 = vsub.f32 %v7390_v15, %v5039_v4  ;;  %v5041_v19 = vpop.eup %5040 }
 0x7e0   :  { %v3464_v45 = vmul.f32 %v5041_v19, %v3462_v38  ;;  %3644 = vmatpush1.bf16.msra.mxu0 %v7886_v60  ;;  %4606 = vmatpush3.bf16.msra.mxu1 %v7206_v57  ;;  %v3465_v14 = vadd.f32 %v5035_v53, %v3463_v34  ;;  %v4022_v60 = vld [vmem:[%s7645_s10 + $0x18] sm:$0xff]  ;;  %v7919_v38 = vld [vmem:[#allocation17_spill] sm:$0xff] }
 0x7e1   :  { %3645 = vmatprep.subr.bf16.mxu0 %v7212_v35  ;;  %4607 = vmatprep.subr.bf16.mxu1 %v7792_v25  ;;  %v7918_v53 = vld [vmem:[#allocation16_spill] sm:$0xff]  ;;  %v3625_v19 = vunpack.c.l.bf16 %v7919_v38  ;;  %v3628_v25 = vunpack.c.h.bf16 %v7919_v38 }
 0x7e2   :  { %v3466_v24 = vadd.f32 %v5039_v4, %v3464_v45  ;;  %v3478_v52 = vsel %vm1962_vm7, %v3465_v14, 0.0  ;;  %v7544_v57 = vsel %vm1962_vm7, %v3465_v14, %v7385_v17  ;;  %v7915_v17 = vld [vmem:[#allocation22_spill] sm:$0xff]  ;;  %v3624_v16 = vunpack.c.l.bf16 %v7918_v53 }
 0x7e3   :  { %v3480_v50 = vadd.f32 %v4021_v28, %v3478_v52  ;;  %v3491_v22 = vunpack.c.h.bf16 %v7915_v17 }
 0x7e4   :  { %3646 = vmatpush1.bf16.msra.mxu0 %v7227_v44  ;;  %4608 = vmatpush3.bf16.msra.mxu1 %v7233_v51  ;;  %v7549_v35 = vsel %vm1963_vm9, %v3466_v24, %v7390_v15  ;;  %v3479_v26 = vsel %vm1963_vm9, %v3466_v24, 0.0  ;;  %v3488_v15 = vunpack.c.l.bf16 %v7915_v17 }
 0x7e5   :  { %v3481_v44 = vadd.f32 %v4022_v60, %v3479_v26  ;;  %4023 = vst [vmem:[%s7645_s10 + $0x10] sm:$0xff] %v3480_v50  ;;  %v3630_v51 = vpack.c.bf16 %v7549_v35, %v7544_v57 }
 0x7e7   :  { %4024 = vst [vmem:[%s7645_s10 + $0x18] sm:$0xff] %v3481_v44  ;;  %3664 = vmatmul.mubr.bf16.vlgmr.msra.gmra.mrb[108].mxu0 %v3630_v51  ;;  %4610 = vmatmul.mubr.bf16.vlgmr.msra.gmra.mrb[108].mxu1 %v3630_v51 }
 0x89a   :  { %v3529_v23 = vpop.f32.mrb[104].mxu0  ;;  %v3572_v42 = vpop.f32.mrb[104].mxu1 }
 0x89b   :  { %v3579_v20 = vadd.f32 %v3529_v23, %v3488_v15  ;;  %v3531_v36 = vpop.f32.mrb[105].mxu0  ;;  %v4591_v10 = vpop.f32.mrb[105].mxu1  ;;  %v3607_v30 = vadd.f32 %v7449_v62, %v3572_v42 }
 0x89c   :  { %v3593_v1 = vadd.f32 %v3531_v36, %v3489_v59  ;;  %v3533_v11 = vpop.f32.mrb[106].mxu0  ;;  %v3575_v58 = vpop.f32.mrb[106].mxu1 }
 0x89d   :  { %v4025_v31 = vmul.f32 -1.442695, %v3579_v20  ;;  %v3580_v61 = vadd.f32 %v3533_v11, %v3491_v22  ;;  %v3535_v46 = vpop.f32.mrb[107].mxu0  ;;  %v4592_v56 = vpop.f32.mrb[107].mxu1  ;;  %v3608_v33 = vadd.f32 %v7449_v62, %v3575_v58  ;;  %v3627_v62 = vunpack.c.h.bf16 %v7918_v53 }
 0x89e   :  { %v3594_v27 = vadd.f32 %v3535_v46, %v3492_v21  ;;  %v4027_v5 = vmul.f32 -1.442695, %v3593_v1 }
 0x89f   :  { %5042 = vpow2.f32 %v4025_v31  ;;  %v4026_v0 = vmul.f32 -1.442695, %v3580_v61 }
 0x8a0   :  { %v4028_v40 = vmul.f32 -1.442695, %v3594_v27 }
 0x8a1   :  { %5044 = vpow2.f32 %v4026_v0 }
 0x8a2   :  { %5046 = vpow2.f32 %v4027_v5  ;;  %v7921_v5 = vld [vmem:[#allocation57_spill] sm:$0xff] }
 0x8a9   :  { %v5043_v43 = vpop.eup %5042 }
 0x8aa   :  { %v3587_v12 = vadd.f32 1.0, %v5043_v43 }
 0x8ab   :  { %v5045_v2 = vpop.eup %5044 }
 0x8ac   :  { %5048 = vrcp.f32 %v3587_v12  ;;  %v3588_v9 = vadd.f32 1.0, %v5045_v2  ;;  %v5047_v8 = vpop.eup %5046 }
 0x8ad   :  { %5050 = vpow2.f32 %v4028_v40  ;;  %v3601_v55 = vadd.f32 1.0, %v5047_v8 }
 0x8ae   :  { %5052 = vrcp.f32 %v3588_v9 }
 0x8b6   :  { %v5049_v49 = vpop.eup %5048 }
 0x8b7   :  { %v5051_v18 = vpop.eup %5050  ;;  %v3609_v37 = vmul.f32 %v5049_v49, %v3607_v30 }
 0x8b8   :  { %v5053_v13 = vpop.eup %5052  ;;  %v3602_v39 = vadd.f32 1.0, %v5051_v18  ;;  %v7924_v18 = vld [vmem:[#allocation27_spill] sm:$0xff] }
 0x8b9   :  { %v3611_v63 = vadd.f32 %v3609_v37, %v3490_v6  ;;  %v3610_v32 = vmul.f32 %v5053_v13, %v3608_v33  ;;  %v3626_v54 = vunpack.c.l.bf16 %v7924_v18 }
 0x8ba   :  { %v3665_v4 = vpop.f32.mrb[108].mxu0  ;;  %v3708_v34 = vpop.f32.mrb[108].mxu1 }
 0x8bb   :  { %5054 = vtanh.f32 %v3611_v63  ;;  %v3612_v45 = vadd.f32 %v3610_v32, %v3493_v7  ;;  %v3715_v14 = vadd.f32 %v3665_v4, %v3624_v16  ;;  %v3667_v24 = vpop.f32.mrb[109].mxu0  ;;  %v4611_v28 = vpop.f32.mrb[109].mxu1  ;;  %v3743_v30 = vadd.f32 %v7501_v47, %v3708_v34 }
 0x8bc   :  { %5056 = vrcp.f32 %v3601_v55  ;;  %v3729_v29 = vadd.f32 %v3667_v24, %v3625_v19  ;;  %v3669_v52 = vpop.f32.mrb[110].mxu0  ;;  %v3711_v50 = vpop.f32.mrb[110].mxu1  ;;  %v3629_v63 = vunpack.c.h.bf16 %v7924_v18 }
 0x8bd   :  { %5058 = vtanh.f32 %v3612_v45  ;;  %v4029_v60 = vmul.f32 -1.442695, %v3715_v14  ;;  %v3716_v26 = vadd.f32 %v3669_v52, %v3627_v62  ;;  %v3671_v44 = vpop.f32.mrb[111].mxu0  ;;  %v4612_v51 = vpop.f32.mrb[111].mxu1  ;;  %v3744_v33 = vadd.f32 %v7501_v47, %v3711_v50 }
 0x8be   :  { %5060 = vrcp.f32 %v3602_v39  ;;  %v3730_v17 = vadd.f32 %v3671_v44, %v3628_v25  ;;  %v4031_v20 = vmul.f32 -1.442695, %v3729_v29  ;;  %v3766_v29 = vld [vmem:[%s7645_s10] sm:$0xff] }
 0x8bf   :  { %5062 = vpow2.f32 %v4029_v60  ;;  %v4030_v15 = vmul.f32 -1.442695, %v3716_v26  ;;  %v7926_v60 = vld [vmem:[#allocation39_spill] sm:$0xff]  ;;  %v3767_v26 = vld [vmem:[%s7645_s10 + $0x8] sm:$0xff] }
 0x8c0   :  { %v4032_v31 = vmul.f32 -1.442695, %v3730_v17  ;;  %vm7927_vm8 = vcmp.eq.s32.totalorder %v7926_v60, 1 }
 0x8c1   :  { %5064 = vpow2.f32 %v4030_v15 }
 0x8c2   :  { %5066 = vpow2.f32 %v4031_v20 }
 0x8c5   :  { %v5055_v23 = vpop.eup %5054 }
 0x8c6   :  { %v5057_v42 = vpop.eup %5056  ;;  %v3615_v3 = vsub.f32 %v7472_v48, %v5055_v23 }
 0x8c7   :  { %v5059_v59 = vpop.eup %5058 }
 0x8c8   :  { %v5061_v36 = vpop.eup %5060  ;;  %v3617_v10 = vmul.f32 %v5057_v42, %v3615_v3  ;;  %v3616_v22 = vsub.f32 %v7479_v41, %v5059_v59 }
 0x8c9   :  { %v5063_v1 = vpop.eup %5062 }
 0x8ca   :  { %v3619_v11 = vadd.f32 %v5055_v23, %v3617_v10  ;;  %v3618_v58 = vmul.f32 %v5061_v36, %v3616_v22  ;;  %v3723_v21 = vadd.f32 1.0, %v5063_v1 }
 0x8cb   :  { %v5065_v61 = vpop.eup %5064 }
 0x8cc   :  { %v3757_v56 = vsel %vm1667_vm4, %v3619_v11, %v7472_v48  ;;  %v3761_v27 = vsel %vm1667_vm4, %v3619_v11, 0.0  ;;  %v3620_v0 = vadd.f32 %v5059_v59, %v3618_v58  ;;  %5068 = vrcp.f32 %v3723_v21  ;;  %v7923_v48 = vld [vmem:[#allocation60_spill] sm:$0xff] }
 0x8cd   :  { %3774 = vst [vmem:[%s7647_s11] sm:$0xff] %v3757_v56  ;;  %v3801_v43 = vadd.f32 %v3761_v27, %v7921_v5  ;;  %v3724_v40 = vadd.f32 1.0, %v5065_v61  ;;  %5070 = vpow2.f32 %v4032_v31 }
 0x8ce   :  { %v3758_v2 = vsel %vm1668_vm5, %v3620_v0, %v7479_v41  ;;  %v3762_v9 = vsel %vm1668_vm5, %v3620_v0, 0.0  ;;  %v5067_v41 = vpop.eup %5066 }
 0x8cf   :  { %4051 = vst [vmem:[%s7645_s10 + $0x70] sm:$0xff] %v3801_v43  ;;  %3775 = vst [vmem:[%s7647_s11 + $0x8] sm:$0xff] %v3758_v2  ;;  %v3802_v8 = vadd.f32 %v3762_v9, %v7923_v48  ;;  %5072 = vrcp.f32 %v3724_v40  ;;  %v3737_v7 = vadd.f32 1.0, %v5067_v41 }
 0x8d1   :  { %4052 = vst [vmem:[%s7645_s10 + $0x78] sm:$0xff] %v3802_v8 }
 0x8d6   :  { %v5069_v49 = vpop.eup %5068 }
 0x8d7   :  { %v3745_v6 = vmul.f32 %v5069_v49, %v3743_v30  ;;  %v5071_v37 = vpop.eup %5070 }
 0x8d8   :  { %v3738_v16 = vadd.f32 1.0, %v5071_v37 }
 0x8d9   :  { %v5073_v13 = vpop.eup %5072  ;;  %v3747_v55 = vadd.f32 %v3745_v6, %v3626_v54 }
 0x8da   :  { %v3746_v32 = vmul.f32 %v5073_v13, %v3744_v33 }
 0x8db   :  { %5074 = vtanh.f32 %v3747_v55 }
 0x8dc   :  { %v3748_v53 = vadd.f32 %v3746_v32, %v3629_v63  ;;  %5076 = vrcp.f32 %v3737_v7 }
 0x8de   :  { %5078 = vtanh.f32 %v3748_v53 }
 0x8df   :  { %5080 = vrcp.f32 %v3738_v16 }
 0x8e5   :  { %v5075_v39 = vpop.eup %5074 }
 0x8e6   :  { %v3751_v4 = vsub.f32 %v7544_v57, %v5075_v39  ;;  %v5077_v34 = vpop.eup %5076 }
 0x8e8   :  { %v5079_v38 = vpop.eup %5078  ;;  %v3753_v19 = vmul.f32 %v5077_v34, %v3751_v4 }
 0x8e9   :  { %v3752_v47 = vsub.f32 %v7549_v35, %v5079_v38  ;;  %v5081_v45 = vpop.eup %5080 }
 0x8ea   :  { %v3755_v14 = vadd.f32 %v5075_v39, %v3753_v19 }
 0x8eb   :  { %v3754_v24 = vmul.f32 %v5081_v45, %v3752_v47 }
 0x8ec   :  { %v3759_v62 = vsel %vm1655_vm1, %v3755_v14, %v7544_v57  ;;  %v3768_v52 = vsel %vm1655_vm1, %v3755_v14, 0.0  ;;  %vm7928_vm1 = vmmov %vm7927_vm8 }
 0x8ed   :  { %v3770_v50 = vadd.f32 %v3768_v52, %v3766_v29  ;;  %4035 = vst [vmem:[%s7647_s11 + $0x10] sm:$0xff] %v3759_v62  ;;  %v3756_v25 = vadd.f32 %v5079_v38, %v3754_v24 }
 0x8ef   :  { %3772 = vst [vmem:[%s7645_s10] sm:$0xff] %v3770_v50  ;;  %v3760_v57 = vsel %vm7927_vm8, %v3756_v25, %v7549_v35  ;;  %v3769_v44 = vsel %vm7928_vm1, %v3756_v25, 0.0 }
 0x8f0   :  { %v3771_v51 = vadd.f32 %v3769_v44, %v3767_v26  ;;  %4036 = vst [vmem:[%s7647_s11 + $0x18] sm:$0xff] %v3760_v57 }
 0x8f2   :  { %3773 = vst [vmem:[%s7645_s10 + $0x8] sm:$0xff] %v3771_v51 }

</bundles_post_ra>
